<compile_context>
chip_gen: v7x
topology: tpu7x:2x2x1
jax: 0.10.0
libtpu: 0.0.40
codegen_flags: <defaults>
</compile_context>

<pallas_src>
import functools

import jax
import jax.numpy as jnp
from jax.experimental import pallas as pl
from jax.experimental.pallas import tpu as pltpu

BN_EPS = 1e-5
PAD = 8   # zero-padding rows kept at both ends of each VMEM activation; must be >= max(K)//2


def _round_up(a, b):
    return ((a + b - 1) // b) * b


# ---------------------------------------------------------------------------
# Fully-fused FCN body: conv1 -> conv2 -> conv3 -> global average pool.
# One grid step = one batch element; inter-layer activations stay in VMEM scratch.
# ---------------------------------------------------------------------------
def _fcn_fused_kernel(x_ref, w1_ref, b1_ref, w2_ref, b2_ref, w3_ref, b3_ref,
                      o_ref, act1, act2,
                      *, l_true, lpad, k2, k3, c1, c2, c3, r1, r2, r3):
    # Zero the "same"-padding halo rows of both scratch activations (rows [0,PAD) and
    # [PAD+lpad, PAD+lpad+PAD)).  Done every step so megacore sharding of the batch axis
    # never observes stale scratch.
    act1[0:PAD, :] = jnp.zeros((PAD, c1), jnp.bfloat16)
    act1[PAD + lpad:PAD + lpad + PAD, :] = jnp.zeros((PAD, c1), jnp.bfloat16)
    act2[0:PAD, :] = jnp.zeros((PAD, c2), jnp.bfloat16)
    act2[PAD + lpad:PAD + lpad + PAD, :] = jnp.zeros((PAD, c2), jnp.bfloat16)

    def epilogue(acc, b_ref, c0, rows):
        """bias + ReLU; mask rows past the true length only on the chunk that crosses it."""
        y = jnp.maximum(acc + b_ref[...], 0.0)
        if c0 < l_true < c0 + rows:            # statically resolved
            rid = c0 + jax.lax.broadcasted_iota(jnp.int32, (rows, 1), 0)
            y = jnp.where(rid < l_true, y, 0.0)
        return y

    # ---- Layer 1: pre-im2col'ed input (rows, K1*C_in) @ (K1*C_in, c1) ----------------------
    for c0 in range(0, lpad, r1):
        rows = min(r1, lpad - c0)
        if c0 >= l_true:                       # whole chunk past true length: just zero it
            act1[PAD + c0:PAD + c0 + rows, :] = jnp.zeros((rows, c1), jnp.bfloat16)
            continue
        acc = jnp.dot(x_ref[0, c0:c0 + rows, :], w1_ref[...],
                      preferred_element_type=jnp.float32)
        act1[PAD + c0:PAD + c0 + rows, :] = epilogue(acc, b1_ref, c0, rows).astype(jnp.bfloat16)

    # ---- Layer 2: im2col from act1 (K=k2), one matmul of contraction k2*c1 ------------------
    pad2 = k2 // 2
    for c0 in range(0, lpad, r2):
        rows = min(r2, lpad - c0)
        if c0 >= l_true:
            act2[PAD + c0:PAD + c0 + rows, :] = jnp.zeros((rows, c2), jnp.bfloat16)
            continue
        start = PAD + c0 - pad2
        lhs = jnp.concatenate(
            [act1[start + j:start + j + rows, :] for j in range(k2)], axis=1)
        acc = jnp.dot(lhs, w2_ref[...], preferred_element_type=jnp.float32)
        act2[PAD + c0:PAD + c0 + rows, :] = epilogue(acc, b2_ref, c0, rows).astype(jnp.bfloat16)

    # ---- Layer 3 + GAP: the (rows, c3) activation never leaves registers --------------------
    pad3 = k3 // 2
    gap = jnp.zeros((1, c3), jnp.float32)
    for c0 in range(0, lpad, r3):
        rows = min(r3, lpad - c0)
        if c0 >= l_true:                       # contributes nothing to the pooled sum
            continue
        start = PAD + c0 - pad3
        lhs = jnp.concatenate(
            [act2[start + j:start + j + rows, :] for j in range(k3)], axis=1)
        acc = jnp.dot(lhs, w3_ref[...], preferred_element_type=jnp.float32)
        y = epilogue(acc, b3_ref, c0, rows)
        gap = gap + jnp.sum(y, axis=0, keepdims=True)

    o_ref[0] = gap * (1.0 / float(l_true))


def fcn_fused(x_cols, w1, b1, w2, b2, w3, b3, *, l_true, r1=256, r2=128, r3=256):
    """x_cols: (B, lpad, K1*C_in) bf16 (layer-1 im2col, zero-padded past l_true in the conv
    window sense); wN: (KN*C_inN, C_outN) bf16 with BN scale folded in; bN: (1, C_outN) f32.
    Returns (B, 1, C_out3) f32 global-average-pooled features."""
    B, lpad, _ = x_cols.shape
    c1, c2, c3 = w1.shape[1], w2.shape[1], w3.shape[1]
    k2 = w2.shape[0] // c1
    k3 = w3.shape[0] // c2
    assert k2 // 2 <= PAD and k3 // 2 <= PAD, "kernel size too large for PAD halo rows"
    assert 0 < l_true <= lpad

    kernel = functools.partial(
        _fcn_fused_kernel, l_true=l_true, lpad=lpad, k2=k2, k3=k3,
        c1=c1, c2=c2, c3=c3, r1=r1, r2=r2, r3=r3)

    return pl.pallas_call(
        kernel,
        out_shape=jax.ShapeDtypeStruct((B, 1, c3), jnp.float32),
        grid_spec=pltpu.PrefetchScalarGridSpec(
            num_scalar_prefetch=0,
            grid=(B,),
            in_specs=[
                pl.BlockSpec((1, lpad, x_cols.shape[2]), lambda b: (b, 0, 0)),
                pl.BlockSpec(w1.shape, lambda b: (0, 0)),
                pl.BlockSpec(b1.shape, lambda b: (0, 0)),
                pl.BlockSpec(w2.shape, lambda b: (0, 0)),
                pl.BlockSpec(b2.shape, lambda b: (0, 0)),
                pl.BlockSpec(w3.shape, lambda b: (0, 0)),
                pl.BlockSpec(b3.shape, lambda b: (0, 0)),
            ],
            out_specs=pl.BlockSpec((1, 1, c3), lambda b: (b, 0, 0)),
            scratch_shapes=[
                pltpu.VMEM((lpad + 2 * PAD, c1), jnp.bfloat16),   # layer-1 activation
                pltpu.VMEM((lpad + 2 * PAD, c2), jnp.bfloat16),   # layer-2 activation
            ],
        ),
        compiler_params=pltpu.CompilerParams(dimension_semantics=("parallel",)),
    )(x_cols, w1, b1, w2, b2, w3, b3)


# ---------------------------------------------------------------------------
# Parameters (PyTorch conventions; eval-mode BN folded into weights/bias) and forward.
# ---------------------------------------------------------------------------
def init_params(key, c_in, n_classes, layers=(128, 256, 128), kss=(7, 5, 3)):
    convs = []
    ni = c_in
    for nf, ks in zip(layers, kss):
        key, k1, k2, k3, k4, k5, k6 = jax.random.split(key, 7)
        conv_w = 0.1 * jax.random.normal(k1, (nf, ni, ks), jnp.float32)   # (C_out, C_in, K)
        conv_b = 0.1 * jax.random.normal(k2, (nf,), jnp.float32)
        gamma = 1.0 + 0.1 * jax.random.normal(k3, (nf,), jnp.float32)
        beta = 0.1 * jax.random.normal(k4, (nf,), jnp.float32)
        run_mean = 0.1 * jax.random.normal(k5, (nf,), jnp.float32)
        run_var = 1.0 + 0.1 * jax.random.uniform(k6, (nf,), jnp.float32)
        # Fold BN (eval mode, running stats): y = conv_nb(x)*scale + (conv_b-mean)*scale + beta
        scale = gamma / jnp.sqrt(run_var + BN_EPS)
        bias = beta + (conv_b - run_mean) * scale
        w_taps = jnp.transpose(conv_w, (2, 1, 0)) * scale[None, None, :]  # (K, C_in, C_out)
        w_flat = w_taps.reshape(ks * ni, nf).astype(jnp.bfloat16)         # (K*C_in, C_out)
        convs.append((w_flat, bias.reshape(1, nf).astype(jnp.float32)))
        ni = nf
    key, kf1, kf2 = jax.random.split(key, 3)
    fc_w_pt = 0.1 * jax.random.normal(kf1, (n_classes, layers[-1]), jnp.float32)
    return {"convs": convs,
            "fc_w": fc_w_pt.T,                                            # (C, n_classes)
            "fc_b": 0.1 * jax.random.normal(kf2, (n_classes,), jnp.float32)}


def fcn_forward(x_ncl, params):
    """x_ncl: (B, C_in, L) float32 (PyTorch NCL layout) -> (B, n_classes) float32."""
    B, c_in, L = x_ncl.shape
    (w1, b1), (w2, b2), (w3, b3) = params["convs"]
    k1 = w1.shape[0] // c_in
    pad1 = k1 // 2
    lpad = _round_up(L, 16)

    # Layer-1 im2col in the wrapper (K1*C_in = 28 lanes): zero 'same' padding at both ends.
    x_blc = jnp.transpose(x_ncl, (0, 2, 1)).astype(jnp.bfloat16)          # (B, L, C_in)
    xp = jnp.pad(x_blc, ((0, 0), (pad1, pad1 + (lpad - L)), (0, 0)))
    x_cols = jnp.concatenate([xp[:, j:j + lpad, :] for j in range(k1)], axis=-1)

    pooled = fcn_fused(x_cols, w1, b1, w2, b2, w3, b3, l_true=L)[:, 0, :]  # (B, C) f32
    # Final Linear is tiny (lane-sparse output) -> plain XLA, not a custom call.
    return pooled @ params["fc_w"] + params["fc_b"]


def fcn_reference(x_ncl, params):
    """Pure-JAX reference mirroring kernel precision (bf16 operands, f32 accumulation)."""
    h = jnp.transpose(x_ncl, (0, 2, 1)).astype(jnp.bfloat16)
    convs = params["convs"]
    n = len(convs)
    for i, (w_flat, bias) in enumerate(convs):
        c_in_l = h.shape[2]
        c_out = w_flat.shape[1]
        K = w_flat.shape[0] // c_in_l
        w_taps = w_flat.reshape(K, c_in_l, c_out)
        pad = K // 2
        L = h.shape[1]
        hp = jnp.pad(h, ((0, 0), (pad, pad), (0, 0)))
        acc = sum(jnp.einsum("blc,cf->blf", hp[:, j:j + L, :], w_taps[j],
                             preferred_element_type=jnp.float32) for j in range(K))
        y = jnp.maximum(acc + bias.reshape(1, 1, c_out), 0.0)
        h = y if i == n - 1 else y.astype(jnp.bfloat16)
    gap = h.mean(axis=1)                                                  # f32
    return gap @ params["fc_w"] + params["fc_b"]


if __name__ == "__main__":
    # L=300 exercises multiple row chunks per layer (256/128/256) and tail-row masking
    # (lpad=304 > L), while staying small.
    B, C_IN, L, N_CLASSES = 2, 4, 300, 6
    key = jax.random.PRNGKey(0)
    key, kx = jax.random.split(key)
    x = jax.random.normal(kx, (B, C_IN, L), jnp.float32)    # PyTorch NCL input layout

    params = init_params(key, C_IN, N_CLASSES)

    fwd = jax.jit(fcn_forward)
    out = jax.block_until_ready(fwd(x, params))

    ref = fcn_reference(x, params)
    assert out.shape == (B, N_CLASSES)
    assert jnp.allclose(out, ref, rtol=2e-2, atol=2e-2), "mismatch vs reference"
    print("KERNEL_OK")
</pallas_src>

<mosaic_0001>
module attributes {stable_mosaic.version = 11 : i64} {
  func.func @_fcn_fused_kernel(%arg0: i32, %arg1: memref<1x304x28xbf16, #tpu.memory_space<vmem>>, %arg2: memref<28x128xbf16, #tpu.memory_space<vmem>>, %arg3: memref<1x128xf32, #tpu.memory_space<vmem>>, %arg4: memref<640x256xbf16, #tpu.memory_space<vmem>>, %arg5: memref<1x256xf32, #tpu.memory_space<vmem>>, %arg6: memref<768x128xbf16, #tpu.memory_space<vmem>>, %arg7: memref<1x128xf32, #tpu.memory_space<vmem>>, %arg8: memref<1x1x128xf32, #tpu.memory_space<vmem>>, %arg9: memref<320x128xbf16, #tpu.memory_space<vmem>>, %arg10: memref<320x256xbf16, #tpu.memory_space<vmem>>) attributes {dimension_semantics = [#tpu.dimension_semantics<parallel>], iteration_bounds = array<i64: 2>, scalar_prefetch = 0 : i64, scratch_operands = 2 : i64, tpu.core_type = #tpu.core_type<tc>, window_params = [{transform_indices = @transform_0, window_bounds = array<i64: 1, 304, 28>}, {pipeline_mode = #tpu.pipeline_mode<synchronous>, transform_indices = @transform_1, window_bounds = array<i64: 28, 128>}, {pipeline_mode = #tpu.pipeline_mode<synchronous>, transform_indices = @transform_2, window_bounds = array<i64: 1, 128>}, {pipeline_mode = #tpu.pipeline_mode<synchronous>, transform_indices = @transform_3, window_bounds = array<i64: 640, 256>}, {pipeline_mode = #tpu.pipeline_mode<synchronous>, transform_indices = @transform_4, window_bounds = array<i64: 1, 256>}, {pipeline_mode = #tpu.pipeline_mode<synchronous>, transform_indices = @transform_5, window_bounds = array<i64: 768, 128>}, {pipeline_mode = #tpu.pipeline_mode<synchronous>, transform_indices = @transform_6, window_bounds = array<i64: 1, 128>}, {transform_indices = @transform_7, window_bounds = array<i64: 1, 1, 128>}]} {
    %cst = arith.constant 0.000000e+00 : bf16
    %0 = vector.broadcast %cst : bf16 to vector<8x128xbf16>
    %c0 = arith.constant 0 : index
    %c0_0 = arith.constant 0 : index
    %1 = vector.load %arg9[%c0, %c0_0] : memref<320x128xbf16, #tpu.memory_space<vmem>>, vector<8x128xbf16>
    tpu.vector_store %arg9[%c0, %c0_0], %0 {strides = array<i32>} : memref<320x128xbf16, #tpu.memory_space<vmem>>, vector<8x128xbf16>,
    %cst_1 = arith.constant 0.000000e+00 : bf16
    %2 = vector.broadcast %cst_1 : bf16 to vector<8x128xbf16>
    %c312 = arith.constant 312 : index
    %c0_2 = arith.constant 0 : index
    %3 = vector.load %arg9[%c312, %c0_2] : memref<320x128xbf16, #tpu.memory_space<vmem>>, vector<8x128xbf16>
    tpu.vector_store %arg9[%c312, %c0_2], %2 {strides = array<i32>} : memref<320x128xbf16, #tpu.memory_space<vmem>>, vector<8x128xbf16>,
    %cst_3 = arith.constant 0.000000e+00 : bf16
    %4 = vector.broadcast %cst_3 : bf16 to vector<8x256xbf16>
    %c0_4 = arith.constant 0 : index
    %c0_5 = arith.constant 0 : index
    %5 = vector.load %arg10[%c0_4, %c0_5] : memref<320x256xbf16, #tpu.memory_space<vmem>>, vector<8x256xbf16>
    tpu.vector_store %arg10[%c0_4, %c0_5], %4 {strides = array<i32>} : memref<320x256xbf16, #tpu.memory_space<vmem>>, vector<8x256xbf16>,
    %cst_6 = arith.constant 0.000000e+00 : bf16
    %6 = vector.broadcast %cst_6 : bf16 to vector<8x256xbf16>
    %c312_7 = arith.constant 312 : index
    %c0_8 = arith.constant 0 : index
    %7 = vector.load %arg10[%c312_7, %c0_8] : memref<320x256xbf16, #tpu.memory_space<vmem>>, vector<8x256xbf16>
    tpu.vector_store %arg10[%c312_7, %c0_8], %6 {strides = array<i32>} : memref<320x256xbf16, #tpu.memory_space<vmem>>, vector<8x256xbf16>,
    %c0_9 = arith.constant 0 : index
    %c0_10 = arith.constant 0 : index
    %c0_11 = arith.constant 0 : index
    %8 = vector.load %arg1[%c0_9, %c0_10, %c0_11] : memref<1x304x28xbf16, #tpu.memory_space<vmem>>, vector<1x256x28xbf16>
    %9 = vector.shape_cast %8 : vector<1x256x28xbf16> to vector<256x28xbf16>
    %c0_12 = arith.constant 0 : index
    %c0_13 = arith.constant 0 : index
    %10 = vector.load %arg2[%c0_12, %c0_13] : memref<28x128xbf16, #tpu.memory_space<vmem>>, vector<28x128xbf16>
    %cst_14 = arith.constant dense<0.000000e+00> : vector<256x128xf32>
    %11 = tpu.matmul %9, %10, %cst_14 {dimension_numbers = #tpu.dot_dimension_numbers<[1], [0], [0], [1], [0, 0, 1, 1], [], []>} : vector<256x28xbf16>, vector<28x128xbf16>, vector<256x128xf32> -> vector<256x128xf32>
    %c0_15 = arith.constant 0 : index
    %c0_16 = arith.constant 0 : index
    %12 = vector.load %arg3[%c0_15, %c0_16] : memref<1x128xf32, #tpu.memory_space<vmem>>, vector<1x128xf32>
    %13 = vector.broadcast %12 : vector<1x128xf32> to vector<256x128xf32>
    %14 = arith.addf %11, %13 : vector<256x128xf32>
    %cst_17 = arith.constant 0.000000e+00 : f32
    %15 = vector.broadcast %cst_17 : f32 to vector<256x128xf32>
    %16 = arith.maximumf %14, %15 : vector<256x128xf32>
    %17 = arith.truncf %16 : vector<256x128xf32> to vector<256x128xbf16>
    %c8 = arith.constant 8 : index
    %c0_18 = arith.constant 0 : index
    %18 = vector.load %arg9[%c8, %c0_18] : memref<320x128xbf16, #tpu.memory_space<vmem>>, vector<256x128xbf16>
    tpu.vector_store %arg9[%c8, %c0_18], %17 {strides = array<i32>} : memref<320x128xbf16, #tpu.memory_space<vmem>>, vector<256x128xbf16>,
    %c0_19 = arith.constant 0 : index
    %c256 = arith.constant 256 : index
    %c0_20 = arith.constant 0 : index
    %19 = vector.load %arg1[%c0_19, %c256, %c0_20] : memref<1x304x28xbf16, #tpu.memory_space<vmem>>, vector<1x48x28xbf16>
    %20 = vector.shape_cast %19 : vector<1x48x28xbf16> to vector<48x28xbf16>
    %c0_21 = arith.constant 0 : index
    %c0_22 = arith.constant 0 : index
    %21 = vector.load %arg2[%c0_21, %c0_22] : memref<28x128xbf16, #tpu.memory_space<vmem>>, vector<28x128xbf16>
    %cst_23 = arith.constant dense<0.000000e+00> : vector<48x128xf32>
    %22 = tpu.matmul %20, %21, %cst_23 {dimension_numbers = #tpu.dot_dimension_numbers<[1], [0], [0], [1], [0, 0, 1, 1], [], []>} : vector<48x28xbf16>, vector<28x128xbf16>, vector<48x128xf32> -> vector<48x128xf32>
    %c0_24 = arith.constant 0 : index
    %c0_25 = arith.constant 0 : index
    %23 = vector.load %arg3[%c0_24, %c0_25] : memref<1x128xf32, #tpu.memory_space<vmem>>, vector<1x128xf32>
    %24 = vector.broadcast %23 : vector<1x128xf32> to vector<48x128xf32>
    %25 = arith.addf %22, %24 : vector<48x128xf32>
    %cst_26 = arith.constant 0.000000e+00 : f32
    %26 = vector.broadcast %cst_26 : f32 to vector<48x128xf32>
    %27 = arith.maximumf %25, %26 : vector<48x128xf32>
    %28 = tpu.iota {dimensions = array<i32: 0>} : vector<48x1xi32>
    %c256_i32 = arith.constant 256 : i32
    %29 = vector.broadcast %c256_i32 : i32 to vector<48x1xi32>
    %30 = arith.addi %29, %28 : vector<48x1xi32>
    %c300_i32 = arith.constant 300 : i32
    %31 = vector.broadcast %c300_i32 : i32 to vector<48x1xi32>
    %32 = arith.cmpi slt, %30, %31 : vector<48x1xi32>
    %cst_27 = arith.constant 0.000000e+00 : f32
    %33 = vector.shape_cast %32 : vector<48x1xi1> to vector<48x1xi1>
    %34 = vector.broadcast %33 : vector<48x1xi1> to vector<48x128xi1>
    %35 = vector.broadcast %cst_27 : f32 to vector<48x128xf32>
    %36 = arith.select %34, %27, %35 : vector<48x128xi1>, vector<48x128xf32>
    %37 = arith.truncf %36 : vector<48x128xf32> to vector<48x128xbf16>
    %c264 = arith.constant 264 : index
    %c0_28 = arith.constant 0 : index
    %38 = vector.load %arg9[%c264, %c0_28] : memref<320x128xbf16, #tpu.memory_space<vmem>>, vector<48x128xbf16>
    tpu.vector_store %arg9[%c264, %c0_28], %37 {strides = array<i32>} : memref<320x128xbf16, #tpu.memory_space<vmem>>, vector<48x128xbf16>,
    %c6 = arith.constant 6 : index
    %c0_29 = arith.constant 0 : index
    %39 = vector.load %arg9[%c6, %c0_29] : memref<320x128xbf16, #tpu.memory_space<vmem>>, vector<128x128xbf16>
    %c7 = arith.constant 7 : index
    %c0_30 = arith.constant 0 : index
    %40 = vector.load %arg9[%c7, %c0_30] : memref<320x128xbf16, #tpu.memory_space<vmem>>, vector<128x128xbf16>
    %c8_31 = arith.constant 8 : index
    %c0_32 = arith.constant 0 : index
    %41 = vector.load %arg9[%c8_31, %c0_32] : memref<320x128xbf16, #tpu.memory_space<vmem>>, vector<128x128xbf16>
    %c9 = arith.constant 9 : index
    %c0_33 = arith.constant 0 : index
    %42 = vector.load %arg9[%c9, %c0_33] : memref<320x128xbf16, #tpu.memory_space<vmem>>, vector<128x128xbf16>
    %c10 = arith.constant 10 : index
    %c0_34 = arith.constant 0 : index
    %43 = vector.load %arg9[%c10, %c0_34] : memref<320x128xbf16, #tpu.memory_space<vmem>>, vector<128x128xbf16>
    %44 = tpu.concatenate %39, %40, %41, %42, %43 in 1 : vector<128x128xbf16>, vector<128x128xbf16>, vector<128x128xbf16>, vector<128x128xbf16>, vector<128x128xbf16> -> vector<128x640xbf16>
    %c0_35 = arith.constant 0 : index
    %c0_36 = arith.constant 0 : index
    %45 = vector.load %arg4[%c0_35, %c0_36] : memref<640x256xbf16, #tpu.memory_space<vmem>>, vector<640x256xbf16>
    %cst_37 = arith.constant dense<0.000000e+00> : vector<128x256xf32>
    %46 = tpu.matmul %44, %45, %cst_37 {dimension_numbers = #tpu.dot_dimension_numbers<[1], [0], [0], [1], [0, 0, 1, 1], [], []>} : vector<128x640xbf16>, vector<640x256xbf16>, vector<128x256xf32> -> vector<128x256xf32>
    %c0_38 = arith.constant 0 : index
    %c0_39 = arith.constant 0 : index
    %47 = vector.load %arg5[%c0_38, %c0_39] : memref<1x256xf32, #tpu.memory_space<vmem>>, vector<1x256xf32>
    %48 = vector.broadcast %47 : vector<1x256xf32> to vector<128x256xf32>
    %49 = arith.addf %46, %48 : vector<128x256xf32>
    %cst_40 = arith.constant 0.000000e+00 : f32
    %50 = vector.broadcast %cst_40 : f32 to vector<128x256xf32>
    %51 = arith.maximumf %49, %50 : vector<128x256xf32>
    %52 = arith.truncf %51 : vector<128x256xf32> to vector<128x256xbf16>
    %c8_41 = arith.constant 8 : index
    %c0_42 = arith.constant 0 : index
    %53 = vector.load %arg10[%c8_41, %c0_42] : memref<320x256xbf16, #tpu.memory_space<vmem>>, vector<128x256xbf16>
    tpu.vector_store %arg10[%c8_41, %c0_42], %52 {strides = array<i32>} : memref<320x256xbf16, #tpu.memory_space<vmem>>, vector<128x256xbf16>,
    %c134 = arith.constant 134 : index
    %c0_43 = arith.constant 0 : index
    %54 = vector.load %arg9[%c134, %c0_43] : memref<320x128xbf16, #tpu.memory_space<vmem>>, vector<128x128xbf16>
    %c135 = arith.constant 135 : index
    %c0_44 = arith.constant 0 : index
    %55 = vector.load %arg9[%c135, %c0_44] : memref<320x128xbf16, #tpu.memory_space<vmem>>, vector<128x128xbf16>
    %c136 = arith.constant 136 : index
    %c0_45 = arith.constant 0 : index
    %56 = vector.load %arg9[%c136, %c0_45] : memref<320x128xbf16, #tpu.memory_space<vmem>>, vector<128x128xbf16>
    %c137 = arith.constant 137 : index
    %c0_46 = arith.constant 0 : index
    %57 = vector.load %arg9[%c137, %c0_46] : memref<320x128xbf16, #tpu.memory_space<vmem>>, vector<128x128xbf16>
    %c138 = arith.constant 138 : index
    %c0_47 = arith.constant 0 : index
    %58 = vector.load %arg9[%c138, %c0_47] : memref<320x128xbf16, #tpu.memory_space<vmem>>, vector<128x128xbf16>
    %59 = tpu.concatenate %54, %55, %56, %57, %58 in 1 : vector<128x128xbf16>, vector<128x128xbf16>, vector<128x128xbf16>, vector<128x128xbf16>, vector<128x128xbf16> -> vector<128x640xbf16>
    %c0_48 = arith.constant 0 : index
    %c0_49 = arith.constant 0 : index
    %60 = vector.load %arg4[%c0_48, %c0_49] : memref<640x256xbf16, #tpu.memory_space<vmem>>, vector<640x256xbf16>
    %cst_50 = arith.constant dense<0.000000e+00> : vector<128x256xf32>
    %61 = tpu.matmul %59, %60, %cst_50 {dimension_numbers = #tpu.dot_dimension_numbers<[1], [0], [0], [1], [0, 0, 1, 1], [], []>} : vector<128x640xbf16>, vector<640x256xbf16>, vector<128x256xf32> -> vector<128x256xf32>
    %c0_51 = arith.constant 0 : index
    %c0_52 = arith.constant 0 : index
    %62 = vector.load %arg5[%c0_51, %c0_52] : memref<1x256xf32, #tpu.memory_space<vmem>>, vector<1x256xf32>
    %63 = vector.broadcast %62 : vector<1x256xf32> to vector<128x256xf32>
    %64 = arith.addf %61, %63 : vector<128x256xf32>
    %cst_53 = arith.constant 0.000000e+00 : f32
    %65 = vector.broadcast %cst_53 : f32 to vector<128x256xf32>
    %66 = arith.maximumf %64, %65 : vector<128x256xf32>
    %67 = arith.truncf %66 : vector<128x256xf32> to vector<128x256xbf16>
    %c136_54 = arith.constant 136 : index
    %c0_55 = arith.constant 0 : index
    %68 = vector.load %arg10[%c136_54, %c0_55] : memref<320x256xbf16, #tpu.memory_space<vmem>>, vector<128x256xbf16>
    tpu.vector_store %arg10[%c136_54, %c0_55], %67 {strides = array<i32>} : memref<320x256xbf16, #tpu.memory_space<vmem>>, vector<128x256xbf16>,
    %c262 = arith.constant 262 : index
    %c0_56 = arith.constant 0 : index
    %69 = vector.load %arg9[%c262, %c0_56] : memref<320x128xbf16, #tpu.memory_space<vmem>>, vector<48x128xbf16>
    %c263 = arith.constant 263 : index
    %c0_57 = arith.constant 0 : index
    %70 = vector.load %arg9[%c263, %c0_57] : memref<320x128xbf16, #tpu.memory_space<vmem>>, vector<48x128xbf16>
    %c264_58 = arith.constant 264 : index
    %c0_59 = arith.constant 0 : index
    %71 = vector.load %arg9[%c264_58, %c0_59] : memref<320x128xbf16, #tpu.memory_space<vmem>>, vector<48x128xbf16>
    %c265 = arith.constant 265 : index
    %c0_60 = arith.constant 0 : index
    %72 = vector.load %arg9[%c265, %c0_60] : memref<320x128xbf16, #tpu.memory_space<vmem>>, vector<48x128xbf16>
    %c266 = arith.constant 266 : index
    %c0_61 = arith.constant 0 : index
    %73 = vector.load %arg9[%c266, %c0_61] : memref<320x128xbf16, #tpu.memory_space<vmem>>, vector<48x128xbf16>
    %74 = tpu.concatenate %69, %70, %71, %72, %73 in 1 : vector<48x128xbf16>, vector<48x128xbf16>, vector<48x128xbf16>, vector<48x128xbf16>, vector<48x128xbf16> -> vector<48x640xbf16>
    %c0_62 = arith.constant 0 : index
    %c0_63 = arith.constant 0 : index
    %75 = vector.load %arg4[%c0_62, %c0_63] : memref<640x256xbf16, #tpu.memory_space<vmem>>, vector<640x256xbf16>
    %cst_64 = arith.constant dense<0.000000e+00> : vector<48x256xf32>
    %76 = tpu.matmul %74, %75, %cst_64 {dimension_numbers = #tpu.dot_dimension_numbers<[1], [0], [0], [1], [0, 0, 1, 1], [], []>} : vector<48x640xbf16>, vector<640x256xbf16>, vector<48x256xf32> -> vector<48x256xf32>
    %c0_65 = arith.constant 0 : index
    %c0_66 = arith.constant 0 : index
    %77 = vector.load %arg5[%c0_65, %c0_66] : memref<1x256xf32, #tpu.memory_space<vmem>>, vector<1x256xf32>
    %78 = vector.broadcast %77 : vector<1x256xf32> to vector<48x256xf32>
    %79 = arith.addf %76, %78 : vector<48x256xf32>
    %cst_67 = arith.constant 0.000000e+00 : f32
    %80 = vector.broadcast %cst_67 : f32 to vector<48x256xf32>
    %81 = arith.maximumf %79, %80 : vector<48x256xf32>
    %82 = tpu.iota {dimensions = array<i32: 0>} : vector<48x1xi32>
    %c256_i32_68 = arith.constant 256 : i32
    %83 = vector.broadcast %c256_i32_68 : i32 to vector<48x1xi32>
    %84 = arith.addi %83, %82 : vector<48x1xi32>
    %c300_i32_69 = arith.constant 300 : i32
    %85 = vector.broadcast %c300_i32_69 : i32 to vector<48x1xi32>
    %86 = arith.cmpi slt, %84, %85 : vector<48x1xi32>
    %cst_70 = arith.constant 0.000000e+00 : f32
    %87 = vector.shape_cast %86 : vector<48x1xi1> to vector<48x1xi1>
    %88 = vector.broadcast %87 : vector<48x1xi1> to vector<48x256xi1>
    %89 = vector.broadcast %cst_70 : f32 to vector<48x256xf32>
    %90 = arith.select %88, %81, %89 : vector<48x256xi1>, vector<48x256xf32>
    %91 = arith.truncf %90 : vector<48x256xf32> to vector<48x256xbf16>
    %c264_71 = arith.constant 264 : index
    %c0_72 = arith.constant 0 : index
    %92 = vector.load %arg10[%c264_71, %c0_72] : memref<320x256xbf16, #tpu.memory_space<vmem>>, vector<48x256xbf16>
    tpu.vector_store %arg10[%c264_71, %c0_72], %91 {strides = array<i32>} : memref<320x256xbf16, #tpu.memory_space<vmem>>, vector<48x256xbf16>,
    %cst_73 = arith.constant 0.000000e+00 : f32
    %93 = vector.broadcast %cst_73 : f32 to vector<1x128xf32>
    %c7_74 = arith.constant 7 : index
    %c0_75 = arith.constant 0 : index
    %94 = vector.load %arg10[%c7_74, %c0_75] : memref<320x256xbf16, #tpu.memory_space<vmem>>, vector<256x256xbf16>
    %c8_76 = arith.constant 8 : index
    %c0_77 = arith.constant 0 : index
    %95 = vector.load %arg10[%c8_76, %c0_77] : memref<320x256xbf16, #tpu.memory_space<vmem>>, vector<256x256xbf16>
    %c9_78 = arith.constant 9 : index
    %c0_79 = arith.constant 0 : index
    %96 = vector.load %arg10[%c9_78, %c0_79] : memref<320x256xbf16, #tpu.memory_space<vmem>>, vector<256x256xbf16>
    %97 = tpu.concatenate %94, %95, %96 in 1 : vector<256x256xbf16>, vector<256x256xbf16>, vector<256x256xbf16> -> vector<256x768xbf16>
    %c0_80 = arith.constant 0 : index
    %c0_81 = arith.constant 0 : index
    %98 = vector.load %arg6[%c0_80, %c0_81] : memref<768x128xbf16, #tpu.memory_space<vmem>>, vector<768x128xbf16>
    %cst_82 = arith.constant dense<0.000000e+00> : vector<256x128xf32>
    %99 = tpu.matmul %97, %98, %cst_82 {dimension_numbers = #tpu.dot_dimension_numbers<[1], [0], [0], [1], [0, 0, 1, 1], [], []>} : vector<256x768xbf16>, vector<768x128xbf16>, vector<256x128xf32> -> vector<256x128xf32>
    %c0_83 = arith.constant 0 : index
    %c0_84 = arith.constant 0 : index
    %100 = vector.load %arg7[%c0_83, %c0_84] : memref<1x128xf32, #tpu.memory_space<vmem>>, vector<1x128xf32>
    %101 = vector.broadcast %100 : vector<1x128xf32> to vector<256x128xf32>
    %102 = arith.addf %99, %101 : vector<256x128xf32>
    %cst_85 = arith.constant 0.000000e+00 : f32
    %103 = vector.broadcast %cst_85 : f32 to vector<256x128xf32>
    %104 = arith.maximumf %102, %103 : vector<256x128xf32>
    %cst_86 = arith.constant dense<0.000000e+00> : vector<128xf32>
    %105 = vector.multi_reduction <add>, %104, %cst_86 [0] : vector<256x128xf32> to vector<128xf32>
    %106 = vector.shape_cast %105 : vector<128xf32> to vector<1x128xf32>
    %107 = arith.addf %93, %106 : vector<1x128xf32>
    %c263_87 = arith.constant 263 : index
    %c0_88 = arith.constant 0 : index
    %108 = vector.load %arg10[%c263_87, %c0_88] : memref<320x256xbf16, #tpu.memory_space<vmem>>, vector<48x256xbf16>
    %c264_89 = arith.constant 264 : index
    %c0_90 = arith.constant 0 : index
    %109 = vector.load %arg10[%c264_89, %c0_90] : memref<320x256xbf16, #tpu.memory_space<vmem>>, vector<48x256xbf16>
    %c265_91 = arith.constant 265 : index
    %c0_92 = arith.constant 0 : index
    %110 = vector.load %arg10[%c265_91, %c0_92] : memref<320x256xbf16, #tpu.memory_space<vmem>>, vector<48x256xbf16>
    %111 = tpu.concatenate %108, %109, %110 in 1 : vector<48x256xbf16>, vector<48x256xbf16>, vector<48x256xbf16> -> vector<48x768xbf16>
    %c0_93 = arith.constant 0 : index
    %c0_94 = arith.constant 0 : index
    %112 = vector.load %arg6[%c0_93, %c0_94] : memref<768x128xbf16, #tpu.memory_space<vmem>>, vector<768x128xbf16>
    %cst_95 = arith.constant dense<0.000000e+00> : vector<48x128xf32>
    %113 = tpu.matmul %111, %112, %cst_95 {dimension_numbers = #tpu.dot_dimension_numbers<[1], [0], [0], [1], [0, 0, 1, 1], [], []>} : vector<48x768xbf16>, vector<768x128xbf16>, vector<48x128xf32> -> vector<48x128xf32>
    %c0_96 = arith.constant 0 : index
    %c0_97 = arith.constant 0 : index
    %114 = vector.load %arg7[%c0_96, %c0_97] : memref<1x128xf32, #tpu.memory_space<vmem>>, vector<1x128xf32>
    %115 = vector.broadcast %114 : vector<1x128xf32> to vector<48x128xf32>
    %116 = arith.addf %113, %115 : vector<48x128xf32>
    %cst_98 = arith.constant 0.000000e+00 : f32
    %117 = vector.broadcast %cst_98 : f32 to vector<48x128xf32>
    %118 = arith.maximumf %116, %117 : vector<48x128xf32>
    %119 = tpu.iota {dimensions = array<i32: 0>} : vector<48x1xi32>
    %c256_i32_99 = arith.constant 256 : i32
    %120 = vector.broadcast %c256_i32_99 : i32 to vector<48x1xi32>
    %121 = arith.addi %120, %119 : vector<48x1xi32>
    %c300_i32_100 = arith.constant 300 : i32
    %122 = vector.broadcast %c300_i32_100 : i32 to vector<48x1xi32>
    %123 = arith.cmpi slt, %121, %122 : vector<48x1xi32>
    %cst_101 = arith.constant 0.000000e+00 : f32
    %124 = vector.shape_cast %123 : vector<48x1xi1> to vector<48x1xi1>
    %125 = vector.broadcast %124 : vector<48x1xi1> to vector<48x128xi1>
    %126 = vector.broadcast %cst_101 : f32 to vector<48x128xf32>
    %127 = arith.select %125, %118, %126 : vector<48x128xi1>, vector<48x128xf32>
    %cst_102 = arith.constant dense<0.000000e+00> : vector<128xf32>
    %128 = vector.multi_reduction <add>, %127, %cst_102 [0] : vector<48x128xf32> to vector<128xf32>
    %129 = vector.shape_cast %128 : vector<128xf32> to vector<1x128xf32>
    %130 = arith.addf %107, %129 : vector<1x128xf32>
    %cst_103 = arith.constant 0.00333333341 : f32
    %131 = vector.broadcast %cst_103 : f32 to vector<1x128xf32>
    %132 = arith.mulf %130, %131 : vector<1x128xf32>
    %c0_104 = arith.constant 0 : index
    %c0_105 = arith.constant 0 : index
    %c0_106 = arith.constant 0 : index
    %133 = vector.load %arg8[%c0_104, %c0_105, %c0_106] : memref<1x1x128xf32, #tpu.memory_space<vmem>>, vector<1x1x128xf32>
    %134 = vector.shape_cast %133 : vector<1x1x128xf32> to vector<1x128xf32>
    %135 = vector.shape_cast %132 : vector<1x128xf32> to vector<1x1x128xf32>
    tpu.vector_store %arg8[%c0_104, %c0_105, %c0_106], %135 {strides = array<i32>} : memref<1x1x128xf32, #tpu.memory_space<vmem>>, vector<1x1x128xf32>,
    return
  }
  func.func @transform_0(%arg0: i32) -> (i32, i32, i32) {
    %c0_i32 = arith.constant 0 : i32
    %c0_i32_0 = arith.constant 0 : i32
    %c0_i32_1 = arith.constant 0 : i32
    return %arg0, %c0_i32, %c0_i32_0 : i32, i32, i32
  }
  func.func @transform_1(%arg0: i32) -> (i32, i32) {
    %c0_i32 = arith.constant 0 : i32
    %c0_i32_0 = arith.constant 0 : i32
    %c0_i32_1 = arith.constant 0 : i32
    return %c0_i32, %c0_i32_0 : i32, i32
  }
  func.func @transform_2(%arg0: i32) -> (i32, i32) {
    %c0_i32 = arith.constant 0 : i32
    %c0_i32_0 = arith.constant 0 : i32
    %c0_i32_1 = arith.constant 0 : i32
    return %c0_i32, %c0_i32_0 : i32, i32
  }
  func.func @transform_3(%arg0: i32) -> (i32, i32) {
    %c0_i32 = arith.constant 0 : i32
    %c0_i32_0 = arith.constant 0 : i32
    %c0_i32_1 = arith.constant 0 : i32
    return %c0_i32, %c0_i32_0 : i32, i32
  }
  func.func @transform_4(%arg0: i32) -> (i32, i32) {
    %c0_i32 = arith.constant 0 : i32
    %c0_i32_0 = arith.constant 0 : i32
    %c0_i32_1 = arith.constant 0 : i32
    return %c0_i32, %c0_i32_0 : i32, i32
  }
  func.func @transform_5(%arg0: i32) -> (i32, i32) {
    %c0_i32 = arith.constant 0 : i32
    %c0_i32_0 = arith.constant 0 : i32
    %c0_i32_1 = arith.constant 0 : i32
    return %c0_i32, %c0_i32_0 : i32, i32
  }
  func.func @transform_6(%arg0: i32) -> (i32, i32) {
    %c0_i32 = arith.constant 0 : i32
    %c0_i32_0 = arith.constant 0 : i32
    %c0_i32_1 = arith.constant 0 : i32
    return %c0_i32, %c0_i32_0 : i32, i32
  }
  func.func @transform_7(%arg0: i32) -> (i32, i32, i32) {
    %c0_i32 = arith.constant 0 : i32
    %c0_i32_0 = arith.constant 0 : i32
    %c0_i32_1 = arith.constant 0 : i32
    return %arg0, %c0_i32, %c0_i32_0 : i32, i32, i32
  }
}

</mosaic_0001>

<bundles_post_ra>
// kernel: fcn_forward.1
= control target key start
LH: loop header
LB: loop body
LE: loop exit
PB: predicated region body
PF: predicated region fallthrough
CT: control target
= control target key end

     0   :  { %12 = vsyncpa [#allocation5], 0  ;;  %s8724_s24 = smov 0   ;;  %s11710_s0 = inlined_call_operand.vmem [shape: bf16[2,304,28], index: 0, kind: input, shape index: {}]   ;;  %s11711_s1 = inlined_call_operand.vmem [shape: bf16[28,128], index: 1, kind: input, shape index: {}]   ;;  %s11712_s2 = inlined_call_operand.vmem [shape: f32[1,128], index: 2, kind: input, shape index: {}]   ;;  %s11713_s3 = inlined_call_operand.hbm [shape: bf16[640,256], index: 3, kind: input, shape index: {}]   ;;  %s11714_s4 = inlined_call_operand.vmem [shape: f32[1,256], index: 4, kind: input, shape index: {}]   ;;  %s11715_s5 = inlined_call_operand.vmem [shape: bf16[768,128], index: 5, kind: input, shape index: {}]   ;;  %s11716_s6 = inlined_call_operand.vmem [shape: f32[1,128], index: 6, kind: input, shape index: {}]   ;;  %s11717_s7 = inlined_call_operand.vmem [shape: f32[2,1,128], index: 7, kind: output, shape index: {}]  }
   0x1 LB: > { %s8730_s25 = sadd.s32 4294967295, %s8676_s24   ;;  %p7110_p0 = scmp.ge.s32.totalorder %s8676_s24, 1  ;;  %s8676_s24 = sphi %s8724_s24, %s18_s24  }
   0x2   : > { %p201_p1 = scmp.lt.s32.totalorder %s8676_s24, 3  ;;  %s8678_s26 = smov [#allocation4]  }
   0x3   : > { %s219_s27 = sshll.u32 %s8678_s26, 4  ;;  %p11718_p3 = scmp.eq.s32.totalorder %s8730_s25, 0  ;;  %s220_s27 = int_to_ptr.vmem [resolvable:$true] %s219_s27 }
   0x4   : > { %p8734_p2 = pnand %p7110_p0, %p201_p1  ;;  %s8638_s9 = scalar_lea.hbm %s11713_s3, 10240 }
   0x5   : > { %p8639_p6 = scmp.ne.s32.totalorder %s11713_s3, %s8638_s9  ;;  %p8645_p10 = scmp.lt.u32.totalorder %s8638_s9, %s11713_s3 }
   0x6   : > { %s11765_s28 = scalar_select %p8734_p2, 1, 0 }
   0x7   : > { %p8214_p4 = pneg %p8734_p2 }
   0x9   : > { %p8743_p5 = pnand %p11718_p3, %p8214_p4 }
   0xb   : > { %p8640_p7 = pneg %p8743_p5 }
   0xd   : > { %p8641_p8 = pnand %p8640_p7, %p8639_p6 }
   0xf   : > { %p8642_p9 = pneg %p8641_p8 }
  0x11   : > { %p8647_p11 = pnand %p8645_p10, %p8642_p9 }
  0x13   : > { %8650 = shalt.err (!%p8647_p11)
}
  0x14   : > { %s8651_s14 = scalar_lea.vmem %s220_s27, 10240  ;;  %p8659_p1 = scmp.lt.s32.totalorder %s220_s27, %s220_s27 }
  0x15   : > { %p8652_p12 = scmp.ne.s32.totalorder %s220_s27, %s8651_s14  ;;  %p8660_p4 = scmp.lt.s32.totalorder %s8651_s14, %s8651_s14 }
  0x17   : > { %p8654_p13 = pnand %p8652_p12, %p8640_p7  ;;  %p8661_p3 = por %p8660_p4, %p8659_p1 }
  0x19   : > { %p8655_p0 = pneg %p8654_p13 }
  0x1b   : > { %p8662_p2 = pnand %p8661_p3, %p8655_p0 }
  0x1d   : > { %8665 = shalt.err (!%p8662_p2)
}
  0x1e   : > { %s8679_s15 = smov 128   ;;  %s8680_s16 = smov 8  }
  0x1f   : > { %8217 = dma.hbm_to_vmem [thread:$0]  (!%p8743_p5), %s11713_s3, 10240, %s220_s27, [#allocation5], %s8679_s15, %s8679_s15, %s8680_s16  }
  0x20   : > { %p11767_p6 = scmp.ne.s32.totalorder %s11765_s28, 0 }
  0x22   : > { %252 = sbr.rel (%p11767_p6) target bundleno = 1261 (0x4ed), region = 48 }
  0x29   : > { %p11768_p8 = scmp.eq.s32.totalorder %s8730_s25, 0 }
  0x2b   : > { %8671 = dma.done.wait (%p11768_p8), [#allocation5], 10240   ;;  %p11769_p7 = pmov %p11768_p8 }
  0x2c   : > { %p282_p2 = scmp.lt.s32.totalorder %s8730_s25, 1  ;;  %v8681_v0 = vmov 0.0   ;;  %vm8682_vm0 = vmmov 0   ;;  %vm480_vm1 = vcmask 1045504   ;;  %v8234_v1 = vld [vmem:[%s11711_s1] sm:$0xff]   ;;  %vm431_vm2 = vcmask 228352  }
  0x2d   : > { %8673 = vsyncadd (%p11769_p7), [#allocation5], 4294957056  ;;  %7948 = vmatprep.subr.bf16.mxu1 %v8681_v0  ;;  %7952 = vmatprep.mubr.msk.bf16.mxu1 %vm8682_vm0, %v8681_v0  ;;  %v8235_v2 = vld [vmem:[%s11711_s1 + $0x8] sm:$0x3f]   ;;  %v8252_v9 = vld [vmem:[%s11711_s1] sm:$0xff]   ;;  %v11720_v50 = vmov 0  }
  0x2e   : > { %s11849_s25 = smov (!%p282_p2, %s8730_s25), 1  ;;  %7912 = vmatprep.subr.bf16.mxu0 %v8234_v1  ;;  %v482_v4 = vsel %vm480_vm1, %v8235_v2, 0  ;;  %v8253_v10 = vld [vmem:[%s11711_s1 + $0x8] sm:$0x3f]   ;;  %7949 = vmatpush3.bf16.msra.mxu1 %v8252_v9  ;;  %v8262_v17 = vld [vmem:[#allocation4 + $0x14] ss:$8 sps:$4 sm:$0xff]  }
  0x2f   : > { %s8209_s19 = smul.u32 152, %s11849_s25  ;;  %7913 = vmatpush3.bf16.msra.mxu0 %v8234_v1  ;;  %7950 = vmatprep.subr.bf16.mxu1 %v8681_v0  ;;  %v828_v13 = vsel %vm480_vm1, %v8253_v10, 0  ;;  %v8257_v15 = vld [vmem:[#allocation4] ss:$8 sps:$4 sm:$0xff]   ;;  %v8259_v16 = vld [vmem:[#allocation4 + $0x4] ss:$8 sps:$4 sm:$0xff]   ;;  %s289_s29 = scalar_lea.vmem %s11717_s7, %s11849_s25 }
  0x30   : > { %8208 = vmatprep.subr.msk.bf16.mxu0 %vm480_vm1, %v8235_v2  ;;  %v8260_v18 = vld [vmem:[#allocation4 + $0x10] ss:$8 sps:$4 sm:$0xff]   ;;  %v8265_v20 = vld [vmem:[#allocation4 + $0x24] ss:$8 sps:$4 sm:$0xff]   ;;  %v8263_v23 = vld [vmem:[#allocation4 + $0x20] ss:$8 sps:$4 sm:$0xff]  }
  0x31   : > { %s8780_s22 = scalar_lea.vmem %s11710_s0, %s8209_s19  ;;  %v8268_v24 = vld [vmem:[#allocation4 + $0x34] ss:$8 sps:$4 sm:$0xff]   ;;  %v8266_v25 = vld [vmem:[#allocation4 + $0x30] ss:$8 sps:$4 sm:$0xff]   ;;  %v8271_v26 = vld [vmem:[#allocation4 + $0x44] ss:$8 sps:$4 sm:$0xff]  }
  0x32   : > { %v8236_v3 = vld [vmem:[%s8780_s22] sm:$0xff]   ;;  %v8237_v5 = vld [vmem:[%s8780_s22 + $0x8] sm:$0xff]   ;;  %v8238_v6 = vld [vmem:[%s8780_s22 + $0x10] sm:$0xff]   ;;  %7951 = vmatpush3.bf16.msra.mxu1 %v828_v13  ;;  %291 = vst [vmem:[#allocation2] sm:$0xf] %v11720_v50  ;;  %vm709_vm3 = vcmask 1043456  }
  0x33   : > { %7916 = vmatprep.mubr.msk.bf16.mxu0 %vm431_vm2, %v8236_v3  ;;  %7915 = vmatpush3.bf16.msra.mxu0 %v482_v4  ;;  %v8239_v7 = vld [vmem:[%s8780_s22 + $0x18] sm:$0xff]   ;;  %v8240_v8 = vld [vmem:[%s8780_s22 + $0x20] sm:$0xff]   ;;  %v8241_v11 = vld [vmem:[%s8780_s22 + $0x28] sm:$0xff]   ;;  %292 = vst [vmem:[#allocation2 + $0x98] sm:$0xf0] %v11720_v50  ;;  %vm1221_vm4 = vcmask 1044480  }
  0x34   : > { %v8242_v12 = vld [vmem:[%s8780_s22 + $0x30] sm:$0xff]   ;;  %v8254_v14 = vld [vmem:[%s8780_s22 + $0x80] sm:$0xff]   ;;  %1747 = vmatprep.subr.bf16.mxu0 %v8259_v16  ;;  %v8243_v19 = vld [vmem:[%s8780_s22 + $0x38] sm:$0xff]   ;;  %3009 = vmatprep.subr.bf16.mxu1 %v8259_v16  ;;  %293 = vst [vmem:[#allocation3] sm:$0xf] %v11720_v50  ;;  %vm1043_vm8 = vcmask 1046528  }
  0x35   : > { %7953 = vmatmul.mubr.msk.bf16.vlgmr.msra.gmra.mrb[0].mxu1 %vm431_vm2, %v8254_v14  ;;  %v8244_v21 = vld [vmem:[%s8780_s22 + $0x40] sm:$0xff]   ;;  %v8255_v22 = vld [vmem:[%s8780_s22 + $0x88] sm:$0xff]   ;;  %v8246_v28 = vld [vmem:[%s8780_s22 + $0x50] sm:$0xff]   ;;  %294 = vst [vmem:[#allocation3 + $0x8] sm:$0xf] %v11720_v50 }
  0x36   : > { %7917 = vmatmul.mubr.msk.bf16.vlgmr.msra.gmra.mrb[0].mxu0 %vm431_vm2, %v8237_v5  ;;  %7956 = vmatprep.mubr.msk.bf16.mxu1 %vm8682_vm0, %v8681_v0  ;;  %v8245_v27 = vld [vmem:[%s8780_s22 + $0x48] sm:$0xff]   ;;  %v8256_v29 = vld [vmem:[%s8780_s22 + $0x90] sm:$0xff]   ;;  %v8274_v31 = vld [vmem:[#allocation4 + $0x54] ss:$8 sps:$4 sm:$0xff]   ;;  %295 = vst [vmem:[#allocation3 + $0x130] sm:$0xf0] %v11720_v50 }
  0x37   : > { %7920 = vmatprep.mubr.msk.bf16.mxu0 %vm431_vm2, %v8238_v6  ;;  %1748 = vmatpush1.bf16.msra.mxu0 %v8257_v15  ;;  %v8269_v30 = vld [vmem:[#allocation4 + $0x40] ss:$8 sps:$4 sm:$0xff]   ;;  %v8272_v32 = vld [vmem:[#allocation4 + $0x50] ss:$8 sps:$4 sm:$0xff]   ;;  %v8277_v33 = vld [vmem:[#allocation4 + $0x64] ss:$8 sps:$4 sm:$0xff]  }
  0x38   : > { %1749 = vmatprep.subr.bf16.mxu0 %v8262_v17  ;;  %3010 = vmatpush1.bf16.msra.mxu1 %v8257_v15  ;;  %v8247_v34 = vld [vmem:[%s8780_s22 + $0x58] sm:$0xff]   ;;  %v8248_v35 = vld [vmem:[%s8780_s22 + $0x60] sm:$0xff]   ;;  %v8275_v36 = vld [vmem:[#allocation4 + $0x60] ss:$8 sps:$4 sm:$0xff]   ;;  %296 = vst [vmem:[#allocation3 + $0x138] sm:$0xf0] %v11720_v50 }
  0x39   : > { %3011 = vmatprep.subr.bf16.mxu1 %v8262_v17  ;;  %v8249_v37 = vld [vmem:[%s8780_s22 + $0x68] sm:$0xff]   ;;  %v8250_v38 = vld [vmem:[%s8780_s22 + $0x70] sm:$0xff]   ;;  %v8251_v39 = vld [vmem:[%s8780_s22 + $0x78] sm:$0xff]   ;;  %vm962_vm5 = vsmask.f32 7424 }
  0x3a   : > { %v8280_v40 = vld [vmem:[#allocation4 + $0x74] ss:$8 sps:$4 sm:$0xff]   ;;  %v8278_v41 = vld [vmem:[#allocation4 + $0x70] ss:$8 sps:$4 sm:$0xff]   ;;  %v8283_v42 = vld [vmem:[#allocation4 + $0x84] ss:$8 sps:$4 sm:$0xff]  }
  0x3b   : > { %1750 = vmatpush1.bf16.msra.mxu0 %v8260_v18  ;;  %v8281_v43 = vld [vmem:[#allocation4 + $0x80] ss:$8 sps:$4 sm:$0xff]   ;;  %v8286_v44 = vld [vmem:[#allocation4 + $0x94] ss:$8 sps:$4 sm:$0xff]   ;;  %v8284_v45 = vld [vmem:[#allocation4 + $0x90] ss:$8 sps:$4 sm:$0xff]  }
  0x3c   : > { %1751 = vmatprep.subr.bf16.mxu0 %v8265_v20  ;;  %3012 = vmatpush1.bf16.msra.mxu1 %v8260_v18  ;;  %v8289_v46 = vld [vmem:[#allocation4 + $0xa4] ss:$8 sps:$4 sm:$0xff]   ;;  %v8287_v47 = vld [vmem:[#allocation4 + $0xa0] ss:$8 sps:$4 sm:$0xff]   ;;  %v8292_v48 = vld [vmem:[#allocation4 + $0xb4] ss:$8 sps:$4 sm:$0xff]  }
  0x3d   : > { %7957 = vmatmul.mubr.msk.bf16.gmra.mrb[4].mxu1 %vm431_vm2, %v8255_v22  ;;  %3013 = vmatprep.subr.bf16.mxu1 %v8265_v20  ;;  %v8290_v49 = vld [vmem:[#allocation4 + $0xb0] ss:$8 sps:$4 sm:$0xff]   ;;  %v8295_v51 = vld [vmem:[#allocation4 + $0xc4] ss:$8 sps:$4 sm:$0xff]   ;;  %v8293_v52 = vld [vmem:[#allocation4 + $0xc0] ss:$8 sps:$4 sm:$0xff]  }
  0x3e   : > { %7921 = vmatmul.mubr.msk.bf16.gmra.mrb[4].mxu0 %vm431_vm2, %v8239_v7  ;;  %7960 = vmatprep.mubr.msk.bf16.mxu1 %vm8682_vm0, %v8681_v0  ;;  %v8298_v53 = vld [vmem:[#allocation4 + $0xd4] ss:$8 sps:$4 sm:$0xff]   ;;  %v8296_v54 = vld [vmem:[#allocation4 + $0xd0] ss:$8 sps:$4 sm:$0xff]   ;;  %v8301_v55 = vld [vmem:[#allocation4 + $0xe4] ss:$8 sps:$4 sm:$0xff]  }
  0x3f   : > { %7924 = vmatprep.mubr.msk.bf16.mxu0 %vm431_vm2, %v8240_v8  ;;  %1752 = vmatpush1.bf16.msra.mxu0 %v8263_v23  ;;  %v8299_v56 = vld [vmem:[#allocation4 + $0xe0] ss:$8 sps:$4 sm:$0xff]   ;;  %v8304_v57 = vld [vmem:[#allocation4 + $0xf4] ss:$8 sps:$4 sm:$0xff]   ;;  %v8302_v58 = vld [vmem:[#allocation4 + $0xf0] ss:$8 sps:$4 sm:$0xff]  }
  0x40   : > { %1753 = vmatprep.subr.bf16.mxu0 %v8268_v24  ;;  %3014 = vmatpush1.bf16.msra.mxu1 %v8263_v23  ;;  %v8307_v59 = vld [vmem:[#allocation4 + $0x104] ss:$8 sps:$4 sm:$0xff]   ;;  %v8849_v60 = vld [vmem:[%s11712_s2] ss:$0 sm:$0xff]  ;;  %vm1061_vm6 = vsmask.f32 6400 }
  0x41   : > { %3015 = vmatprep.subr.bf16.mxu1 %v8268_v24  ;;  %vm4868_vm9 = vsmask.f32 4352 }
  0x43   : > { %1754 = vmatpush1.bf16.msra.mxu0 %v8266_v25 }
  0x44   : > { %1755 = vmatprep.subr.bf16.mxu0 %v8271_v26  ;;  %3016 = vmatpush1.bf16.msra.mxu1 %v8266_v25 }
  0x45   : > { %7961 = vmatmul.mubr.msk.bf16.gmra.mrb[8].mxu1 %vm431_vm2, %v8256_v29  ;;  %3017 = vmatprep.subr.bf16.mxu1 %v8271_v26 }
  0x46   : > { %7925 = vmatmul.mubr.msk.bf16.gmra.mrb[8].mxu0 %vm431_vm2, %v8241_v11 }
  0x47   : > { %7928 = vmatprep.mubr.msk.bf16.mxu0 %vm431_vm2, %v8242_v12  ;;  %1756 = vmatpush1.bf16.msra.mxu0 %v8269_v30 }
  0x48   : > { %1757 = vmatprep.subr.bf16.mxu0 %v8274_v31  ;;  %3018 = vmatpush1.bf16.msra.mxu1 %v8269_v30 }
  0x49   : > { %3019 = vmatprep.subr.bf16.mxu1 %v8274_v31 }
  0x4b   : > { %1758 = vmatpush1.bf16.msra.mxu0 %v8272_v32 }
  0x4c   : > { %1759 = vmatprep.subr.bf16.mxu0 %v8277_v33  ;;  %3020 = vmatpush1.bf16.msra.mxu1 %v8272_v32 }
  0x4d   : > { %3021 = vmatprep.subr.bf16.mxu1 %v8277_v33 }
  0x4e   : > { %7929 = vmatmul.mubr.msk.bf16.gmra.mrb[12].mxu0 %vm431_vm2, %v8243_v19 }
  0x4f   : > { %7932 = vmatprep.mubr.msk.bf16.mxu0 %vm431_vm2, %v8244_v21  ;;  %1760 = vmatpush1.bf16.msra.mxu0 %v8275_v36 }
  0x50   : > { %3022 = vmatpush1.bf16.msra.mxu1 %v8275_v36  ;;  %1761 = vmatprep.subr.bf16.mxu0 %v8280_v40 }
  0x51   : > { %3023 = vmatprep.subr.bf16.mxu1 %v8280_v40 }
  0x53   : > { %1762 = vmatpush1.bf16.msra.mxu0 %v8278_v41 }
  0x54   : > { %3024 = vmatpush1.bf16.msra.mxu1 %v8278_v41  ;;  %1763 = vmatprep.subr.bf16.mxu0 %v8283_v42 }
  0x55   : > { %3025 = vmatprep.subr.bf16.mxu1 %v8283_v42 }
  0x56   : > { %7933 = vmatmul.mubr.msk.bf16.gmra.mrb[16].mxu0 %vm431_vm2, %v8245_v27 }
  0x57   : > { %7936 = vmatprep.mubr.msk.bf16.mxu0 %vm431_vm2, %v8246_v28  ;;  %1764 = vmatpush1.bf16.msra.mxu0 %v8281_v43 }
  0x58   : > { %3026 = vmatpush1.bf16.msra.mxu1 %v8281_v43  ;;  %1765 = vmatprep.subr.bf16.mxu0 %v8286_v44 }
  0x59   : > { %3027 = vmatprep.subr.bf16.mxu1 %v8286_v44 }
  0x5b   : > { %1766 = vmatpush1.bf16.msra.mxu0 %v8284_v45 }
  0x5c   : > { %3028 = vmatpush1.bf16.msra.mxu1 %v8284_v45  ;;  %1767 = vmatprep.subr.bf16.mxu0 %v8289_v46 }
  0x5d   : > { %3029 = vmatprep.subr.bf16.mxu1 %v8289_v46 }
  0x5e   : > { %7937 = vmatmul.mubr.msk.bf16.gmra.mrb[20].mxu0 %vm431_vm2, %v8247_v34 }
  0x5f   : > { %7940 = vmatprep.mubr.msk.bf16.mxu0 %vm431_vm2, %v8248_v35  ;;  %1768 = vmatpush1.bf16.msra.mxu0 %v8287_v47 }
  0x60   : > { %3030 = vmatpush1.bf16.msra.mxu1 %v8287_v47  ;;  %1769 = vmatprep.subr.bf16.mxu0 %v8292_v48 }
  0x61   : > { %3031 = vmatprep.subr.bf16.mxu1 %v8292_v48 }
  0x63   : > { %1770 = vmatpush1.bf16.msra.mxu0 %v8290_v49 }
  0x64   : > { %3032 = vmatpush1.bf16.msra.mxu1 %v8290_v49  ;;  %1771 = vmatprep.subr.bf16.mxu0 %v8295_v51 }
  0x65   : > { %3033 = vmatprep.subr.bf16.mxu1 %v8295_v51 }
  0x66   : > { %7941 = vmatmul.mubr.msk.bf16.gmra.mrb[24].mxu0 %vm431_vm2, %v8249_v37 }
  0x67   : > { %7944 = vmatprep.mubr.msk.bf16.mxu0 %vm431_vm2, %v8250_v38  ;;  %1772 = vmatpush1.bf16.msra.mxu0 %v8293_v52 }
  0x68   : > { %3034 = vmatpush1.bf16.msra.mxu1 %v8293_v52  ;;  %1773 = vmatprep.subr.bf16.mxu0 %v8298_v53 }
  0x69   : > { %3035 = vmatprep.subr.bf16.mxu1 %v8298_v53 }
  0x6b   : > { %1774 = vmatpush1.bf16.msra.mxu0 %v8296_v54 }
  0x6c   : > { %3036 = vmatpush1.bf16.msra.mxu1 %v8296_v54  ;;  %1775 = vmatprep.subr.bf16.mxu0 %v8301_v55 }
  0x6d   : > { %3037 = vmatprep.subr.bf16.mxu1 %v8301_v55 }
  0x6e   : > { %7945 = vmatmul.mubr.msk.bf16.gmra.mrb[28].mxu0 %vm431_vm2, %v8251_v39 }
  0x6f   : > { %1776 = vmatpush1.bf16.msra.mxu0 %v8299_v56 }
  0x70   : > { %3038 = vmatpush1.bf16.msra.mxu1 %v8299_v56  ;;  %1777 = vmatprep.subr.bf16.mxu0 %v8304_v57 }
  0x71   : > { %3039 = vmatprep.subr.bf16.mxu1 %v8304_v57 }
  0x73   : > { %1778 = vmatpush1.bf16.msra.mxu0 %v8302_v58 }
  0x74   : > { %3040 = vmatpush1.bf16.msra.mxu1 %v8302_v58  ;;  %1860 = vmatprep.subr.bf16.mxu0 %v8307_v59 }
  0x75   : > { %3122 = vmatprep.subr.bf16.mxu1 %v8307_v59 }
 0x108   : > { %v8865_v33 = vpop.f32.mrb[0].mxu1 }
 0x109   : > { %v7918_v61 = vpop.f32.mrb[0].mxu0  ;;  %v7954_v38 = vpop.f32.mrb[1].mxu1 }
 0x10a   : > { %v527_v62 = vadd.f32 %v7918_v61, %v8849_v60  ;;  %v518_v63 = vpop.f32.mrb[1].mxu0  ;;  %v8872_v44 = vpop.f32.mrb[2].mxu1 }
 0x10b   : > { %v519_v0 = vadd.f32 %v8849_v60, %v518_v63  ;;  %v7919_v1 = vpop.f32.mrb[2].mxu0  ;;  %v7955_v49 = vpop.f32.mrb[3].mxu1 }
 0x10c   : > { %v530_v2 = vadd.f32 %v7919_v1, %v8849_v60  ;;  %v521_v3 = vpop.f32.mrb[3].mxu0  ;;  %v647_v5 = vmax.f32 %v527_v62, 0.0 }
 0x10d   : > { %v522_v4 = vadd.f32 %v8849_v60, %v521_v3  ;;  %v645_v7 = vmax.f32 %v519_v0, 0.0 }
 0x10e   : > { %v648_v6 = vmax.f32 %v530_v2, 0.0 }
 0x10f   : > { %v646_v8 = vmax.f32 %v522_v4, 0.0 }
 0x110   : > { %v678_v9 = vpack.c.bf16 %v648_v6, %v647_v5 }
 0x111   : > { %v677_v10 = vpack.c.bf16 %v646_v8, %v645_v7  ;;  %v7922_v11 = vpop.f32.mrb[4].mxu0  ;;  %v8896_v8 = vpop.f32.mrb[4].mxu1 }
 0x112   : > { %v711_v12 = vrot.slane %v678_v9, 4  ;;  %v543_v13 = vadd.f32 %v7922_v11, %v8849_v60  ;;  %v534_v14 = vpop.f32.mrb[5].mxu0 }
 0x113   : > { %v710_v15 = vrot.slane %v677_v10, 4  ;;  %v535_v16 = vadd.f32 %v8849_v60, %v534_v14  ;;  %v7923_v17 = vpop.f32.mrb[6].mxu0  ;;  %v7958_v14 = vpop.f32.mrb[5].mxu1 }
 0x114   : > { %v651_v18 = vmax.f32 %v543_v13, 0.0  ;;  %v546_v19 = vadd.f32 %v7923_v17, %v8849_v60  ;;  %v537_v20 = vpop.f32.mrb[7].mxu0 }
 0x115   : > { %v8859_v21 = vsel %vm709_vm3, %v710_v15, %v711_v12  ;;  %758 = vst [vmem:[#allocation2] sm:$0xf0] %v710_v15  ;;  %v538_v22 = vadd.f32 %v8849_v60, %v537_v20  ;;  %v649_v24 = vmax.f32 %v535_v16, 0.0  ;;  %v8905_v20 = vpop.f32.mrb[6].mxu1 }
 0x116   : > { %759 = vst [vmem:[#allocation2 + $0x8] sm:$0xff] %v8859_v21  ;;  %v652_v23 = vmax.f32 %v546_v19, 0.0  ;;  %v11733_v26 = vshll.u32 %v8859_v21, 16  ;;  %v11736_v43 = vshrl.u32 %v8859_v21, 16  ;;  %v1223_v1 = vrot.slane %v8859_v21, 3 }
 0x117   : > { %v650_v25 = vmax.f32 %v538_v22, 0.0 }
 0x118   : > { %v680_v27 = vpack.c.bf16 %v652_v23, %v651_v18  ;;  %v973_v37 = vrot.slane %v11733_v26, 1 }
 0x119   : > { %v679_v28 = vpack.c.bf16 %v650_v25, %v649_v24  ;;  %v7926_v29 = vpop.f32.mrb[8].mxu0 }
 0x11a   : > { %v715_v30 = vrot.slane %v680_v27, 4  ;;  %v559_v31 = vadd.f32 %v7926_v29, %v8849_v60  ;;  %v550_v32 = vpop.f32.mrb[9].mxu0  ;;  %v977_v55 = vor.u32 %v11736_v43, %v973_v37  ;;  %v7959_v27 = vpop.f32.mrb[7].mxu1 }
 0x11b   : > { %v713_v34 = vrot.slane %v679_v28, 4  ;;  %v551_v35 = vadd.f32 %v8849_v60, %v550_v32  ;;  %v7927_v36 = vpop.f32.mrb[10].mxu0 }
 0x11c   : > { %v655_v39 = vmax.f32 %v559_v31, 0.0  ;;  %v562_v40 = vadd.f32 %v7927_v36, %v8849_v60  ;;  %v553_v41 = vpop.f32.mrb[11].mxu0  ;;  %v949_v42 = vld [vmem:[#allocation2] sm:$0xf8] }
 0x11d   : > { %v8875_v45 = vsel %vm709_vm3, %v711_v12, %v713_v34  ;;  %v8878_v46 = vsel %vm709_vm3, %v713_v34, %v715_v30  ;;  %v653_v47 = vmax.f32 %v551_v35, 0.0  ;;  %v554_v48 = vadd.f32 %v8849_v60, %v553_v41  ;;  %v8922_v34 = vld [vmem:[#allocation4 + $0x100] ss:$8 sps:$4 sm:$0xff]  }
 0x11e   : > { %760 = vst [vmem:[#allocation2 + $0x10] sm:$0xff] %v8875_v45  ;;  %761 = vst [vmem:[#allocation2 + $0x18] sm:$0xff] %v8878_v46  ;;  %v656_v51 = vmax.f32 %v562_v40, 0.0  ;;  %v966_v52 = vshll.u32 %v949_v42, 16  ;;  %v11734_v53 = vshll.u32 %v8875_v45, 16  ;;  %v11731_v56 = vshll.u32 %v8878_v46, 16 }
 0x11f   : > { %v654_v54 = vmax.f32 %v554_v48, 0.0  ;;  %v964_v58 = vshrl.u32 %v949_v42, 16  ;;  %v1222_v0 = vrot.slane %v949_v42, 3  ;;  %v11735_v2 = vshrl.u32 %v8875_v45, 16  ;;  %v8932_v40 = vld [vmem:[#allocation4 + $0x114] ss:$8 sps:$4 sm:$0xff]  }
 0x120   : > { %v8887_v57 = vpack.c.bf16 %v656_v51, %v655_v39  ;;  %v968_v59 = vrot.slane %v966_v52, 1  ;;  %v981_v61 = vrot.slane %v11734_v53, 1  ;;  %v989_v13 = vrot.slane %v11731_v56, 1  ;;  %v9137_v53 = vld [vmem:[#allocation4 + $0x174] ss:$8 sps:$4 sm:$0xff]  }
 0x121   : > { %v681_v62 = vpack.c.bf16 %v654_v54, %v653_v47  ;;  %v7930_v63 = vpop.f32.mrb[12].mxu0  ;;  %v1224_v35 = vsel %vm1221_vm4, %v1222_v0, %v1223_v1 }
 0x122   : > { %v719_v3 = vrot.slane %v8887_v57, 4  ;;  %v575_v4 = vadd.f32 %v7930_v63, %v8849_v60  ;;  %v566_v5 = vpop.f32.mrb[13].mxu0  ;;  %v969_v6 = vor.u32 %v968_v59, %v964_v58  ;;  %v982_v7 = vsel %vm962_vm5, %v977_v55, %v981_v61 }
 0x123   : > { %v717_v9 = vrot.slane %v681_v62, 4  ;;  %v567_v10 = vadd.f32 %v8849_v60, %v566_v5  ;;  %v7931_v11 = vpop.f32.mrb[14].mxu0  ;;  %v985_v12 = vor.u32 %v11735_v2, %v981_v61  ;;  %v1226_v19 = vrot.slane %v982_v7, 3  ;;  %v8947_v61 = vpop.f32.mrb[8].mxu1 }
 0x124   : > { %v659_v15 = vmax.f32 %v575_v4, 0.0  ;;  %v578_v16 = vadd.f32 %v7931_v11, %v8849_v60  ;;  %v569_v17 = vpop.f32.mrb[15].mxu0  ;;  %v974_v18 = vsel %vm962_vm5, %v969_v6, %v973_v37  ;;  %v8951_v4 = vld [vmem:[#allocation4 + $0x110] ss:$8 sps:$4 sm:$0xff]   ;;  %v7962_v7 = vpop.f32.mrb[9].mxu1 }
 0x125   : > { %v8908_v22 = vsel %vm709_vm3, %v715_v30, %v717_v9  ;;  %v8913_v23 = vsel %vm709_vm3, %v717_v9, %v719_v3  ;;  %v657_v24 = vmax.f32 %v567_v10, 0.0  ;;  %v570_v25 = vadd.f32 %v8849_v60, %v569_v17  ;;  %v8963_v14 = vpop.f32.mrb[10].mxu1  ;;  %v9012_v7 = vld [vmem:[#allocation4 + $0x130] ss:$8 sps:$4 sm:$0xff]  }
 0x126   : > { %762 = vst [vmem:[#allocation2 + $0x20] sm:$0xff] %v8908_v22  ;;  %763 = vst [vmem:[#allocation2 + $0x28] sm:$0xff] %v8913_v23  ;;  %v660_v28 = vmax.f32 %v578_v16, 0.0  ;;  %v1225_v29 = vrot.slane %v974_v18, 3  ;;  %v8919_v31 = vsel %vm962_vm5, %v985_v12, %v989_v13  ;;  %v11732_v30 = vshrl.u32 %v8878_v46, 16 }
 0x127   : > { %v658_v32 = vmax.f32 %v570_v25, 0.0  ;;  %v1239_v36 = vrot.slane %v8919_v31, 3  ;;  %v11728_v37 = vshll.u32 %v8908_v22, 16  ;;  %v11726_v42 = vshll.u32 %v8913_v23, 16  ;;  %v8960_v12 = vld [vmem:[#allocation4 + $0x124] ss:$8 sps:$4 sm:$0xff]  }
 0x128   : > { %v8929_v38 = vpack.c.bf16 %v660_v28, %v659_v15  ;;  %v1227_v39 = vsel %vm1221_vm4, %v1225_v29, %v1226_v19  ;;  %v993_v41 = vor.u32 %v11732_v30, %v989_v13  ;;  %v11729_v52 = vshrl.u32 %v8908_v22, 16 }
 0x129   : > { %v683_v47 = vpack.c.bf16 %v658_v32, %v657_v24  ;;  %v7934_v48 = vpop.f32.mrb[16].mxu0  ;;  %1779 = vmatprep.mubr.bf16.mxu0 %v1227_v39  ;;  %v1240_v49 = vsel %vm1221_vm4, %v1226_v19, %v1239_v36  ;;  %v997_v51 = vrot.slane %v11728_v37, 1  ;;  %v1005_v59 = vrot.slane %v11726_v42, 1  ;;  %v7963_v24 = vpop.f32.mrb[11].mxu1 }
 0x12a   : > { %v723_v54 = vrot.slane %v8929_v38, 4  ;;  %v591_v55 = vadd.f32 %v7934_v48, %v8849_v60  ;;  %v582_v58 = vpop.f32.mrb[17].mxu0  ;;  %1780 = vmatmul.mubr.bf16.vlgmr.msra.gmra.mrb[32].mxu0 %v1224_v35  ;;  %v1237_v13 = vrot.slane %v8875_v45, 3  ;;  %v893_v15 = vlaneseq }
 0x12b   : > { %v721_v62 = vrot.slane %v683_v47, 4  ;;  %v583_v63 = vadd.f32 %v8849_v60, %v582_v58  ;;  %v7935_v0 = vpop.f32.mrb[18].mxu0  ;;  %1861 = vmatpush1.bf16.msra.mxu0 %v8922_v34  ;;  %1789 = vmatprep.mubr.bf16.mxu0 %v1240_v49  ;;  %v8954_v5 = vsel %vm962_vm5, %v993_v41, %v997_v51  ;;  %v1001_v6 = vor.u32 %v11729_v52, %v997_v51  ;;  %v8995_v41 = vld [vmem:[#allocation4 + $0x134] ss:$8 sps:$4 sm:$0xff]  }
 0x12c   : > { %v663_v9 = vmax.f32 %v591_v55, 0.0  ;;  %v594_v10 = vadd.f32 %v7935_v0, %v8849_v60  ;;  %v585_v11 = vpop.f32.mrb[19].mxu0  ;;  %1862 = vmatprep.subr.bf16.mxu0 %v8932_v40  ;;  %v1249_v27 = vrot.slane %v8954_v5, 3  ;;  %v11727_v29 = vshrl.u32 %v8913_v23, 16 }
 0x12d   : > { %v8968_v16 = vsel %vm709_vm3, %v719_v3, %v721_v62  ;;  %v8973_v17 = vsel %vm709_vm3, %v721_v62, %v723_v54  ;;  %v661_v18 = vmax.f32 %v583_v63, 0.0  ;;  %v586_v19 = vadd.f32 %v8849_v60, %v585_v11  ;;  %v8980_v3 = vld [vmem:[#allocation4 + $0x120] ss:$8 sps:$4 sm:$0xff]  }
 0x12e   : > { %764 = vst [vmem:[#allocation2 + $0x30] sm:$0xff] %v8968_v16  ;;  %765 = vst [vmem:[#allocation2 + $0x38] sm:$0xff] %v8973_v17  ;;  %v664_v25 = vmax.f32 %v594_v10, 0.0  ;;  %v8983_v28 = vsel %vm962_vm5, %v1001_v6, %v1005_v59  ;;  %v11723_v32 = vshll.u32 %v8968_v16, 16  ;;  %v1238_v39 = vsel %vm1221_vm4, %v1223_v1, %v1237_v13 }
 0x12f   : > { %v662_v57 = vmax.f32 %v586_v19, 0.0  ;;  %1863 = vmatpush1.bf16.msra.mxu0 %v8951_v4  ;;  %v1247_v47 = vrot.slane %v8878_v46, 3  ;;  %v8998_v48 = vshrl.u32 %v893_v15, 7  ;;  %v1257_v55 = vrot.slane %v8908_v22, 3  ;;  %v9017_v15 = vld [vmem:[#allocation4 + $0x144] ss:$8 sps:$4 sm:$0xff]  }
 0x130   : > { %v8987_v35 = vpack.c.bf16 %v664_v25, %v663_v9  ;;  %1864 = vmatprep.subr.bf16.mxu0 %v8960_v12  ;;  %v1009_v58 = vor.u32 %v11727_v29, %v1005_v59  ;;  %v1013_v62 = vrot.slane %v11723_v32, 1  ;;  %v1250_v6 = vsel %vm1221_vm4, %v1239_v36, %v1249_v27 }
 0x131   : > { %11770 = vst [vmem:[#allocation7_spill] sm:$0xff] %v8998_v48  ;;  %v685_v49 = vpack.c.bf16 %v662_v57, %v661_v18  ;;  %v7938_v51 = vpop.f32.mrb[20].mxu0  ;;  %v1259_v9 = vrot.slane %v8983_v28, 3  ;;  %v11737_v31 = vrot.slane %v8913_v23, 3  ;;  %v11725_v25 = vshrl.u32 %v8968_v16, 16 }
 0x132   : > { %v727_v63 = vrot.slane %v8987_v35, 4  ;;  %v607_v1 = vadd.f32 %v7938_v51, %v8849_v60  ;;  %v598_v0 = vpop.f32.mrb[21].mxu0  ;;  %1790 = vmatmul.mubr.bf16.gmra.mrb[36].mxu0 %v1238_v39  ;;  %v9020_v18 = vsel %vm962_vm5, %v1009_v58, %v1013_v62  ;;  %v11722_v57 = vshll.u32 %v8973_v17, 16  ;;  %v9030_v28 = vld [vmem:[%s11712_s2] ss:$0 sm:$0xff] }
 0x133   : > { %v725_v59 = vrot.slane %v685_v49, 4  ;;  %v599_v10 = vadd.f32 %v8849_v60, %v598_v0  ;;  %v7939_v11 = vpop.f32.mrb[22].mxu0  ;;  %1865 = vmatpush1.bf16.msra.mxu0 %v8980_v3  ;;  %1799 = vmatprep.mubr.bf16.mxu0 %v1250_v6  ;;  %v11738_v0 = vrot.slane %v9020_v18, 3  ;;  %v9045_v38 = vadd.s32 40, %v8998_v48 }
 0x134   : > { %v667_v19 = vmax.f32 %v607_v1, 0.0  ;;  %v610_v36 = vadd.f32 %v7939_v11, %v8849_v60  ;;  %v601_v24 = vpop.f32.mrb[23].mxu0  ;;  %1866 = vmatprep.subr.bf16.mxu0 %v8995_v41  ;;  %v9048_v11 = vld [vmem:[#allocation4 + $0x140] ss:$8 sps:$4 sm:$0xff]  }
 0x135   : > { %v726_v39 = vsel %vm709_vm3, %v723_v54, %v725_v59  ;;  %v9038_v49 = vsel %vm709_vm3, %v725_v59, %v727_v63  ;;  %v665_v51 = vmax.f32 %v599_v10, 0.0  ;;  %v602_v58 = vadd.f32 %v8849_v60, %v601_v24 }
 0x136   : > { %766 = vst [vmem:[#allocation2 + $0x40] sm:$0xff] %v726_v39  ;;  %767 = vst [vmem:[#allocation2 + $0x48] sm:$0xff] %v9038_v49  ;;  %v668_v1 = vmax.f32 %v610_v36, 0.0  ;;  %v11724_v6 = vshll.u32 %v9038_v49, 16  ;;  %v1017_v59 = vor.u32 %v11725_v25, %v1013_v62  ;;  %v9054_v10 = vrot.slane %v11722_v57, 1 }
 0x137   : > { %v666_v54 = vmax.f32 %v602_v58, 0.0  ;;  %1867 = vmatpush1.bf16.msra.mxu0 %v9012_v7  ;;  %v9058_v36 = vadd.f32 %v9030_v28, %v8865_v33  ;;  %v1248_v39 = vsel %vm1221_vm4, %v1237_v13, %v1247_v47  ;;  %v9066_v58 = vld [vmem:[#allocation4 + $0x154] ss:$8 sps:$4 sm:$0xff]   ;;  %v11730_v50 = vshrl.u32 %v9038_v49, 16 }
 0x138   : > { %v9060_v24 = vpack.c.bf16 %v668_v1, %v667_v19  ;;  %1868 = vmatprep.subr.bf16.mxu0 %v9017_v15  ;;  %v9070_v62 = vrot.slane %v11724_v6, 1  ;;  %v1260_v33 = vsel %vm1221_vm4, %v1249_v27, %v1259_v9  ;;  %v1258_v19 = vsel %vm1221_vm4, %v1247_v47, %v1257_v55 }
 0x139   : > { %v687_v57 = vpack.c.bf16 %v666_v54, %v665_v51  ;;  %v7942_v32 = vpop.f32.mrb[24].mxu0  ;;  %v9080_v13 = vsel %vm1221_vm4, %v1257_v55, %v11737_v31  ;;  %v1270_v51 = vsel %vm1221_vm4, %v1259_v9, %v11738_v0  ;;  %v9090_v55 = vld [vmem:[#allocation4 + $0x150] ss:$8 sps:$4 sm:$0xff]  }
 0x13a   : > { %v11739_v1 = vrot.slane %v9060_v24, 4  ;;  %v623_v6 = vadd.f32 %v7942_v32, %v8849_v60  ;;  %v614_v25 = vpop.f32.mrb[25].mxu0  ;;  %1800 = vmatmul.mubr.bf16.gmra.mrb[40].mxu0 %v1248_v39  ;;  %v9094_v32 = vsel %vm962_vm5, %v1017_v59, %v9054_v10 }
 0x13b   : > { %v729_v27 = vrot.slane %v687_v57, 4  ;;  %v615_v47 = vadd.f32 %v8849_v60, %v614_v25  ;;  %1869 = vmatpush1.bf16.msra.mxu0 %v9048_v11  ;;  %v7943_v54 = vpop.f32.mrb[26].mxu0  ;;  %1809 = vmatprep.mubr.bf16.mxu0 %v1260_v33  ;;  %v9099_v57 = vld [vmem:[#allocation4 + $0x164] ss:$8 sps:$4 sm:$0xff]   ;;  %v2243_v25 = vor.u32 %v11730_v50, %v9070_v62  ;;  %v9106_v33 = vadd.f32 %v9030_v28, %v8872_v44 }
 0x13c   : > { %v671_v42 = vmax.f32 %v623_v6, 0.0  ;;  %v626_v9 = vadd.f32 %v7943_v54, %v8849_v60  ;;  %v617_v29 = vpop.f32.mrb[27].mxu0  ;;  %1870 = vmatprep.subr.bf16.mxu0 %v9066_v58 }
 0x13d   : > { %v9111_v59 = vsel %vm709_vm3, %v727_v63, %v729_v27  ;;  %v9116_v6 = vsel %vm709_vm3, %v729_v27, %v11739_v1  ;;  %v669_v54 = vmax.f32 %v615_v47, 0.0  ;;  %v618_v37 = vadd.f32 %v8849_v60, %v617_v29  ;;  %v9119_v52 = vld [vmem:[#allocation2 + $0x40] sm:$0xf8] }
 0x13e   : > { %768 = vst [vmem:[#allocation2 + $0x50] sm:$0xff] %v9111_v59  ;;  %769 = vst [vmem:[#allocation2 + $0x58] sm:$0xff] %v9116_v6  ;;  %v672_v44 = vmax.f32 %v626_v9, 0.0  ;;  %v2230_v35 = vshrl.u32 %v9119_v52, 16  ;;  %v2232_v63 = vshll.u32 %v9119_v52, 16  ;;  %v11740_v50 = vshll.u32 %v9111_v59, 16 }
 0x13f   : > { %v9126_v56 = vld [vmem:[#allocation2 + $0x40] sm:$0xf]  ;;  %v670_v27 = vmax.f32 %v618_v37, 0.0  ;;  %1871 = vmatpush1.bf16.msra.mxu0 %v9090_v55  ;;  %v11741_v26 = vshll.u32 %v9116_v6, 16 }
 0x140   : > { %v9129_v47 = vld [vmem:[#allocation4 + $0x160] ss:$8 sps:$4 sm:$0xff]   ;;  %v9134_v9 = vpack.c.bf16 %v672_v44, %v671_v42  ;;  %1872 = vmatprep.subr.bf16.mxu0 %v9099_v57  ;;  %v2234_v2 = vrot.slane %v2232_v63, 1  ;;  %v2247_v37 = vrot.slane %v11740_v50, 1  ;;  %v1027_v29 = vshll.u32 %v9126_v56, 16 }
 0x141   : > { %v689_v31 = vpack.c.bf16 %v670_v27, %v669_v54  ;;  %v7946_v39 = vpop.f32.mrb[28].mxu0  ;;  %v2255_v0 = vrot.slane %v11741_v26, 1  ;;  %v9150_v54 = vld [vmem:[#allocation4 + $0x170] ss:$8 sps:$4 sm:$0xff]   ;;  %v11771_v42 = vshrl.u32 %v9111_v59, 16 }
 0x142   : > { %1810 = vmatmul.mubr.bf16.gmra.mrb[44].mxu0 %v1258_v19  ;;  %v639_v5 = vadd.f32 %v7946_v39, %v8849_v60  ;;  %v2235_v63 = vor.u32 %v2234_v2, %v2230_v35  ;;  %v2248_v1 = vsel %vm962_vm5, %v2243_v25, %v2247_v37  ;;  %v630_v50 = vpop.f32.mrb[29].mxu0  ;;  %v9156_v2 = vld [vmem:[#allocation4 + $0x184] ss:$8 sps:$4 sm:$0xff]   ;;  %v2484_v39 = vrot.slane %v9119_v52, 3  ;;  %v9174_v52 = vld [vmem:[#allocation4 + $0x180] ss:$8 sps:$4 sm:$0xff]  }
 0x143   : > { %v733_v30 = vrot.slane %v689_v31, 4  ;;  %1873 = vmatpush1.bf16.msra.mxu0 %v9129_v47  ;;  %1819 = vmatprep.mubr.bf16.mxu0 %v1270_v51  ;;  %v2488_v27 = vrot.slane %v2248_v1, 3  ;;  %v631_v26 = vadd.f32 %v8849_v60, %v630_v50  ;;  %v7947_v43 = vpop.f32.mrb[30].mxu0  ;;  %v2251_v44 = vor.u32 %v11771_v42, %v2247_v37  ;;  %11772 = vst [vmem:[#allocation8_spill] sm:$0xff] %v9156_v2 }
 0x144   : > { %1874 = vmatprep.subr.bf16.mxu0 %v9137_v53  ;;  %v675_v19 = vmax.f32 %v639_v5, 0.0  ;;  %v2240_v31 = vsel %vm962_vm5, %v2235_v63, %v9070_v62  ;;  %v642_v51 = vadd.f32 %v7947_v43, %v8849_v60  ;;  %v633_v25 = vpop.f32.mrb[31].mxu0  ;;  %v11773_v1 = vrot.slane %v9060_v24, 4 }
 0x145   : > { %v11774_v35 = vrot.slane %v9134_v9, 4  ;;  %v2487_v5 = vrot.slane %v2240_v31, 3  ;;  %v673_v42 = vmax.f32 %v631_v26, 0.0  ;;  %v634_v62 = vadd.f32 %v8849_v60, %v633_v25  ;;  %v9191_v25 = vld [vmem:[#allocation4 + $0x194] ss:$8 sps:$4 sm:$0xff]  }
 0x146   : > { %v9165_v50 = vsel %vm709_vm3, %v11773_v1, %v733_v30  ;;  %v676_v43 = vmax.f32 %v642_v51, 0.0  ;;  %v9178_v24 = vsel %vm962_vm5, %v2251_v44, %v2255_v0  ;;  %v1029_v63 = vrot.slane %v1027_v29, 1 }
 0x147   : > { %v9170_v37 = vsel %vm709_vm3, %v733_v30, %v11774_v35  ;;  %770 = vst [vmem:[#allocation2 + $0x60] sm:$0xff] %v9165_v50  ;;  %1875 = vmatpush1.bf16.msra.mxu0 %v9150_v54  ;;  %v2489_v30 = vsel %vm1221_vm4, %v2487_v5, %v2488_v27  ;;  %v9185_v35 = vld [vmem:[#allocation2] sm:$0xf0]  ;;  %v11775_v60 = vrot.slane %v9038_v49, 3  ;;  %v674_v51 = vmax.f32 %v634_v62, 0.0 }
 0x148   : > { %771 = vst [vmem:[#allocation2 + $0x68] sm:$0xff] %v9170_v37  ;;  %1876 = vmatprep.subr.bf16.mxu0 %v9156_v2  ;;  %3041 = vmatprep.mubr.bf16.mxu1 %v2489_v30  ;;  %v692_v29 = vpack.c.bf16 %v676_v43, %v675_v19  ;;  %v11745_v5 = vrot.slane %v8968_v16, 3  ;;  %v11776_v31 = vrot.slane %v9094_v32, 3  ;;  %v11777_v1 = vrot.slane %v9020_v18, 3 }
 0x149   : > { %v2486_v44 = vsel %vm1221_vm4, %v2484_v39, %v11775_v60  ;;  %v11778_v30 = vshrl.u32 %v8973_v17, 16  ;;  %v11779_v2 = vshrl.u32 %v9116_v6, 16  ;;  %v11780_v19 = vshll.u32 %v9165_v50, 16 }
 0x14a   : > { %3042 = vmatmul.mubr.bf16.vlgmr.msra.gmra.mrb[12].mxu1 %v2486_v44  ;;  %v1280_v26 = vsel %vm1221_vm4, %v11777_v1, %v11776_v31  ;;  %1820 = vmatmul.mubr.bf16.gmra.mrb[48].mxu0 %v9080_v13  ;;  %v739_v62 = vrot.slane %v692_v29, 4  ;;  %v691_v60 = vpack.c.bf16 %v674_v51, %v673_v42  ;;  %v11781_v18 = vrot.slane %v9178_v24, 3 }
 0x14b   : > { %v1025_v48 = vor.u32 %v11778_v30, %v9054_v10  ;;  %v2259_v39 = vor.u32 %v11779_v2, %v2255_v0  ;;  %v2263_v43 = vrot.slane %v11780_v19, 1  ;;  %3123 = vmatpush1.bf16.msra.mxu1 %v8922_v34  ;;  %v1063_v1 = vshrl.u32 %v9185_v35, 16  ;;  %1877 = vmatpush1.bf16.msra.mxu0 %v9174_v52  ;;  %v9213_v10 = vld [vmem:[#allocation4 + $0x190] ss:$8 sps:$4 sm:$0xff]  }
 0x14c   : > { %v2502_v31 = vsel %vm1221_vm4, %v2488_v27, %v11781_v18  ;;  %1829 = vmatprep.mubr.bf16.mxu0 %v1280_v26  ;;  %v11746_v0 = vrot.slane %v9111_v59, 3  ;;  %v11782_v34 = vmax.f32 %v9058_v36, 0.0  ;;  %v11783_v42 = vmax.f32 %v9106_v33, 0.0  ;;  %774 = vst [vmem:[#allocation2 + $0x80] sm:$0xf] %v739_v62  ;;  %1878 = vmatprep.subr.bf16.mxu0 %v9191_v25 }
 0x14d   : > { %v9217_v2 = vsel %vm962_vm5, %v1025_v48, %v1029_v63  ;;  %v9220_v13 = vsel %vm962_vm5, %v2259_v39, %v2263_v43  ;;  %v737_v44 = vrot.slane %v691_v60, 4  ;;  %3124 = vmatprep.subr.bf16.mxu1 %v8932_v40  ;;  %v9230_v26 = vld [vmem:[#allocation4 + $0x1a4] ss:$8 sps:$4 sm:$0xff]   ;;  %v1031_v48 = vshrl.u32 %v9126_v56, 16  ;;  %3051 = vmatprep.mubr.bf16.mxu1 %v2502_v31 }
 0x14e   : > { %v9226_v27 = vpack.c.bf16 %v11783_v42, %v11782_v34  ;;  %v11749_v29 = vshll.u32 %v9170_v37, 16  ;;  %v1066_v51 = vshll.u32 %v9185_v35, 16  ;;  %v11748_v33 = vshrl.u32 %v9165_v50, 16 }
 0x14f   : > { %v9238_v30 = vadd.s32 256, %v9045_v38  ;;  %v11785_v39 = vrot.slane %v9134_v9, 4  ;;  %v9246_v19 = vsel %vm709_vm3, %v737_v44, %v739_v62  ;;  %3125 = vmatpush1.bf16.msra.mxu1 %v8951_v4  ;;  %v1289_v60 = vrot.slane %v9217_v2, 3  ;;  %1879 = vmatpush1.bf16.msra.mxu0 %v9213_v10  ;;  %v9254_v38 = vld [vmem:[#allocation4 + $0x1a0] ss:$8 sps:$4 sm:$0xff]  }
 0x150   : > { %v11747_v36 = vrot.slane %v9226_v27, 4  ;;  %773 = vst [vmem:[#allocation2 + $0x78] sm:$0xff] %v9246_v19  ;;  %v11786_v9 = vrot.slane %v8913_v23, 3  ;;  %v11787_v4 = vrot.slane %v9038_v49, 3  ;;  %3126 = vmatprep.subr.bf16.mxu1 %v8960_v12  ;;  %v2267_v34 = vor.u32 %v11748_v33, %v2263_v43  ;;  %1880 = vmatprep.subr.bf16.mxu0 %v9230_v26 }
 0x151   : > { %11784 = vst [vmem:[#allocation9_spill] sm:$0xff] %v9238_v30  ;;  %v9243_v40 = vsel %vm709_vm3, %v11785_v39, %v737_v44  ;;  %v11788_v42 = vshrl.u32 %v8859_v21, 16  ;;  %v9274_v39 = vld [vmem:[#allocation4 + $0x1b4] ss:$8 sps:$4 sm:$0xff]   ;;  %v11789_v12 = vshrl.u32 %v8875_v45, 16  ;;  %v11790_v18 = vshll.u32 %v8875_v45, 16 }
 0x152   : > { %772 = vst [vmem:[#allocation2 + $0x70] sm:$0xff] %v9243_v40  ;;  %v1278_v62 = vsel %vm1221_vm4, %v11786_v9, %v11745_v5  ;;  %v2500_v31 = vsel %vm1221_vm4, %v11787_v4, %v11746_v0  ;;  %945 = vst [vmem:[#allocation2 + $0x80] sm:$0xf0] %v11747_v36  ;;  %v1033_v9 = vor.u32 %v1031_v48, %v1029_v63  ;;  %v2271_v5 = vrot.slane %v11749_v29, 1  ;;  %v9323_v29 = vld [vmem:[#allocation4 + $0x1c0] ss:$8 sps:$4 sm:$0xff]  }
 0x153   : > { %v1070_v44 = vrot.slane %v11788_v42, 1  ;;  %v1065_v4 = vrot.slane %v1063_v1, 1  ;;  %v1068_v0 = vrot.slane %v1066_v51, 2  ;;  %3052 = vmatmul.mubr.bf16.gmra.mrb[16].mxu1 %v2500_v31  ;;  %v1074_v36 = vrot.slane %v11789_v12, 1  ;;  %1830 = vmatmul.mubr.bf16.gmra.mrb[52].mxu0 %v1278_v62  ;;  %v9301_v62 = vld [vmem:[#allocation4 + $0x1b0] ss:$8 sps:$4 sm:$0xff]  }
 0x154   : > { %v1075_v43 = vrot.slane %v11790_v18, 2  ;;  %v873_v42 = vadd.f32 %v9030_v28, %v8896_v8  ;;  %v876_v33 = vadd.f32 %v9030_v28, %v8905_v20  ;;  %v11791_v63 = vrot.slane %v9094_v32, 3  ;;  %3127 = vmatpush1.bf16.msra.mxu1 %v8980_v3  ;;  %1881 = vmatpush1.bf16.msra.mxu0 %v9254_v38 }
 0x155   : > { %v11792_v48 = vrot.slane %v9220_v13, 3  ;;  %v11793_v51 = vrot.slane %v9178_v24, 3  ;;  %v1287_v8 = vrot.slane %v8973_v17, 3  ;;  %v11794_v31 = vshll.u32 %v8859_v21, 16  ;;  %1882 = vmatprep.subr.bf16.mxu0 %v9274_v39  ;;  %3128 = vmatprep.subr.bf16.mxu1 %v8995_v41 }
 0x156   : > { %v1290_v1 = vsel %vm1221_vm4, %v11791_v63, %v1289_v60  ;;  %v9304_v32 = vsel %vm962_vm5, %v2267_v34, %v2271_v5  ;;  %v889_v3 = vmax.f32 %v873_v42, 0.0  ;;  %v890_v12 = vmax.f32 %v876_v33, 0.0  ;;  %v9309_v63 = vld [vmem:[#allocation4 + $0x1c4] ss:$8 sps:$4 sm:$0xff]  }
 0x157   : > { %v2512_v18 = vsel %vm1221_vm4, %v11793_v51, %v11792_v48  ;;  %v1071_v20 = vrot.slane %v11794_v31, 2  ;;  %1839 = vmatprep.mubr.bf16.mxu0 %v1290_v1  ;;  %v881_v24 = vadd.f32 %v9030_v28, %v8947_v61  ;;  %v2509_v48 = vrot.slane %v9116_v6, 3 }
 0x158   : > { %3061 = vmatprep.mubr.bf16.mxu1 %v2512_v18  ;;  %v2273_v51 = vshrl.u32 %v9170_v37, 16  ;;  %v2277_v1 = vshll.u32 %v9243_v40, 16  ;;  %v1299_v34 = vrot.slane %v1033_v9, 3  ;;  %v1069_v31 = vor.u32 %v1068_v0, %v1065_v4  ;;  %3129 = vmatpush1.bf16.msra.mxu1 %v9012_v7  ;;  %v9337_v4 = vld [vmem:[#allocation4 + $0x1d4] ss:$8 sps:$4 sm:$0xff]  }
 0x159   : > { %v9315_v42 = vor.u32 %v1075_v43, %v1074_v36  ;;  %v931_v33 = vpack.c.bf16 %v890_v12, %v889_v3  ;;  %v2521_v61 = vrot.slane %v9304_v32, 3  ;;  %v884_v18 = vadd.f32 %v9030_v28, %v8963_v14  ;;  %1883 = vmatpush1.bf16.msra.mxu0 %v9301_v62  ;;  %3130 = vmatprep.subr.bf16.mxu1 %v9017_v15  ;;  %v957_v43 = vld [vmem:[#allocation2 + $0x40] sm:$0x7] }
 0x15a   : > { %vm911_vm7 = vcmp.lt.s32.totalorder %v9238_v30, 300  ;;  %v11795_v41 = vrot.slane %v8968_v16, 3  ;;  %v1072_v7 = vor.u32 %v1071_v20, %v1070_v44  ;;  %v891_v9 = vmax.f32 %v881_v24, 0.0  ;;  %1884 = vmatprep.subr.bf16.mxu0 %v9309_v63 }
 0x15b   : > { %v937_v36 = vrot.slane %v931_v33, 4  ;;  %v11796_v14 = vrot.slane %v9111_v59, 3  ;;  %v2275_v3 = vor.u32 %v2273_v51, %v2271_v5  ;;  %v2279_v15 = vrot.slane %v2277_v1, 1 }
 0x15c   : > { %v1288_v0 = vsel %vm1221_vm4, %v11795_v41, %v1287_v8  ;;  %v892_v44 = vmax.f32 %v884_v18, 0.0  ;;  %v1300_v20 = vsel %vm1221_vm4, %v1289_v60, %v1299_v34  ;;  %v1073_v12 = vsel %vm1061_vm6, %v1069_v31, %v1072_v7  ;;  %3131 = vmatpush1.bf16.msra.mxu1 %v9048_v11  ;;  %v9367_v11 = vld [vmem:[#allocation4 + $0x1d0] ss:$8 sps:$4 sm:$0xff]  }
 0x15d   : > { %v2510_v28 = vsel %vm1221_vm4, %v11796_v14, %v2509_v48  ;;  %v9349_v24 = vsel %vm1061_vm6, %v1072_v7, %v9315_v42  ;;  %v11797_v33 = vrot.slane %v9226_v27, 4  ;;  %1840 = vmatmul.mubr.bf16.gmra.mrb[56].mxu0 %v1288_v0  ;;  %v11798_v5 = vrot.slane %v9220_v13, 3  ;;  %3132 = vmatprep.subr.bf16.mxu1 %v9066_v58  ;;  %v9371_v13 = vld [vmem:[#allocation4 + $0x1e4] ss:$8 sps:$4 sm:$0xff]  }
 0x15e   : > { %3062 = vmatmul.mubr.bf16.gmra.mrb[20].mxu1 %v2510_v28  ;;  %v929_v60 = vsel %vm911_vm7, %v892_v44, 0.0  ;;  %v11799_v34 = vshrl.u32 %v8878_v46, 16  ;;  %v11800_v27 = vshll.u32 %v8878_v46, 16  ;;  %1885 = vmatpush1.bf16.msra.mxu0 %v9323_v29  ;;  %v1297_v0 = vrot.slane %v957_v43, 3 }
 0x15f   : > { %v938_v41 = vsel %vm709_vm3, %v11797_v33, %v937_v36  ;;  %v2522_v2 = vsel %vm1221_vm4, %v11798_v5, %v2521_v61  ;;  %1849 = vmatprep.mubr.bf16.mxu0 %v1300_v20  ;;  %v932_v7 = vpack.c.bf16 %v929_v60, %v891_v9  ;;  %1886 = vmatprep.subr.bf16.mxu0 %v9337_v4  ;;  %v2519_v14 = vrot.slane %v9165_v50, 3  ;;  %v9398_v60 = vld [vmem:[#allocation4 + $0x1f4] ss:$8 sps:$4 sm:$0xff]  }
 0x160   : > { %946 = vst [vmem:[#allocation2 + $0x88] sm:$0xff] %v938_v41  ;;  %v1078_v31 = vrot.slane %v11799_v34, 1  ;;  %v1079_v18 = vrot.slane %v11800_v27, 2  ;;  %v1231_v28 = vrot.slane %v1073_v12, 3  ;;  %v1232_v44 = vrot.slane %v9349_v24, 3  ;;  %3071 = vmatprep.mubr.bf16.mxu1 %v2522_v2  ;;  %3133 = vmatpush1.bf16.msra.mxu1 %v9090_v55 }
 0x161   : > { %v9376_v33 = vsel %vm962_vm5, %v2275_v3, %v2279_v15  ;;  %v939_v20 = vrot.slane %v932_v7, 4  ;;  %v1044_v41 = vrot.slane %v9185_v35, 1  ;;  %v2281_v9 = vshrl.u32 %v9243_v40, 16  ;;  %v9384_v12 = vld [vmem:[#allocation4 + $0x1e0] ss:$8 sps:$4 sm:$0xff]   ;;  %3134 = vmatprep.subr.bf16.mxu1 %v9099_v57 }
 0x162   : > { %v2285_v43 = vshll.u32 %v9246_v19, 16  ;;  %v1047_v58 = vrot.slane %v8875_v45, 1  ;;  %v1080_v5 = vor.u32 %v1079_v18, %v1078_v31  ;;  %1887 = vmatpush1.bf16.msra.mxu0 %v9367_v11  ;;  %v2531_v3 = vrot.slane %v9376_v33, 3  ;;  %v9400_v57 = vld [vmem:[#allocation2 + $0x80] sm:$0xf] }
 0x163   : > { %v940_v35 = vsel %vm709_vm3, %v937_v36, %v939_v20  ;;  %948 = vst [vmem:[#allocation2 + $0x98] sm:$0xf] %v939_v20  ;;  %v1045_v2 = vrot.slane %v8859_v21, 1  ;;  %v2283_v55 = vor.u32 %v2281_v9, %v2279_v15  ;;  %1888 = vmatprep.subr.bf16.mxu0 %v9371_v13  ;;  %v2520_v45 = vsel %vm1221_vm4, %v2509_v48, %v2519_v14  ;;  %v9424_v7 = vld [vmem:[#allocation4 + $0x1f0] ss:$8 sps:$4 sm:$0xff]  }
 0x164   : > { %947 = vst [vmem:[#allocation2 + $0x90] sm:$0xff] %v940_v35  ;;  %v1298_v21 = vsel %vm1221_vm4, %v1287_v8, %v1297_v0  ;;  %v1233_v36 = vsel %vm1221_vm4, %v1231_v28, %v1232_v44  ;;  %v2287_v34 = vrot.slane %v2285_v43, 1  ;;  %3135 = vmatpush1.bf16.msra.mxu1 %v9129_v47  ;;  %v9417_v31 = vsel %vm1061_vm6, %v9315_v42, %v1080_v5  ;;  %v9435_v20 = vld [vmem:[#allocation4 + $0x204] ss:$8 sps:$4 sm:$0xff]   ;;  %v9473_v24 = vld [vmem:[#allocation4 + $0x210] ss:$8 sps:$4 sm:$0xff]  }
 0x165   : > { %v1046_v15 = vsel %vm1043_vm8, %v1044_v41, %v1045_v2  ;;  %1850 = vmatmul.mubr.bf16.gmra.mrb[60].mxu0 %v1298_v21  ;;  %v9413_v48 = vsel %vm1043_vm8, %v1045_v2, %v1047_v58  ;;  %v11801_v8 = vshrl.u32 %v8908_v22, 16  ;;  %v11802_v18 = vshll.u32 %v8908_v22, 16  ;;  %3136 = vmatprep.subr.bf16.mxu1 %v9137_v53  ;;  %v9445_v21 = vld [vmem:[#allocation4 + $0x200] ss:$8 sps:$4 sm:$0xff]  }
 0x166   : > { %3072 = vmatmul.mubr.bf16.gmra.mrb[24].mxu1 %v2520_v45  ;;  %1889 = vmatpush1.bf16.msra.mxu0 %v9384_v12  ;;  %v2532_v47 = vsel %vm1221_vm4, %v2521_v61, %v2531_v3  ;;  %v9430_v28 = vsel %vm962_vm5, %v2283_v55, %v2287_v34  ;;  %v2289_v42 = vshrl.u32 %v9246_v19, 16  ;;  %v2293_v33 = vshll.u32 %v9400_v57, 16 }
 0x167   : > { %v1082_v27 = vrot.slane %v11801_v8, 1  ;;  %v1083_v0 = vrot.slane %v11802_v18, 2  ;;  %1892 = vmatprep.mubr.bf16.mxu0 %v1233_v36  ;;  %1890 = vmatprep.subr.bf16.mxu0 %v9398_v60  ;;  %v2529_v41 = vrot.slane %v9170_v37, 3  ;;  %v1228_v35 = vrot.slane %v1046_v15, 3  ;;  %v11803_v36 = vld [vmem:[#allocation8_spill] sm:$0xff] }
 0x168   : > { %3081 = vmatprep.mubr.bf16.mxu1 %v2532_v47  ;;  %v1229_v32 = vrot.slane %v9413_v48, 3  ;;  %v1243_v61 = vrot.slane %v9417_v31, 3  ;;  %v1049_v2 = vrot.slane %v8878_v46, 1  ;;  %3137 = vmatpush1.bf16.msra.mxu1 %v9150_v54  ;;  %v2541_v55 = vrot.slane %v9430_v28, 3  ;;  %v9454_v54 = vld [vmem:[#allocation4 + $0x214] ss:$8 sps:$4 sm:$0xff]  }
 0x169   : > { %v1084_v45 = vor.u32 %v1083_v0, %v1082_v27  ;;  %3138 = vmatprep.subr.bf16.mxu1 %v11803_v36  ;;  %v2291_v53 = vor.u32 %v2289_v42, %v2287_v34  ;;  %v2295_v15 = vrot.slane %v2293_v33, 1  ;;  %v2530_v46 = vsel %vm1221_vm4, %v2519_v14, %v2529_v41 }
 0x16a   : > { %1891 = vmatpush1.bf16.msra.mxu0 %v9424_v7  ;;  %v1230_v48 = vsel %vm1221_vm4, %v1228_v35, %v1229_v32  ;;  %v1244_v31 = vsel %vm1221_vm4, %v1232_v44, %v1243_v61  ;;  %v9461_v8 = vsel %vm1043_vm8, %v1047_v58, %v1049_v2  ;;  %v2542_v34 = vsel %vm1221_vm4, %v2531_v3, %v2541_v55  ;;  %v9484_v3 = vld [vmem:[#allocation4 + $0x224] ss:$8 sps:$4 sm:$0xff]  }
 0x16b   : > { %1973 = vmatprep.subr.bf16.mxu0 %v9435_v20  ;;  %v9466_v27 = vsel %vm1061_vm6, %v1080_v5, %v1084_v45  ;;  %v11804_v14 = vshrl.u32 %v8913_v23, 16  ;;  %v11805_v0 = vshll.u32 %v8913_v23, 16  ;;  %v9476_v44 = vsel %vm962_vm5, %v2291_v53, %v2295_v15 }
 0x16c   : > { %3139 = vmatpush1.bf16.msra.mxu1 %v9174_v52  ;;  %v9478_v52 = vld [vmem:[#allocation2 + $0x40] sm:$0xf0]  ;;  %v1241_v58 = vrot.slane %v9461_v8, 3  ;;  %v2539_v5 = vrot.slane %v9243_v40, 3  ;;  %v1051_v28 = vrot.slane %v8908_v22, 1  ;;  %v1253_v33 = vrot.slane %v9466_v27, 3 }
 0x16d   : > { %1893 = vmatmul.mubr.bf16.vlgmr.msra.gmra.mrb[32].mxu0 %v1230_v48  ;;  %v1086_v18 = vrot.slane %v11804_v14, 1  ;;  %v1087_v47 = vrot.slane %v11805_v0, 2  ;;  %3140 = vmatprep.subr.bf16.mxu1 %v9191_v25  ;;  %v2297_v35 = vshrl.u32 %v9400_v57, 16  ;;  %v2551_v36 = vrot.slane %v9476_v44, 3 }
 0x16e   : > { %3082 = vmatmul.mubr.bf16.gmra.mrb[28].mxu1 %v2530_v46  ;;  %1974 = vmatpush1.bf16.msra.mxu0 %v9445_v21  ;;  %v2327_v53 = vshrl.u32 %v9478_v52, 16  ;;  %v2330_v46 = vshll.u32 %v9478_v52, 16  ;;  %v1242_v22 = vsel %vm1221_vm4, %v1229_v32, %v1241_v58  ;;  %v2540_v48 = vsel %vm1221_vm4, %v2529_v41, %v2539_v5 }
 0x16f   : > { %1902 = vmatprep.mubr.bf16.mxu0 %v1244_v31  ;;  %1975 = vmatprep.subr.bf16.mxu0 %v9454_v54  ;;  %v1088_v25 = vor.u32 %v1087_v47, %v1086_v18  ;;  %v9497_v31 = vld [vmem:[#allocation4 + $0x220] ss:$8 sps:$4 sm:$0xff]   ;;  %v1254_v8 = vsel %vm1221_vm4, %v1243_v61, %v1253_v33  ;;  %v2299_v27 = vor.u32 %v2297_v35, %v2295_v15  ;;  %v11807_v32 = vshll.u32 %v8968_v16, 16 }
 0x170   : > { %3091 = vmatprep.mubr.bf16.mxu1 %v2542_v34  ;;  %3141 = vmatpush1.bf16.msra.mxu1 %v9213_v10  ;;  %v9501_v10 = vsel %vm1043_vm8, %v1049_v2, %v1051_v28  ;;  %v9504_v34 = vld [vmem:[#allocation4 + $0x234] ss:$8 sps:$4 sm:$0xff]   ;;  %v2552_v41 = vsel %vm1221_vm4, %v2541_v55, %v2551_v36  ;;  %v2329_v0 = vrot.slane %v2327_v53, 1  ;;  %v11808_v61 = vshrl.u32 %v9038_v49, 16  ;;  %v9527_v53 = vld [vmem:[#allocation4 + $0x230] ss:$8 sps:$4 sm:$0xff]  }
 0x171   : > { %3142 = vmatprep.subr.bf16.mxu1 %v9230_v26  ;;  %v11806_v26 = vshrl.u32 %v8968_v16, 16  ;;  %v1091_v18 = vrot.slane %v11807_v32, 2  ;;  %v9513_v2 = vsel %vm1061_vm6, %v1084_v45, %v1088_v25  ;;  %v2332_v15 = vrot.slane %v2330_v46, 2 }
 0x172   : > { %1976 = vmatpush1.bf16.msra.mxu0 %v9473_v24  ;;  %v2334_v47 = vrot.slane %v11808_v61, 1  ;;  %v11809_v44 = vshll.u32 %v9038_v49, 16  ;;  %v1251_v55 = vrot.slane %v9501_v10, 3  ;;  %v2549_v45 = vrot.slane %v9246_v19, 3 }
 0x173   : > { %1977 = vmatprep.subr.bf16.mxu0 %v9484_v3  ;;  %v1090_v14 = vrot.slane %v11806_v26, 1  ;;  %v2561_v46 = vrot.slane %v2299_v27, 3  ;;  %v2333_v10 = vor.u32 %v2332_v15, %v2329_v0 }
 0x174   : > { %3143 = vmatpush1.bf16.msra.mxu1 %v9254_v38  ;;  %v2335_v35 = vrot.slane %v11809_v44, 2  ;;  %v11811_v38 = vshll.u32 %v9111_v59, 16 }
 0x175   : > { %1903 = vmatmul.mubr.bf16.gmra.mrb[36].mxu0 %v1242_v22  ;;  %3144 = vmatprep.subr.bf16.mxu1 %v9274_v39  ;;  %v9531_v32 = vor.u32 %v1091_v18, %v1090_v14  ;;  %v1263_v39 = vrot.slane %v9513_v2, 3  ;;  %v2562_v27 = vsel %vm1221_vm4, %v2551_v36, %v2561_v46  ;;  %v2224_v14 = vld [vmem:[#allocation2 + $0x80] sm:$0x7]  ;;  %v11812_v18 = vshrl.u32 %v9116_v6, 16 }
 0x176   : > { %3092 = vmatmul.mubr.bf16.gmra.mrb[32].mxu1 %v2540_v48  ;;  %1912 = vmatprep.mubr.bf16.mxu0 %v1254_v8  ;;  %v11810_v48 = vshrl.u32 %v9111_v59, 16  ;;  %v2339_v26 = vrot.slane %v11811_v38, 2  ;;  %v1053_v8 = vrot.slane %v8913_v23, 1  ;;  %v2336_v61 = vor.u32 %v2335_v35, %v2334_v47  ;;  %v9541_v23 = vld [vmem:[#allocation4 + $0x240] ss:$8 sps:$4 sm:$0xff]  }
 0x177   : > { %3101 = vmatprep.mubr.bf16.mxu1 %v2552_v41  ;;  %1978 = vmatpush1.bf16.msra.mxu0 %v9497_v31  ;;  %v9533_v41 = vld [vmem:[#allocation4 + $0x244] ss:$8 sps:$4 sm:$0xff]   ;;  %v2550_v38 = vsel %vm1221_vm4, %v2539_v5, %v2549_v45  ;;  %v1264_v5 = vsel %vm1221_vm4, %v1253_v33, %v1263_v39  ;;  %v2342_v36 = vrot.slane %v11812_v18, 1  ;;  %v11814_v47 = vshrl.u32 %v8973_v17, 16  ;;  %v9569_v35 = vld [vmem:[#allocation4 + $0x250] ss:$8 sps:$4 sm:$0xff]  }
 0x178   : > { %v2338_v22 = vrot.slane %v11810_v48, 1  ;;  %1979 = vmatprep.subr.bf16.mxu0 %v9504_v34  ;;  %3145 = vmatpush1.bf16.msra.mxu1 %v9301_v62  ;;  %v1252_v48 = vsel %vm1221_vm4, %v1241_v58, %v1251_v55  ;;  %v9545_v62 = vsel %vm1043_vm8, %v1051_v28, %v1053_v8  ;;  %v9552_v58 = vld [vmem:[#allocation4 + $0x254] ss:$8 sps:$4 sm:$0xff]   ;;  %v11813_v28 = vshll.u32 %v9116_v6, 16 }
 0x179   : > { %3146 = vmatprep.subr.bf16.mxu1 %v9309_v63  ;;  %v9549_v63 = vsel %vm1061_vm6, %v1088_v25, %v9531_v32  ;;  %v2337_v25 = vsel %vm1061_vm6, %v2333_v10, %v2336_v61  ;;  %v1094_v15 = vrot.slane %v11814_v47, 1  ;;  %v11815_v33 = vshll.u32 %v8973_v17, 16 }
 0x17a   : > { %v2340_v44 = vor.u32 %v2339_v26, %v2338_v22  ;;  %v2343_v2 = vrot.slane %v11813_v28, 2  ;;  %v1261_v22 = vrot.slane %v9545_v62, 3  ;;  %v2559_v26 = vrot.slane %v2224_v14, 3 }
 0x17b   : > { %1980 = vmatpush1.bf16.msra.mxu0 %v9527_v53  ;;  %v1273_v46 = vrot.slane %v9549_v63, 3  ;;  %v1055_v10 = vrot.slane %v8968_v16, 1  ;;  %v2493_v62 = vrot.slane %v2337_v25, 3  ;;  %v11816_v25 = vshrl.u32 %v9165_v50, 16 }
 0x17c   : > { %1981 = vmatprep.subr.bf16.mxu0 %v9533_v41  ;;  %3147 = vmatpush1.bf16.msra.mxu1 %v9323_v29  ;;  %v9563_v0 = vsel %vm1061_vm6, %v2336_v61, %v2340_v44  ;;  %v1095_v29 = vrot.slane %v11815_v33, 2  ;;  %v2309_v61 = vrot.slane %v9478_v52, 1 }
 0x17d   : > { %1913 = vmatmul.mubr.bf16.gmra.mrb[40].mxu0 %v1252_v48  ;;  %3148 = vmatprep.subr.bf16.mxu1 %v9337_v4  ;;  %v9574_v4 = vld [vmem:[#allocation2 + $0x40] sm:$0x1f]  ;;  %v2310_v48 = vrot.slane %v9038_v49, 1  ;;  %v2494_v14 = vrot.slane %v9563_v0, 3  ;;  %v1262_v49 = vsel %vm1221_vm4, %v1251_v55, %v1261_v22  ;;  %v1274_v28 = vsel %vm1221_vm4, %v1263_v39, %v1273_v46  ;;  %v9600_v55 = vld [vmem:[#allocation4 + $0x274] ss:$8 sps:$4 sm:$0xff]  }
 0x17e   : > { %3102 = vmatmul.mubr.bf16.gmra.mrb[36].mxu1 %v2550_v38  ;;  %1922 = vmatprep.mubr.bf16.mxu0 %v1264_v5  ;;  %v2312_v38 = vrot.slane %v9111_v59, 1  ;;  %v2344_v5 = vor.u32 %v2343_v2, %v2342_v36  ;;  %v1096_v18 = vor.u32 %v1095_v29, %v1094_v15  ;;  %v1099_v16 = vshrl.u32 %v9574_v4, 16 }
 0x17f   : > { %3111 = vmatprep.mubr.bf16.mxu1 %v2562_v27  ;;  %1982 = vmatpush1.bf16.msra.mxu0 %v9541_v23  ;;  %v9581_v27 = vld [vmem:[#allocation4 + $0x264] ss:$8 sps:$4 sm:$0xff]   ;;  %v1102_v52 = vshll.u32 %v9574_v4, 16  ;;  %v2560_v59 = vsel %vm1221_vm4, %v2549_v45, %v2559_v26  ;;  %v2311_v36 = vsel %vm1043_vm8, %v2309_v61, %v2310_v48  ;;  %v2495_v45 = vsel %vm1221_vm4, %v2493_v62, %v2494_v14 }
 0x180   : > { %1983 = vmatprep.subr.bf16.mxu0 %v9552_v58  ;;  %3149 = vmatpush1.bf16.msra.mxu1 %v9367_v11  ;;  %v9594_v11 = vld [vmem:[#allocation4 + $0x260] ss:$8 sps:$4 sm:$0xff]   ;;  %v2313_v2 = vsel %vm1043_vm8, %v2310_v48, %v2312_v38  ;;  %v2345_v39 = vsel %vm1061_vm6, %v2340_v44, %v2344_v5  ;;  %v2346_v0 = vrot.slane %v11816_v25, 1  ;;  %v1097_v15 = vsel %vm1061_vm6, %v9531_v32, %v1096_v18  ;;  %v9613_v44 = vld [vmem:[#allocation4 + $0x270] ss:$8 sps:$4 sm:$0xff]  }
 0x181   : > { %3150 = vmatprep.subr.bf16.mxu1 %v9371_v13  ;;  %v1056_v13 = vsel %vm1043_vm8, %v1053_v8, %v1055_v10  ;;  %v11817_v8 = vshll.u32 %v9165_v50, 16  ;;  %v1101_v33 = vrot.slane %v1099_v16, 1  ;;  %v1104_v29 = vrot.slane %v1102_v52, 2 }
 0x182   : > { %v2490_v26 = vrot.slane %v2311_v36, 3  ;;  %v2491_v61 = vrot.slane %v2313_v2, 3  ;;  %v2505_v48 = vrot.slane %v2345_v39, 3  ;;  %v1057_v62 = vrot.slane %v8973_v17, 1 }
 0x183   : > { %1984 = vmatpush1.bf16.msra.mxu0 %v9569_v35  ;;  %v2347_v47 = vrot.slane %v11817_v8, 2  ;;  %v1283_v32 = vrot.slane %v1097_v15, 3  ;;  %v11818_v36 = vshll.u32 %v9170_v37, 16  ;;  %v2318_v15 = vrot.slane %v9170_v37, 1 }
 0x184   : > { %1985 = vmatprep.subr.bf16.mxu0 %v9581_v27  ;;  %3151 = vmatpush1.bf16.msra.mxu1 %v9384_v12  ;;  %v1271_v12 = vrot.slane %v1056_v13, 3  ;;  %v2506_v17 = vsel %vm1221_vm4, %v2494_v14, %v2505_v48 }
 0x185   : > { %1923 = vmatmul.mubr.bf16.gmra.mrb[44].mxu0 %v1262_v49  ;;  %3152 = vmatprep.subr.bf16.mxu1 %v9398_v60  ;;  %v2314_v49 = vrot.slane %v9116_v6, 1  ;;  %v2348_v16 = vor.u32 %v2347_v47, %v2346_v0  ;;  %v1105_v60 = vor.u32 %v1104_v29, %v1101_v33  ;;  %v1058_v6 = vsel %vm1043_vm8, %v1055_v10, %v1057_v62 }
 0x186   : > { %3112 = vmatmul.mubr.bf16.gmra.mrb[40].mxu1 %v2560_v59  ;;  %1932 = vmatprep.mubr.bf16.mxu0 %v1274_v28  ;;  %v8379_v59 = vld [vmem:[#allocation4 + $0x4] ss:$8 sps:$4 sm:$0xff]   ;;  %v1272_v52 = vsel %vm1221_vm4, %v1261_v22, %v1271_v12  ;;  %v2492_v28 = vsel %vm1221_vm4, %v2490_v26, %v2491_v61  ;;  %v2350_v22 = vrot.slane %v2273_v51, 1  ;;  %v2351_v2 = vrot.slane %v11818_v36, 2 }
 0x187   : > { %3154 = vmatprep.mubr.bf16.mxu1 %v2495_v45  ;;  %1986 = vmatpush1.bf16.msra.mxu0 %v9594_v11  ;;  %v2315_v13 = vsel %vm1043_vm8, %v2312_v38, %v2314_v49  ;;  %v1106_v10 = vsel %vm1061_vm6, %v1096_v18, %v1105_v60  ;;  %v1281_v63 = vrot.slane %v1058_v6, 3  ;;  %v1303_v33 = vrot.slane %v1105_v60, 3  ;;  %v8546_v60 = vld [vmem:[#allocation2 + $0x8] sm:$0xff] }
 0x188   : > { %1987 = vmatprep.subr.bf16.mxu0 %v9600_v55  ;;  %3153 = vmatpush1.bf16.msra.mxu1 %v9424_v7  ;;  %v1284_v7 = vsel %vm1221_vm4, %v1273_v46, %v1283_v32  ;;  %v2503_v38 = vrot.slane %v2315_v13, 3  ;;  %v1059_v46 = vrot.slane %v9126_v56, 1  ;;  %v1293_v45 = vrot.slane %v1106_v10, 3 }
 0x189   : > { %3235 = vmatprep.subr.bf16.mxu1 %v9435_v20  ;;  %v2349_v20 = vsel %vm1061_vm6, %v2344_v5, %v2348_v16  ;;  %v2316_v5 = vrot.slane %v9165_v50, 1  ;;  %v2352_v39 = vor.u32 %v2351_v2, %v2350_v22  ;;  %v1282_v18 = vsel %vm1221_vm4, %v1271_v12, %v1281_v63 }
 0x18a   : > { %v2515_v14 = vrot.slane %v2349_v20, 3  ;;  %v2504_v51 = vsel %vm1221_vm4, %v2491_v61, %v2503_v38  ;;  %v1294_v56 = vsel %vm1221_vm4, %v1283_v32, %v1293_v45  ;;  %v1304_v37 = vsel %vm1221_vm4, %v1293_v45, %v1303_v33  ;;  %v9671_v61 = vld [vmem:[#allocation2 + $0x80] sm:$0x1f]  ;;  %v9695_v20 = vld [vmem:[#allocation2 + $0x18] sm:$0xff] }
 0x18b   : > { %1988 = vmatpush1.bf16.msra.mxu0 %v9613_v44  ;;  %v2317_v25 = vsel %vm1043_vm8, %v2314_v49, %v2316_v5  ;;  %v2353_v50 = vsel %vm1061_vm6, %v2348_v16, %v2352_v39  ;;  %v8545_v49 = vld [vmem:[#allocation2 + $0x10] sm:$0xff]  ;;  %v1301_v32 = vrot.slane %v1059_v46, 3  ;;  %v1115_v22 = vrot.slane %v9695_v20, 2  ;;  %v9707_v45 = vld [vmem:[#allocation2 + $0x98] sm:$0xf] }
 0x18c   : > { %4106 = vmatprep.subr.bf16.mxu0 %v8379_v59  ;;  %v2513_v0 = vrot.slane %v2317_v25, 3  ;;  %v2525_v47 = vrot.slane %v2353_v50, 3  ;;  %v1113_v59 = vrot.slane %v8545_v49, 2  ;;  %v8389_v20 = vld [vmem:[#allocation4 + $0x40] ss:$8 sps:$4 sm:$0xff]  }
 0x18d   : > { %1933 = vmatmul.mubr.bf16.gmra.mrb[48].mxu0 %v1272_v52  ;;  %v1111_v52 = vrot.slane %v8546_v60, 2 }
 0x18e   : > { %3155 = vmatmul.mubr.bf16.vlgmr.msra.gmra.mrb[12].mxu1 %v2492_v28  ;;  %1942 = vmatprep.mubr.bf16.mxu0 %v1284_v7  ;;  %v2514_v12 = vsel %vm1221_vm4, %v2503_v38, %v2513_v0  ;;  %v2363_v28 = vshrl.u32 %v9671_v61, 16 }
 0x18f   : > { %3164 = vmatprep.mubr.bf16.mxu1 %v2506_v17  ;;  %3236 = vmatpush1.bf16.msra.mxu1 %v9445_v21  ;;  %v2516_v21 = vsel %vm1221_vm4, %v2505_v48, %v2515_v14  ;;  %v2366_v17 = vshll.u32 %v9671_v61, 16 }
 0x190   : > { %3237 = vmatprep.subr.bf16.mxu1 %v9454_v54  ;;  %v1060_v54 = vsel %vm1043_vm8, %v1057_v62, %v1059_v46  ;;  %v2365_v36 = vrot.slane %v2363_v28, 1  ;;  %v9704_v46 = vld [vmem:[#allocation2 + $0x80] sm:$0xf0] }
 0x191   : > { %v1291_v8 = vrot.slane %v1060_v54, 3  ;;  %v2368_v2 = vrot.slane %v2366_v17, 2  ;;  %v8377_v54 = vld [vmem:[#allocation4] ss:$8 sps:$4 sm:$0xff]   ;;  %v3521_v25 = vrot.slane %v9704_v46, 1 }
 0x193   : > { %3238 = vmatpush1.bf16.msra.mxu1 %v9473_v24  ;;  %v2354_v24 = vrot.slane %v2281_v9, 1  ;;  %v2526_v9 = vsel %vm1221_vm4, %v2515_v14, %v2525_v47  ;;  %v2322_v14 = vrot.slane %v9246_v19, 1  ;;  %v8391_v19 = vld [vmem:[#allocation4 + $0x44] ss:$8 sps:$4 sm:$0xff]  }
 0x194   : > { %3239 = vmatprep.subr.bf16.mxu1 %v9484_v3  ;;  %v2355_v3 = vrot.slane %v2277_v1, 2  ;;  %v1292_v1 = vsel %vm1221_vm4, %v1281_v63, %v1291_v8 }
 0x195   : > { %1943 = vmatmul.mubr.bf16.gmra.mrb[52].mxu0 %v1282_v18  ;;  %v9718_v18 = vld [vmem:[#allocation2 + $0x90] sm:$0xff] }
 0x196   : > { %3165 = vmatmul.mubr.bf16.gmra.mrb[16].mxu1 %v2504_v51  ;;  %1952 = vmatprep.mubr.bf16.mxu0 %v1294_v56  ;;  %v2356_v29 = vor.u32 %v2355_v3, %v2354_v24  ;;  %v9714_v51 = vor.u32 %v2368_v2, %v2365_v36  ;;  %v3524_v50 = vrot.slane %v9718_v18, 1  ;;  %v8382_v3 = vld [vmem:[#allocation4 + $0x14] ss:$8 sps:$4 sm:$0xff]  }
 0x197   : > { %3174 = vmatprep.mubr.bf16.mxu1 %v2516_v21  ;;  %3240 = vmatpush1.bf16.msra.mxu1 %v9497_v31  ;;  %v9661_v31 = vsel %vm1043_vm8, %v2316_v5, %v2318_v15  ;;  %v3485_v21 = vld [vmem:[#allocation2 + $0x80] sm:$0xe0] }
 0x198   : > { %3241 = vmatprep.subr.bf16.mxu1 %v9504_v34  ;;  %v961_v34 = vld [vmem:[#allocation2] sm:$0xe0]  ;;  %v9665_v26 = vsel %vm1061_vm6, %v2352_v39, %v2356_v29  ;;  %v2523_v48 = vrot.slane %v9661_v31, 3  ;;  %v9712_v39 = vsel %vm480_vm1, %v1113_v59, %v1115_v22  ;;  %v9740_v31 = vld [vmem:[#allocation2 + $0x98] sm:$0x1f] }
 0x199   : > { %v1110_v62 = vrot.slane %v961_v34, 2  ;;  %v2535_v16 = vrot.slane %v9665_v26, 3  ;;  %v1245_v26 = vrot.slane %v9712_v39, 3  ;;  %v3560_v60 = vrot.slane %v9740_v31, 2 }
 0x19a   : > { %v2565_v39 = vrot.slane %v9714_v51, 3 }
 0x19b   : > { %3242 = vmatpush1.bf16.msra.mxu1 %v9527_v53  ;;  %v2358_v53 = vrot.slane %v2289_v42, 1  ;;  %v2320_v42 = vrot.slane %v9243_v40, 1  ;;  %v1112_v6 = vsel %vm480_vm1, %v1110_v62, %v1111_v52  ;;  %v1302_v40 = vsel %vm1221_vm4, %v1291_v8, %v1301_v32 }
 0x19c   : > { %3243 = vmatprep.subr.bf16.mxu1 %v9533_v41  ;;  %v2359_v41 = vrot.slane %v2285_v43, 2  ;;  %v2536_v13 = vsel %vm1221_vm4, %v2525_v47, %v2535_v16  ;;  %v1234_v10 = vrot.slane %v1112_v6, 3  ;;  %v3526_v8 = vrot.slane %v9707_v45, 1 }
 0x19d   : > { %1953 = vmatmul.mubr.bf16.gmra.mrb[56].mxu0 %v1292_v1  ;;  %v9690_v7 = vsel %vm1043_vm8, %v2318_v15, %v2320_v42  ;;  %v3555_v47 = vrot.slane %v3485_v21, 2  ;;  %v8549_v21 = vld [vmem:[#allocation2 + $0x28] sm:$0xff] }
 0x19e   : > { %3175 = vmatmul.mubr.bf16.gmra.mrb[20].mxu1 %v2514_v12  ;;  %1962 = vmatprep.mubr.bf16.mxu0 %v1304_v37  ;;  %v2360_v43 = vor.u32 %v2359_v41, %v2358_v53  ;;  %v2533_v63 = vrot.slane %v9690_v7, 3  ;;  %v3527_v34 = vsel %vm1043_vm8, %v3524_v50, %v3526_v8  ;;  %v8380_v37 = vld [vmem:[#allocation4 + $0x10] ss:$8 sps:$4 sm:$0xff]   ;;  %v8385_v41 = vld [vmem:[#allocation4 + $0x24] ss:$8 sps:$4 sm:$0xff]  }
 0x19f   : > { %3184 = vmatprep.mubr.bf16.mxu1 %v2526_v9  ;;  %3244 = vmatpush1.bf16.msra.mxu1 %v9541_v23  ;;  %v2524_v23 = vsel %vm1221_vm4, %v2513_v0, %v2523_v48  ;;  %v9731_v0 = vsel %vm1043_vm8, %v2320_v42, %v2322_v14  ;;  %v3675_v49 = vrot.slane %v3527_v34, 3 }
 0x1a0   : > { %3245 = vmatprep.subr.bf16.mxu1 %v9552_v58  ;;  %v9684_v58 = vsel %vm480_vm1, %v1111_v52, %v1113_v59  ;;  %v2534_v24 = vsel %vm1221_vm4, %v2523_v48, %v2533_v63  ;;  %v2370_v12 = vsel %vm1061_vm6, %v2360_v43, %v9714_v51  ;;  %v2543_v48 = vrot.slane %v9731_v0, 3  ;;  %v8548_v52 = vld [vmem:[#allocation2 + $0x20] sm:$0xff]  ;;  %v8392_v0 = vld [vmem:[#allocation4 + $0x50] ss:$8 sps:$4 sm:$0xff]  }
 0x1a1   : > { %v1235_v38 = vrot.slane %v9684_v58, 3  ;;  %v3558_v59 = vrot.slane %v9718_v18, 2  ;;  %v2555_v32 = vrot.slane %v2370_v12, 3  ;;  %v8551_v12 = vld [vmem:[#allocation2 + $0x50] sm:$0xff] }
 0x1a3   : > { %3246 = vmatpush1.bf16.msra.mxu1 %v9569_v35  ;;  %v9693_v35 = vsel %vm1061_vm6, %v2356_v29, %v2360_v43  ;;  %v1117_v43 = vrot.slane %v8548_v52, 2 }
 0x1a4   : > { %3247 = vmatprep.subr.bf16.mxu1 %v9581_v27  ;;  %v11819_v27 = vmov 0   ;;  %v2545_v5 = vrot.slane %v9693_v35, 3  ;;  %v1246_v35 = vsel %vm1221_vm4, %v1235_v38, %v1245_v26 }
 0x1a5   : > { %1963 = vmatmul.mubr.bf16.gmra.mrb[60].mxu0 %v1302_v40  ;;  %v9760_v40 = vsel %vm480_vm1, %v3558_v59, %v3560_v60 }
 0x1a6   : > { %3185 = vmatmul.mubr.bf16.gmra.mrb[24].mxu1 %v2524_v23  ;;  %2005 = vmatprep.mubr.bf16.mxu0 %v11819_v27  ;;  %v8383_v23 = vld [vmem:[#allocation4 + $0x20] ss:$8 sps:$4 sm:$0xff]   ;;  %v3679_v7 = vrot.slane %v9760_v40, 3  ;;  %v2556_v36 = vsel %vm1221_vm4, %v2545_v5, %v2555_v32  ;;  %v8529_v40 = vld [vmem:[%s11715_s5 + $0xf8] sm:$0xff]  }
 0x1a7   : > { %3194 = vmatprep.mubr.bf16.mxu1 %v2536_v13  ;;  %3248 = vmatpush1.bf16.msra.mxu1 %v9594_v11  ;;  %v9716_v11 = vld [vmem:[#allocation2 + $0x88] sm:$0xff]  ;;  %v8388_v13 = vld [vmem:[#allocation4 + $0x34] ss:$8 sps:$4 sm:$0xff]  }
 0x1a8   : > { %3249 = vmatprep.subr.bf16.mxu1 %v9600_v55  ;;  %v1236_v55 = vsel %vm1221_vm4, %v1234_v10, %v1235_v38  ;;  %v3522_v56 = vrot.slane %v9716_v11, 1  ;;  %v3556_v29 = vrot.slane %v9716_v11, 2  ;;  %v8386_v38 = vld [vmem:[#allocation4 + $0x30] ss:$8 sps:$4 sm:$0xff]  }
 0x1aa   : > { %v3523_v15 = vsel %vm1043_vm8, %v3521_v25, %v3522_v56  ;;  %v3525_v33 = vsel %vm1043_vm8, %v3522_v56, %v3524_v50  ;;  %v3557_v53 = vsel %vm480_vm1, %v3555_v47, %v3556_v29  ;;  %v3559_v17 = vsel %vm480_vm1, %v3556_v29, %v3558_v59  ;;  %v8394_v25 = vld [vmem:[#allocation4 + $0x54] ss:$8 sps:$4 sm:$0xff]  }
 0x1ab   : > { %3250 = vmatpush1.bf16.msra.mxu1 %v9613_v44  ;;  %v2546_v44 = vsel %vm1221_vm4, %v2535_v16, %v2545_v5  ;;  %v3662_v1 = vrot.slane %v3523_v15, 3  ;;  %v3663_v9 = vrot.slane %v3525_v33, 3  ;;  %v2324_v16 = vrot.slane %v9400_v57, 1  ;;  %v8550_v33 = vld [vmem:[#allocation2 + $0x48] sm:$0xff] }
 0x1ac   : > { %v3668_v42 = vrot.slane %v3557_v53, 3  ;;  %v3669_v6 = vrot.slane %v3559_v17, 3  ;;  %v2544_v57 = vsel %vm1221_vm4, %v2533_v63, %v2543_v48  ;;  %v1118_v63 = vsel %vm480_vm1, %v1115_v22, %v1117_v43  ;;  %v8400_v53 = vld [vmem:[#allocation4 + $0x74] ss:$8 sps:$4 sm:$0xff]  }
 0x1ad   : > { %2006 = vmatmul.mubr.bf16.vlgmr.msra.gmra.mrb[32].mxu0 %v1236_v55  ;;  %v9748_v62 = vsel %vm1221_vm4, %v3662_v1, %v3663_v9  ;;  %v9754_v28 = vsel %vm1221_vm4, %v3663_v9, %v3675_v49  ;;  %v2325_v2 = vsel %vm1043_vm8, %v2322_v14, %v2324_v16  ;;  %v1255_v5 = vrot.slane %v1118_v63, 3  ;;  %v8552_v9 = vld [vmem:[#allocation2 + $0x30] sm:$0xff]  ;;  %v8553_v17 = vld [vmem:[#allocation2 + $0x58] sm:$0xff] }
 0x1ae   : > { %3195 = vmatmul.mubr.bf16.gmra.mrb[28].mxu1 %v2534_v24  ;;  %4107 = vmatpush1.bf16.msra.mxu0 %v8377_v54  ;;  %v9772_v10 = vsel %vm1221_vm4, %v3668_v42, %v3669_v6  ;;  %v9780_v58 = vsel %vm1221_vm4, %v3669_v6, %v3679_v7  ;;  %v2553_v14 = vrot.slane %v2325_v2, 3  ;;  %v1119_v54 = vrot.slane %v8549_v21, 2  ;;  %v8554_v6 = vld [vmem:[#allocation2 + $0x38] sm:$0xff] }
 0x1af   : > { %3204 = vmatprep.mubr.bf16.mxu1 %v2546_v44  ;;  %2015 = vmatprep.mubr.bf16.mxu0 %v11819_v27  ;;  %v3685_v22 = vrot.slane %v3526_v8, 3  ;;  %v1256_v56 = vsel %vm1221_vm4, %v1245_v26, %v1255_v5  ;;  %v2566_v50 = vsel %vm1221_vm4, %v2555_v32, %v2565_v39  ;;  %v8397_v8 = vld [vmem:[#allocation4 + $0x64] ss:$8 sps:$4 sm:$0xff]   ;;  %v2563_v47 = vrot.slane %v2324_v16, 3  ;;  %v8398_v32 = vld [vmem:[#allocation4 + $0x70] ss:$8 sps:$4 sm:$0xff]  }
 0x1b0   : > { %4108 = vmatprep.subr.bf16.mxu0 %v8382_v3  ;;  %v2554_v55 = vsel %vm1221_vm4, %v2543_v48, %v2553_v14  ;;  %v1120_v51 = vsel %vm480_vm1, %v1117_v43, %v1119_v54  ;;  %v2228_v3 = vld [vmem:[#allocation2 + $0x40] sm:$0xe0]  ;;  %v2374_v29 = vrot.slane %v8550_v33, 2  ;;  %v2376_v1 = vrot.slane %v8551_v12, 2 }
 0x1b1   : > { %v9788_v24 = vsel %vm1221_vm4, %v3675_v49, %v3685_v22  ;;  %v1265_v44 = vrot.slane %v1120_v51, 3  ;;  %v2373_v15 = vrot.slane %v2228_v3, 2  ;;  %v1121_v34 = vrot.slane %v8552_v9, 2  ;;  %v8403_v16 = vld [vmem:[#allocation4 + $0x84] ss:$8 sps:$4 sm:$0xff]  }
 0x1b2   : > { %4109 = vmatpush1.bf16.msra.mxu0 %v8380_v37  ;;  %v8395_v37 = vld [vmem:[#allocation4 + $0x60] ss:$8 sps:$4 sm:$0xff]   ;;  %v2564_v26 = vsel %vm1221_vm4, %v2553_v14, %v2563_v47  ;;  %v2377_v49 = vsel %vm480_vm1, %v2374_v29, %v2376_v1  ;;  %v8409_v14 = vld [vmem:[#allocation4 + $0xa4] ss:$8 sps:$4 sm:$0xff]   ;;  %v1125_v22 = vrot.slane %v9574_v4, 2  ;;  %v3498_v33 = vshrl.u32 %v9716_v11, 16 }
 0x1b3   : > { %4110 = vmatprep.subr.bf16.mxu0 %v8385_v41  ;;  %v1266_v41 = vsel %vm1221_vm4, %v1255_v5, %v1265_v44  ;;  %v2375_v48 = vsel %vm480_vm1, %v2373_v15, %v2374_v29  ;;  %v1122_v59 = vsel %vm480_vm1, %v1119_v54, %v1121_v34  ;;  %v2497_v52 = vrot.slane %v2377_v49, 3  ;;  %v9805_v39 = vld [vmem:[#allocation2 + $0x80] sm:$0xf8]  ;;  %v8412_v51 = vld [vmem:[#allocation4 + $0xb4] ss:$8 sps:$4 sm:$0xff]  }
 0x1b4   : > { %v2496_v42 = vrot.slane %v2375_v48, 3  ;;  %v1275_v43 = vrot.slane %v1122_v59, 3  ;;  %v8555_v54 = vld [vmem:[#allocation2 + $0x60] sm:$0xff]  ;;  %v8410_v47 = vld [vmem:[#allocation4 + $0xb0] ss:$8 sps:$4 sm:$0xff]   ;;  %v3502_v29 = vshll.u32 %v9718_v18, 16 }
 0x1b5   : > { %2016 = vmatmul.mubr.bf16.gmra.mrb[36].mxu0 %v1246_v35  ;;  %v8415_v12 = vld [vmem:[#allocation4 + $0xc4] ss:$8 sps:$4 sm:$0xff]   ;;  %v8418_v59 = vld [vmem:[#allocation4 + $0xd4] ss:$8 sps:$4 sm:$0xff]  }
 0x1b6   : > { %3205 = vmatmul.mubr.bf16.gmra.mrb[32].mxu1 %v2544_v57  ;;  %4111 = vmatpush1.bf16.msra.mxu0 %v8383_v23  ;;  %v2378_v23 = vrot.slane %v8553_v17, 2  ;;  %v1123_v57 = vrot.slane %v8554_v6, 2  ;;  %v2498_v35 = vsel %vm1221_vm4, %v2496_v42, %v2497_v52  ;;  %v1276_v2 = vsel %vm1221_vm4, %v1265_v44, %v1275_v43  ;;  %v9834_v42 = vld [vmem:[%s11715_s5 + $0x40] sm:$0xff]  }
 0x1b7   : > { %3214 = vmatprep.mubr.bf16.mxu1 %v2556_v36  ;;  %2025 = vmatprep.mubr.bf16.mxu0 %v11819_v27  ;;  %v8406_v36 = vld [vmem:[#allocation4 + $0x94] ss:$8 sps:$4 sm:$0xff]   ;;  %v3504_v48 = vrot.slane %v3502_v29, 1  ;;  %v8416_v17 = vld [vmem:[#allocation4 + $0xd0] ss:$8 sps:$4 sm:$0xff]  }
 0x1b8   : > { %4112 = vmatprep.subr.bf16.mxu0 %v8388_v13  ;;  %v8401_v13 = vld [vmem:[#allocation4 + $0x80] ss:$8 sps:$4 sm:$0xff]   ;;  %v2379_v63 = vsel %vm480_vm1, %v2376_v1, %v2378_v23  ;;  %v1126_v4 = vsel %vm480_vm1, %v1123_v57, %v1125_v22  ;;  %7474 = vmatprep.subr.bf16.mxu1 %v9834_v42 }
 0x1b9   : > { %v2507_v5 = vrot.slane %v2379_v63, 3  ;;  %v1295_v9 = vrot.slane %v1126_v4, 3  ;;  %v8557_v63 = vld [vmem:[#allocation2 + $0x70] sm:$0xff] }
 0x1ba   : > { %4113 = vmatpush1.bf16.msra.mxu0 %v8386_v38  ;;  %v1124_v38 = vsel %vm480_vm1, %v1121_v34, %v1123_v57  ;;  %v8556_v34 = vld [vmem:[#allocation2 + $0x68] sm:$0xff]  ;;  %v3506_v57 = vshrl.u32 %v9718_v18, 16 }
 0x1bb   : > { %4114 = vmatprep.subr.bf16.mxu0 %v8391_v19  ;;  %v8404_v19 = vld [vmem:[#allocation4 + $0x90] ss:$8 sps:$4 sm:$0xff]   ;;  %v1285_v21 = vrot.slane %v1124_v38, 3  ;;  %v2384_v38 = vrot.slane %v8557_v63, 2 }
 0x1bd   : > { %2026 = vmatmul.mubr.bf16.gmra.mrb[40].mxu0 %v1256_v56  ;;  %v3494_v56 = vshll.u32 %v9716_v11, 16  ;;  %v1286_v3 = vsel %vm1221_vm4, %v1275_v43, %v1285_v21  ;;  %v8499_v43 = vld [vmem:[%s11715_s5 + $0x48] sm:$0xff]  }
 0x1be   : > { %3215 = vmatmul.mubr.bf16.gmra.mrb[36].mxu1 %v2554_v55  ;;  %4115 = vmatpush1.bf16.msra.mxu0 %v8389_v20  ;;  %v2380_v20 = vrot.slane %v8555_v54, 2  ;;  %v8407_v55 = vld [vmem:[#allocation4 + $0xa0] ss:$8 sps:$4 sm:$0xff]  }
 0x1bf   : > { %3224 = vmatprep.mubr.bf16.mxu1 %v2566_v50  ;;  %2035 = vmatprep.mubr.bf16.mxu0 %v11819_v27  ;;  %v2508_v50 = vsel %vm1221_vm4, %v2497_v52, %v2507_v5  ;;  %v3496_v15 = vrot.slane %v3494_v56, 1  ;;  %v8498_v52 = vld [vmem:[%s11715_s5] sm:$0xff]  }
 0x1c0   : > { %4116 = vmatprep.subr.bf16.mxu0 %v8394_v25  ;;  %v3489_v25 = vshll.u32 %v9805_v39, 16 }
 0x1c2   : > { %4117 = vmatpush1.bf16.msra.mxu0 %v8392_v0  ;;  %v2381_v0 = vsel %vm480_vm1, %v2378_v23, %v2380_v20  ;;  %v3491_v44 = vrot.slane %v3489_v25, 1 }
 0x1c3   : > { %4118 = vmatprep.subr.bf16.mxu0 %v8397_v8  ;;  %v3487_v8 = vshrl.u32 %v9805_v39, 16  ;;  %v2517_v1 = vrot.slane %v2381_v0, 3  ;;  %v8422_v0 = vld [vmem:[#allocation4 + $0xf0] ss:$8 sps:$4 sm:$0xff]  }
 0x1c5   : > { %2036 = vmatmul.mubr.bf16.gmra.mrb[44].mxu0 %v1266_v41  ;;  %v3500_v41 = vor.u32 %v3498_v33, %v3496_v15  ;;  %v2518_v49 = vsel %vm1221_vm4, %v2507_v5, %v2517_v1  ;;  %v8419_v5 = vld [vmem:[#allocation4 + $0xe0] ss:$8 sps:$4 sm:$0xff]  }
 0x1c6   : > { %3225 = vmatmul.mubr.bf16.gmra.mrb[40].mxu1 %v2564_v26  ;;  %4119 = vmatpush1.bf16.msra.mxu0 %v8395_v37  ;;  %v2382_v37 = vrot.slane %v8556_v34, 2  ;;  %v8413_v26 = vld [vmem:[#allocation4 + $0xc0] ss:$8 sps:$4 sm:$0xff]  }
 0x1c7   : > { %3267 = vmatprep.mubr.bf16.mxu1 %v11819_v27  ;;  %2045 = vmatprep.mubr.bf16.mxu0 %v11819_v27  ;;  %v9845_v6 = vsel %vm962_vm5, %v3500_v41, %v3504_v48  ;;  %v3532_v41 = vshll.u32 %v9704_v46, 16 }
 0x1c8   : > { %4120 = vmatprep.subr.bf16.mxu0 %v8400_v53  ;;  %v3492_v53 = vor.u32 %v3491_v44, %v3487_v8  ;;  %v8427_v8 = vld [vmem:[#allocation4 + $0x104] ss:$8 sps:$4 sm:$0xff]   ;;  %v3514_v44 = vshrl.u32 %v9707_v45, 16 }
 0x1ca   : > { %4121 = vmatpush1.bf16.msra.mxu0 %v8398_v32  ;;  %v1296_v32 = vsel %vm1221_vm4, %v1285_v21, %v1295_v9  ;;  %v3497_v23 = vsel %vm962_vm5, %v3492_v53, %v3496_v15  ;;  %v3508_v21 = vor.u32 %v3506_v57, %v3504_v48  ;;  %v8502_v15 = vld [vmem:[%s11715_s5 + $0x10] sm:$0xff]   ;;  %v3529_v53 = vshrl.u32 %v9704_v46, 16 }
 0x1cb   : > { %4122 = vmatprep.subr.bf16.mxu0 %v8403_v16  ;;  %v9828_v16 = vsel %vm480_vm1, %v2380_v20, %v2382_v37 }
 0x1cc   : > { %v3531_v46 = vrot.slane %v3529_v53, 1  ;;  %v8451_v53 = vld [vmem:[#allocation4 + $0x184] ss:$8 sps:$4 sm:$0xff]  }
 0x1cd   : > { %2046 = vmatmul.mubr.bf16.gmra.mrb[48].mxu0 %v1276_v2  ;;  %v1305_v2 = vrot.slane %v1125_v22, 3  ;;  %v8500_v22 = vld [vmem:[%s11715_s5 + $0x8] sm:$0xff]  }
 0x1ce   : > { %3268 = vmatmul.mubr.bf16.vlgmr.msra.gmra.mrb[12].mxu1 %v2498_v35  ;;  %4123 = vmatpush1.bf16.msra.mxu0 %v8401_v13  ;;  %v3510_v13 = vshll.u32 %v9707_v45, 16  ;;  %v8421_v35 = vld [vmem:[#allocation4 + $0xe4] ss:$8 sps:$4 sm:$0xff]   ;;  %v8425_v45 = vld [vmem:[#allocation4 + $0x100] ss:$8 sps:$4 sm:$0xff]  }
 0x1cf   : > { %3277 = vmatprep.mubr.bf16.mxu1 %v11819_v27  ;;  %2055 = vmatprep.mubr.bf16.mxu0 %v11819_v27  ;;  %v1306_v25 = vsel %vm1221_vm4, %v1295_v9, %v1305_v2  ;;  %v8558_v9 = vld [vmem:[#allocation2 + $0x78] sm:$0xff] }
 0x1d0   : > { %4124 = vmatprep.subr.bf16.mxu0 %v8406_v36  ;;  %v2527_v36 = vrot.slane %v9828_v16, 3  ;;  %7475 = vmatpush3.bf16.msra.mxu1 %v8498_v52  ;;  %v3512_v54 = vrot.slane %v3510_v13, 1  ;;  %v2386_v34 = vrot.slane %v8558_v9, 2  ;;  %v3540_v13 = vrot.slane %v3506_v57, 1  ;;  %v8443_v9 = vld [vmem:[#allocation4 + $0x160] ss:$8 sps:$4 sm:$0xff]  }
 0x1d1   : > { %7476 = vmatprep.subr.bf16.mxu1 %v8499_v43  ;;  %v3536_v43 = vrot.slane %v3498_v33, 1  ;;  %v3671_v33 = vrot.slane %v9718_v18, 3 }
 0x1d2   : > { %4125 = vmatpush1.bf16.msra.mxu0 %v8404_v19  ;;  %v3659_v19 = vrot.slane %v3497_v23, 3  ;;  %v2528_v20 = vsel %vm1221_vm4, %v2517_v1, %v2527_v36  ;;  %v3513_v4 = vsel %vm962_vm5, %v3508_v21, %v3512_v54  ;;  %v3657_v1 = vrot.slane %v9716_v11, 3  ;;  %v3481_v21 = vld [vmem:[#allocation2 + $0x98] sm:$0x7] }
 0x1d3   : > { %4126 = vmatprep.subr.bf16.mxu0 %v8409_v14  ;;  %v3660_v14 = vrot.slane %v9845_v6, 3  ;;  %v2387_v16 = vsel %vm480_vm1, %v2384_v38, %v2386_v34  ;;  %v3534_v23 = vrot.slane %v3532_v41, 2  ;;  %v3537_v6 = vrot.slane %v3494_v56, 2  ;;  %v8454_v41 = vld [vmem:[#allocation4 + $0x194] ss:$8 sps:$4 sm:$0xff]  }
 0x1d4   : > { %7477 = vmatpush3.bf16.msra.mxu1 %v8500_v22  ;;  %v2547_v2 = vrot.slane %v2387_v16, 3  ;;  %v8460_v16 = vld [vmem:[#allocation4 + $0x1b4] ss:$8 sps:$4 sm:$0xff]  }
 0x1d5   : > { %2056 = vmatmul.mubr.bf16.gmra.mrb[52].mxu0 %v1286_v3  ;;  %v3661_v3 = vsel %vm1221_vm4, %v3659_v19, %v3660_v14  ;;  %v8431_v19 = vld [vmem:[#allocation4 + $0x120] ss:$8 sps:$4 sm:$0xff]   ;;  %v3538_v11 = vor.u32 %v3537_v6, %v3536_v43  ;;  %v8458_v43 = vld [vmem:[#allocation4 + $0x1b0] ss:$8 sps:$4 sm:$0xff]   ;;  %v3545_v6 = vshrl.u32 %v9740_v31, 16 }
 0x1d6   : > { %3278 = vmatmul.mubr.bf16.gmra.mrb[16].mxu1 %v2508_v50  ;;  %4127 = vmatpush1.bf16.msra.mxu0 %v8407_v55  ;;  %v8424_v55 = vld [vmem:[#allocation4 + $0xf4] ss:$8 sps:$4 sm:$0xff]   ;;  %v9860_v50 = vsel %vm480_vm1, %v2382_v37, %v2384_v38  ;;  %v2388_v38 = vrot.slane %v9671_v61, 2  ;;  %v8434_v61 = vld [vmem:[#allocation4 + $0x130] ss:$8 sps:$4 sm:$0xff]  }
 0x1d7   : > { %3287 = vmatprep.mubr.bf16.mxu1 %v11819_v27  ;;  %2065 = vmatprep.mubr.bf16.mxu0 %v11819_v27  ;;  %v8503_v37 = vld [vmem:[%s11715_s5 + $0x58] sm:$0xff]  }
 0x1d8   : > { %4128 = vmatprep.subr.bf16.mxu0 %v8412_v51  ;;  %v8501_v51 = vld [vmem:[%s11715_s5 + $0x50] sm:$0xff]   ;;  %v2389_v18 = vsel %vm480_vm1, %v2386_v34, %v2388_v38 }
 0x1d9   : > { %7478 = vmatprep.subr.bf16.mxu1 %v8501_v51 }
 0x1da   : > { %4129 = vmatpush1.bf16.msra.mxu0 %v8410_v47  ;;  %v2537_v47 = vrot.slane %v9860_v50, 3  ;;  %7479 = vmatpush3.bf16.msra.mxu1 %v8502_v15  ;;  %v2557_v50 = vrot.slane %v2389_v18, 3  ;;  %v8440_v15 = vld [vmem:[#allocation4 + $0x150] ss:$8 sps:$4 sm:$0xff]   ;;  %v8475_v18 = vld [vmem:[#allocation4 + $0x204] ss:$8 sps:$4 sm:$0xff]  }
 0x1db   : > { %4130 = vmatprep.subr.bf16.mxu0 %v8415_v12  ;;  %v3656_v12 = vrot.slane %v9805_v39, 3  ;;  %v8430_v39 = vld [vmem:[#allocation4 + $0x114] ss:$8 sps:$4 sm:$0xff]   ;;  %7480 = vmatprep.subr.bf16.mxu1 %v8503_v37 }
 0x1dc   : > { %v2538_v48 = vsel %vm1221_vm4, %v2527_v36, %v2537_v47  ;;  %v8433_v36 = vld [vmem:[#allocation4 + $0x124] ss:$8 sps:$4 sm:$0xff]   ;;  %v2548_v57 = vsel %vm1221_vm4, %v2537_v47, %v2547_v2  ;;  %v8442_v47 = vld [vmem:[#allocation4 + $0x154] ss:$8 sps:$4 sm:$0xff]  }
 0x1dd   : > { %2066 = vmatmul.mubr.bf16.gmra.mrb[56].mxu0 %v1296_v32  ;;  %v3658_v32 = vsel %vm1221_vm4, %v3656_v12, %v3657_v1  ;;  %v8445_v12 = vld [vmem:[#allocation4 + $0x164] ss:$8 sps:$4 sm:$0xff]   ;;  %v8448_v37 = vld [vmem:[#allocation4 + $0x174] ss:$8 sps:$4 sm:$0xff]  }
 0x1de   : > { %3288 = vmatmul.mubr.bf16.gmra.mrb[20].mxu1 %v2518_v49  ;;  %4131 = vmatpush1.bf16.msra.mxu0 %v8413_v26  ;;  %v3673_v26 = vrot.slane %v3513_v4, 3  ;;  %v3516_v49 = vor.u32 %v3514_v44, %v3512_v54  ;;  %v3672_v54 = vsel %vm1221_vm4, %v3657_v1, %v3671_v33  ;;  %v2567_v1 = vrot.slane %v2388_v38, 3 }
 0x1df   : > { %3297 = vmatprep.mubr.bf16.mxu1 %v11819_v27  ;;  %2075 = vmatprep.mubr.bf16.mxu0 %v11819_v27 }
 0x1e0   : > { %4132 = vmatprep.subr.bf16.mxu0 %v8418_v59  ;;  %v8504_v59 = vld [vmem:[%s11715_s5 + $0x18] sm:$0xff]   ;;  %v3674_v52 = vsel %vm1221_vm4, %v3660_v14, %v3673_v26  ;;  %v3683_v63 = vrot.slane %v3516_v49, 3  ;;  %v3535_v14 = vor.u32 %v3534_v23, %v3531_v46  ;;  %v2568_v34 = vsel %vm1221_vm4, %v2557_v50, %v2567_v1  ;;  %v8508_v46 = vld [vmem:[%s11715_s5 + $0x28] sm:$0xff]  }
 0x1e1   : > { %7481 = vmatpush3.bf16.msra.mxu1 %v8504_v59  ;;  %v8452_v49 = vld [vmem:[#allocation4 + $0x190] ss:$8 sps:$4 sm:$0xff]   ;;  %v8457_v59 = vld [vmem:[#allocation4 + $0x1a4] ss:$8 sps:$4 sm:$0xff]   ;;  %v8461_v23 = vld [vmem:[#allocation4 + $0x1c0] ss:$8 sps:$4 sm:$0xff]  }
 0x1e2   : > { %4133 = vmatpush1.bf16.msra.mxu0 %v8416_v17  ;;  %v8428_v17 = vld [vmem:[#allocation4 + $0x110] ss:$8 sps:$4 sm:$0xff]   ;;  %v8496_v1 = vld [vmem:[#allocation4 + $0x274] ss:$8 sps:$4 sm:$0xff]  }
 0x1e3   : > { %4134 = vmatprep.subr.bf16.mxu0 %v8421_v35  ;;  %v3541_v35 = vrot.slane %v3502_v29, 2  ;;  %v3684_v29 = vsel %vm1221_vm4, %v3673_v26, %v3683_v63  ;;  %v8446_v26 = vld [vmem:[#allocation4 + $0x170] ss:$8 sps:$4 sm:$0xff]  }
 0x1e4   : > { %v8464_v63 = vld [vmem:[#allocation4 + $0x1d0] ss:$8 sps:$4 sm:$0xff]  }
 0x1e5   : > { %2076 = vmatmul.mubr.bf16.gmra.mrb[60].mxu0 %v1306_v25  ;;  %v9898_v56 = vor.u32 %v3541_v35, %v3540_v13  ;;  %v8439_v25 = vld [vmem:[#allocation4 + $0x144] ss:$8 sps:$4 sm:$0xff]   ;;  %v3548_v13 = vshll.u32 %v9740_v31, 16  ;;  %v8466_v35 = vld [vmem:[#allocation4 + $0x1d4] ss:$8 sps:$4 sm:$0xff]  }
 0x1e6   : > { %3298 = vmatmul.mubr.bf16.gmra.mrb[24].mxu1 %v2528_v20  ;;  %4135 = vmatpush1.bf16.msra.mxu0 %v8419_v5  ;;  %v8436_v5 = vld [vmem:[#allocation4 + $0x134] ss:$8 sps:$4 sm:$0xff]   ;;  %v3681_v20 = vrot.slane %v3481_v21, 3  ;;  %v8470_v21 = vld [vmem:[#allocation4 + $0x1f0] ss:$8 sps:$4 sm:$0xff]   ;;  %v8526_v31 = vld [vmem:[%s11715_s5 + $0xa8] sm:$0xff]  }
 0x1e7   : > { %3307 = vmatprep.mubr.bf16.mxu1 %v11819_v27  ;;  %4138 = vmatprep.mubr.bf16.mxu0 %v3661_v3  ;;  %v9908_v22 = vsel %vm1061_vm6, %v3538_v11, %v9898_v56  ;;  %v3550_v38 = vrot.slane %v3548_v13, 2 }
 0x1e8   : > { %4136 = vmatprep.subr.bf16.mxu0 %v8424_v55  ;;  %v3539_v55 = vsel %vm1061_vm6, %v3535_v14, %v3538_v11  ;;  %v3666_v3 = vrot.slane %v9908_v22, 3  ;;  %v3682_v4 = vsel %vm1221_vm4, %v3671_v33, %v3681_v20  ;;  %v3547_v33 = vrot.slane %v3545_v6, 1  ;;  %v8467_v14 = vld [vmem:[#allocation4 + $0x1e0] ss:$8 sps:$4 sm:$0xff]   ;;  %v8482_v22 = vld [vmem:[#allocation4 + $0x230] ss:$8 sps:$4 sm:$0xff]  }
 0x1e9   : > { %v3665_v51 = vrot.slane %v3539_v55, 3  ;;  %v8473_v20 = vld [vmem:[#allocation4 + $0x200] ss:$8 sps:$4 sm:$0xff]   ;;  %v8478_v55 = vld [vmem:[#allocation4 + $0x214] ss:$8 sps:$4 sm:$0xff]  }
 0x1ea   : > { %4137 = vmatpush1.bf16.msra.mxu0 %v8422_v0  ;;  %v8437_v0 = vld [vmem:[#allocation4 + $0x140] ss:$8 sps:$4 sm:$0xff]   ;;  %v3551_v11 = vor.u32 %v3550_v38, %v3547_v33 }
 0x1eb   : > { %4169 = vmatprep.subr.bf16.mxu0 %v8427_v8  ;;  %v2558_v8 = vsel %vm1221_vm4, %v2547_v2, %v2557_v50  ;;  %v3667_v44 = vsel %vm1221_vm4, %v3665_v51, %v3666_v3  ;;  %v8512_v2 = vld [vmem:[%s11715_s5 + $0x30] sm:$0xff]   ;;  %v8523_v50 = vld [vmem:[%s11715_s5 + $0x140] sm:$0xff]  }
 0x1ec   : > { %v8481_v51 = vld [vmem:[#allocation4 + $0x224] ss:$8 sps:$4 sm:$0xff]  }
 0x1ed   : > { %4139 = vmatmul.mubr.bf16.vlgmr.msra.gmra.mrb[64].mxu0 %v3658_v32  ;;  %v8455_v32 = vld [vmem:[#allocation4 + $0x1a0] ss:$8 sps:$4 sm:$0xff]  }
 0x1ee   : > { %3308 = vmatmul.mubr.bf16.gmra.mrb[28].mxu1 %v2538_v48  ;;  %4170 = vmatpush1.bf16.msra.mxu0 %v8425_v45  ;;  %v8449_v45 = vld [vmem:[#allocation4 + $0x180] ss:$8 sps:$4 sm:$0xff]   ;;  %v8505_v48 = vld [vmem:[%s11715_s5 + $0x60] sm:$0xff]  }
 0x1ef   : > { %3317 = vmatprep.mubr.bf16.mxu1 %v11819_v27  ;;  %4148 = vmatprep.mubr.bf16.mxu0 %v3674_v52  ;;  %v8507_v52 = vld [vmem:[%s11715_s5 + $0x68] sm:$0xff]  }
 0x1f0   : > { %4171 = vmatprep.subr.bf16.mxu0 %v8430_v39  ;;  %v8506_v39 = vld [vmem:[%s11715_s5 + $0x20] sm:$0xff]   ;;  %7482 = vmatprep.subr.bf16.mxu1 %v8505_v48 }
 0x1f1   : > { %7483 = vmatpush3.bf16.msra.mxu1 %v8506_v39  ;;  %v8521_v48 = vld [vmem:[%s11715_s5 + $0xe0] sm:$0xff]   ;;  %v3689_v39 = vrot.slane %v3560_v60, 3  ;;  %v8527_v60 = vld [vmem:[%s11715_s5 + $0xf0] sm:$0xff]  }
 0x1f2   : > { %4172 = vmatpush1.bf16.msra.mxu0 %v8428_v17  ;;  %v8463_v17 = vld [vmem:[#allocation4 + $0x1c4] ss:$8 sps:$4 sm:$0xff]   ;;  %7484 = vmatprep.subr.bf16.mxu1 %v8507_v52  ;;  %v1207_v52 = vld [vmem:[%s11714_s4] sm:$0x3] }
 0x1f3   : > { %4173 = vmatprep.subr.bf16.mxu0 %v8433_v36  ;;  %v8511_v36 = vld [vmem:[%s11715_s5 + $0x70] sm:$0xff]  }
 0x1f5   : > { %4149 = vmatmul.mubr.bf16.gmra.mrb[68].mxu0 %v3672_v54  ;;  %7485 = vmatpush3.bf16.msra.mxu1 %v8508_v46  ;;  %v3552_v54 = vsel %vm1061_vm6, %v9898_v56, %v3551_v11  ;;  %v8476_v56 = vld [vmem:[#allocation4 + $0x210] ss:$8 sps:$4 sm:$0xff]  }
 0x1f6   : > { %3318 = vmatmul.mubr.bf16.gmra.mrb[32].mxu1 %v2548_v57  ;;  %4174 = vmatpush1.bf16.msra.mxu0 %v8431_v19  ;;  %v8469_v19 = vld [vmem:[#allocation4 + $0x1e4] ss:$8 sps:$4 sm:$0xff]   ;;  %v8472_v57 = vld [vmem:[#allocation4 + $0x1f4] ss:$8 sps:$4 sm:$0xff]  }
 0x1f7   : > { %3327 = vmatprep.mubr.bf16.mxu1 %v11819_v27  ;;  %4158 = vmatprep.mubr.bf16.mxu0 %v3684_v29  ;;  %v8518_v29 = vld [vmem:[%s11715_s5 + $0x38] sm:$0xff]  }
 0x1f8   : > { %4175 = vmatprep.subr.bf16.mxu0 %v8436_v5  ;;  %7486 = vmatprep.subr.bf16.mxu1 %v8511_v36  ;;  %v8517_v5 = vld [vmem:[%s11715_s5 + $0x78] sm:$0xff]  }
 0x1f9   : > { %7487 = vmatpush3.bf16.msra.mxu1 %v8512_v2 }
 0x1fa   : > { %4176 = vmatpush1.bf16.msra.mxu0 %v8434_v61  ;;  %7488 = vmatprep.subr.bf16.mxu1 %v8517_v5  ;;  %v3677_v61 = vrot.slane %v3552_v54, 3 }
 0x1fb   : > { %4177 = vmatprep.subr.bf16.mxu0 %v8439_v25 }
 0x1fc   : > { %v3678_v25 = vsel %vm1221_vm4, %v3666_v3, %v3677_v61  ;;  %v8487_v3 = vld [vmem:[#allocation4 + $0x244] ss:$8 sps:$4 sm:$0xff]  }
 0x1fd   : > { %4159 = vmatmul.mubr.bf16.gmra.mrb[72].mxu0 %v3682_v4  ;;  %7489 = vmatpush3.bf16.msra.mxu1 %v8518_v29  ;;  %v8479_v4 = vld [vmem:[#allocation4 + $0x220] ss:$8 sps:$4 sm:$0xff]  }
 0x1fe   : > { %3328 = vmatmul.mubr.bf16.gmra.mrb[36].mxu1 %v2558_v8  ;;  %4178 = vmatpush1.bf16.msra.mxu0 %v8437_v0  ;;  %v3687_v0 = vrot.slane %v3551_v11, 3  ;;  %v8484_v8 = vld [vmem:[#allocation4 + $0x234] ss:$8 sps:$4 sm:$0xff]  }
 0x1ff   : > { %3337 = vmatprep.mubr.bf16.mxu1 %v11819_v27  ;;  %4201 = vmatprep.mubr.bf16.mxu0 %v3667_v44  ;;  %v8490_v44 = vld [vmem:[#allocation4 + $0x254] ss:$8 sps:$4 sm:$0xff]  }
 0x200   : > { %4179 = vmatprep.subr.bf16.mxu0 %v8442_v47  ;;  %7698 = vmatprep.subr.bf16.mxu1 %v8523_v50  ;;  %v8485_v47 = vld [vmem:[#allocation4 + $0x240] ss:$8 sps:$4 sm:$0xff]  }
 0x202   : > { %4180 = vmatpush1.bf16.msra.mxu0 %v8440_v15  ;;  %v8488_v15 = vld [vmem:[#allocation4 + $0x250] ss:$8 sps:$4 sm:$0xff]  }
 0x203   : > { %4181 = vmatprep.subr.bf16.mxu0 %v8445_v12  ;;  %v8493_v12 = vld [vmem:[#allocation4 + $0x264] ss:$8 sps:$4 sm:$0xff]  }
 0x206   : > { %3338 = vmatmul.mubr.bf16.gmra.mrb[40].mxu1 %v2568_v34  ;;  %4182 = vmatpush1.bf16.msra.mxu0 %v8443_v9  ;;  %v8494_v9 = vld [vmem:[#allocation4 + $0x270] ss:$8 sps:$4 sm:$0xff]  }
 0x207   : > { %4183 = vmatprep.subr.bf16.mxu0 %v8448_v37  ;;  %v9960_v34 = vld [vmem:[%s11715_s5 + $0xc0] sm:$0xff]   ;;  %v8513_v37 = vld [vmem:[%s11715_s5 + $0xc8] sm:$0xff]  }
 0x20a   : > { %4184 = vmatpush1.bf16.msra.mxu0 %v8446_v26  ;;  %v8514_v26 = vld [vmem:[%s11715_s5 + $0x88] sm:$0xff]  }
 0x20b   : > { %4185 = vmatprep.subr.bf16.mxu0 %v8451_v53  ;;  %v8515_v53 = vld [vmem:[%s11715_s5 + $0xd0] sm:$0xff]  }
 0x20e   : > { %4186 = vmatpush1.bf16.msra.mxu0 %v8449_v45  ;;  %v8516_v45 = vld [vmem:[%s11715_s5 + $0x90] sm:$0xff]  }
 0x20f   : > { %4187 = vmatprep.subr.bf16.mxu0 %v8454_v41  ;;  %v8520_v41 = vld [vmem:[%s11715_s5 + $0x98] sm:$0xff]  }
 0x212   : > { %4188 = vmatpush1.bf16.msra.mxu0 %v8452_v49  ;;  %v3690_v49 = vsel %vm1221_vm4, %v3679_v7, %v3689_v39  ;;  %v8530_v7 = vld [vmem:[%s11715_s5 + $0xb8] sm:$0xff]  }
 0x213   : > { %4189 = vmatprep.subr.bf16.mxu0 %v8457_v59  ;;  %v8528_v59 = vld [vmem:[%s11715_s5 + $0xb0] sm:$0xff]  }
 0x216   : > { %4190 = vmatpush1.bf16.msra.mxu0 %v8455_v32  ;;  %v11820_v32 = vld [vmem:[#allocation7_spill] sm:$0xff] }
 0x217   : > { %4191 = vmatprep.subr.bf16.mxu0 %v8460_v16  ;;  %v10019_v16 = vsub.s32 0, %v11820_v32  ;;  %v10025_v46 = vsub.s32 1, %v11820_v32 }
 0x21a   : > { %4192 = vmatpush1.bf16.msra.mxu0 %v8458_v43  ;;  %v10028_v43 = vrot.slane %v1207_v52, %v10019_v16 }
 0x21b   : > { %4193 = vmatprep.subr.bf16.mxu0 %v8463_v17  ;;  %v10031_v17 = vrot.slane %v1207_v52, %v10025_v46 }
 0x21e   : > { %4194 = vmatpush1.bf16.msra.mxu0 %v8461_v23 }
 0x21f   : > { %4195 = vmatprep.subr.bf16.mxu0 %v8466_v35 }
 0x222   : > { %4196 = vmatpush1.bf16.msra.mxu0 %v8464_v63 }
 0x223   : > { %4197 = vmatprep.subr.bf16.mxu0 %v8469_v19 }
 0x226   : > { %4198 = vmatpush1.bf16.msra.mxu0 %v8467_v14 }
 0x227   : > { %4199 = vmatprep.subr.bf16.mxu0 %v8472_v57 }
 0x22a   : > { %4200 = vmatpush1.bf16.msra.mxu0 %v8470_v21 }
 0x22b   : > { %4232 = vmatprep.subr.bf16.mxu0 %v8475_v18 }
 0x22d   : > { %4202 = vmatmul.mubr.bf16.vlgmr.msra.gmra.mrb[64].mxu0 %v9748_v62  ;;  %v3688_v62 = vsel %vm1221_vm4, %v3677_v61, %v3687_v0  ;;  %v2470_v0 = vld [vmem:[%s11714_s4] sm:$0x3] }
 0x22e   : > { %4211 = vmatprep.mubr.bf16.mxu0 %v3678_v25  ;;  %4233 = vmatpush1.bf16.msra.mxu0 %v8473_v20 }
 0x22f   : > { %4234 = vmatprep.subr.bf16.mxu0 %v8478_v55 }
 0x232   : > { %4235 = vmatpush1.bf16.msra.mxu0 %v8476_v56 }
 0x233   : > { %4236 = vmatprep.subr.bf16.mxu0 %v8481_v51 }
 0x235   : > { %4212 = vmatmul.mubr.bf16.gmra.mrb[68].mxu0 %v9754_v28  ;;  %v8491_v28 = vld [vmem:[#allocation4 + $0x260] ss:$8 sps:$4 sm:$0xff]  }
 0x236   : > { %4237 = vmatpush1.bf16.msra.mxu0 %v8479_v4  ;;  %4221 = vmatprep.mubr.bf16.mxu0 %v3688_v62 }
 0x237   : > { %4238 = vmatprep.subr.bf16.mxu0 %v8484_v8 }
 0x23a   : > { %4239 = vmatpush1.bf16.msra.mxu0 %v8482_v22 }
 0x23b   : > { %4240 = vmatprep.subr.bf16.mxu0 %v8487_v3 }
 0x23d   : > { %4222 = vmatmul.mubr.bf16.gmra.mrb[72].mxu0 %v9788_v24  ;;  %v8510_v24 = vld [vmem:[%s11715_s5 + $0x80] sm:$0xff]  }
 0x23e   : > { %4241 = vmatpush1.bf16.msra.mxu0 %v8485_v47  ;;  %4264 = vmatprep.mubr.bf16.mxu0 %v11819_v27  ;;  %v10045_v47 = vrot.slane %v2470_v0, %v10025_v46 }
 0x23f   : > { %4242 = vmatprep.subr.bf16.mxu0 %v8490_v44 }
 0x242   : > { %4243 = vmatpush1.bf16.msra.mxu0 %v8488_v15 }
 0x243   : > { %4244 = vmatprep.subr.bf16.mxu0 %v8493_v12 }
 0x246   : > { %4245 = vmatpush1.bf16.msra.mxu0 %v8491_v28 }
 0x247   : > { %4246 = vmatprep.subr.bf16.mxu0 %v8496_v1 }
 0x24a   : > { %4247 = vmatpush1.bf16.msra.mxu0 %v8494_v9 }
 0x24b   : > { %7586 = vmatprep.subr.bf16.mxu0 %v9960_v34 }
 0x24d   : > { %4265 = vmatmul.mubr.bf16.vlgmr.msra.gmra.mrb[64].mxu0 %v9772_v10  ;;  %v8519_v10 = vld [vmem:[%s11715_s5 + $0xd8] sm:$0xff]  }
 0x24e   : > { %4274 = vmatprep.mubr.bf16.mxu0 %v11819_v27  ;;  %7587 = vmatpush3.bf16.msra.mxu0 %v8510_v24  ;;  %v10050_v24 = vrot.slane %v2470_v0, %v10019_v16 }
 0x24f   : > { %7588 = vmatprep.subr.bf16.mxu0 %v8513_v37 }
 0x252   : > { %7589 = vmatpush3.bf16.msra.mxu0 %v8514_v26 }
 0x253   : > { %7590 = vmatprep.subr.bf16.mxu0 %v8515_v53 }
 0x255   : > { %4275 = vmatmul.mubr.bf16.gmra.mrb[68].mxu0 %v9780_v58  ;;  %v8522_v58 = vld [vmem:[%s11715_s5 + $0xa0] sm:$0xff]  }
 0x256   : > { %4284 = vmatprep.mubr.bf16.mxu0 %v11819_v27  ;;  %7591 = vmatpush3.bf16.msra.mxu0 %v8516_v45  ;;  %v8525_v27 = vld [vmem:[%s11715_s5 + $0xe8] sm:$0xff]  }
 0x257   : > { %7592 = vmatprep.subr.bf16.mxu0 %v8519_v10 }
 0x25a   : > { %7593 = vmatpush3.bf16.msra.mxu0 %v8520_v41 }
 0x25b   : > { %7594 = vmatprep.subr.bf16.mxu0 %v8521_v48 }
 0x25d   : > { %4285 = vmatmul.mubr.bf16.gmra.mrb[72].mxu0 %v3690_v49 }
 0x25e   : > { %7595 = vmatpush3.bf16.msra.mxu0 %v8522_v58 }
 0x25f   : > { %7596 = vmatprep.subr.bf16.mxu0 %v8525_v27 }
 0x262   : > { %7597 = vmatpush3.bf16.msra.mxu0 %v8526_v31 }
 0x263   : > { %7598 = vmatprep.subr.bf16.mxu0 %v8527_v60 }
 0x266   : > { %7599 = vmatpush3.bf16.msra.mxu0 %v8528_v59 }
 0x267   : > { %7600 = vmatprep.subr.bf16.mxu0 %v8529_v40 }
 0x26a   : > { %7601 = vmatpush3.bf16.msra.mxu0 %v8530_v7 }
 0x26b   : > { %7810 = vmatprep.subr.bf16.mxu0 %v9834_v42 }
 0x280   : > { %v2007_v23 = vpop.f32.mrb[32].mxu0 }
 0x281   : > { %v7980_v6 = vadd.f32 %v2007_v23, %v10028_v43  ;;  %v2009_v42 = vpop.f32.mrb[33].mxu0 }
 0x282   : > { %v7981_v13 = vadd.f32 %v2009_v42, %v10031_v17  ;;  %v2011_v35 = vpop.f32.mrb[34].mxu0 }
 0x283   : > { %v7982_v36 = vadd.f32 %v2011_v35, %v10028_v43  ;;  %v2013_v2 = vpop.f32.mrb[35].mxu0  ;;  %v2086_v33 = vmax.f32 %v7980_v6, 0.0 }
 0x284   : > { %v7983_v63 = vadd.f32 %v2013_v2, %v10031_v17  ;;  %v2087_v19 = vmax.f32 %v7981_v13, 0.0 }
 0x285   : > { %v2088_v38 = vmax.f32 %v7982_v36, 0.0 }
 0x286   : > { %v2089_v14 = vmax.f32 %v7983_v63, 0.0 }
 0x287   : > { %v2118_v11 = vpack.c.bf16 %v2088_v38, %v2086_v33 }
 0x288   : > { %v2119_v57 = vpack.c.bf16 %v2089_v14, %v2087_v19  ;;  %v2017_v5 = vpop.f32.mrb[36].mxu0 }
 0x289   : > { %v2150_v29 = vrot.slane %v2118_v11, 4  ;;  %v7984_v21 = vadd.f32 %v2017_v5, %v10028_v43  ;;  %v2019_v54 = vpop.f32.mrb[37].mxu0 }
 0x28a   : > { %v2151_v18 = vrot.slane %v2119_v57, 4  ;;  %v7985_v61 = vadd.f32 %v2019_v54, %v10031_v17  ;;  %v2021_v20 = vpop.f32.mrb[38].mxu0 }
 0x28b   : > { %2198 = vst [vmem:[#allocation3] sm:$0xf0] %v2150_v29  ;;  %v7986_v55 = vadd.f32 %v2021_v20, %v10028_v43  ;;  %v2023_v25 = vpop.f32.mrb[39].mxu0  ;;  %v2090_v56 = vmax.f32 %v7984_v21, 0.0 }
 0x28c   : > { %2199 = vst [vmem:[#allocation3 + $0x8] sm:$0xf0] %v2151_v18  ;;  %v7987_v50 = vadd.f32 %v2023_v25, %v10031_v17  ;;  %v2091_v4 = vmax.f32 %v7985_v61, 0.0 }
 0x28d   : > { %v2092_v51 = vmax.f32 %v7986_v55, 0.0 }
 0x28e   : > { %v2093_v8 = vmax.f32 %v7987_v50, 0.0 }
 0x28f   : > { %v2120_v62 = vpack.c.bf16 %v2092_v51, %v2090_v56 }
 0x290   : > { %v2121_v22 = vpack.c.bf16 %v2093_v8, %v2091_v4  ;;  %v2027_v3 = vpop.f32.mrb[40].mxu0 }
 0x291   : > { %v2152_v44 = vrot.slane %v2120_v62, 4  ;;  %v7988_v15 = vadd.f32 %v2027_v3, %v10028_v43  ;;  %v2029_v12 = vpop.f32.mrb[41].mxu0 }
 0x292   : > { %v2154_v28 = vrot.slane %v2121_v22, 4  ;;  %v7989_v1 = vadd.f32 %v2029_v12, %v10031_v17  ;;  %v2031_v9 = vpop.f32.mrb[42].mxu0  ;;  %v4357_v37 = vld [vmem:[#allocation3] sm:$0xf8] }
 0x293   : > { %v2153_v26 = vsel %vm709_vm3, %v2150_v29, %v2152_v44  ;;  %v2094_v53 = vmax.f32 %v7988_v15, 0.0  ;;  %v7990_v45 = vadd.f32 %v2031_v9, %v10028_v43  ;;  %v2033_v10 = vpop.f32.mrb[43].mxu0  ;;  %v4358_v41 = vld [vmem:[#allocation3 + $0x8] sm:$0xf8]  ;;  %v4870_v48 = vshrl.u32 %v4357_v37, 16 }
 0x294   : > { %2200 = vst [vmem:[#allocation3 + $0x10] sm:$0xff] %v2153_v26  ;;  %v2155_v39 = vsel %vm709_vm3, %v2151_v18, %v2154_v28  ;;  %v2095_v58 = vmax.f32 %v7989_v1, 0.0  ;;  %v7991_v27 = vadd.f32 %v2033_v10, %v10031_v17  ;;  %v4882_v49 = vshrl.u32 %v4358_v41, 16 }
 0x295   : > { %2201 = vst [vmem:[#allocation3 + $0x18] sm:$0xff] %v2155_v39  ;;  %v2096_v31 = vmax.f32 %v7990_v45, 0.0  ;;  %v4415_v60 = vshll.u32 %v2155_v39, 16  ;;  %v4427_v59 = vshrl.u32 %v2155_v39, 16  ;;  %v4885_v40 = vshll.u32 %v4358_v41, 16  ;;  %v8524_v45 = vld [vmem:[%s11715_s5 + $0x100] sm:$0xff]  }
 0x296   : > { %v2097_v7 = vmax.f32 %v7991_v27, 0.0  ;;  %v4884_v32 = vrot.slane %v4882_v49, 3  ;;  %v4403_v52 = vshll.u32 %v2153_v26, 16  ;;  %v4419_v23 = vshrl.u32 %v2153_v26, 16 }
 0x297   : > { %v10056_v6 = vpack.c.bf16 %v2096_v31, %v2094_v53  ;;  %v10058_v42 = vrot.slane %v4415_v60, 1  ;;  %v4887_v13 = vrot.slane %v4885_v40, 4  ;;  %v4889_v35 = vrot.slane %v4427_v59, 3  ;;  %v8531_v31 = vld [vmem:[%s11715_s5 + $0x148] sm:$0xff]  }
 0x298   : > { %v10060_v36 = vpack.c.bf16 %v2097_v7, %v2095_v58  ;;  %v2037_v2 = vpop.f32.mrb[44].mxu0  ;;  %v4890_v63 = vrot.slane %v4415_v60, 4  ;;  %v10062_v33 = vrot.slane %v4403_v52, 1  ;;  %v4872_v38 = vrot.slane %v4870_v48, 3 }
 0x299   : > { %v2156_v19 = vrot.slane %v10056_v6, 4  ;;  %v7992_v14 = vadd.f32 %v2037_v2, %v10028_v43  ;;  %v2039_v11 = vpop.f32.mrb[45].mxu0  ;;  %v10067_v57 = vor.u32 %v4427_v59, %v10058_v42  ;;  %v4888_v5 = vor.u32 %v4887_v13, %v4884_v32 }
 0x29a   : > { %v2158_v29 = vrot.slane %v10060_v36, 4  ;;  %v7993_v21 = vadd.f32 %v2039_v11, %v10031_v17  ;;  %v2041_v54 = vpop.f32.mrb[46].mxu0  ;;  %v10071_v18 = vor.u32 %v4890_v63, %v4889_v35  ;;  %v10074_v61 = vor.u32 %v4419_v23, %v10062_v33 }
 0x29b   : > { %v10077_v20 = vsel %vm709_vm3, %v2152_v44, %v2156_v19  ;;  %v2098_v55 = vmax.f32 %v7992_v14, 0.0  ;;  %v7994_v25 = vadd.f32 %v2041_v54, %v10028_v43  ;;  %v2043_v50 = vpop.f32.mrb[47].mxu0  ;;  %v4873_v56 = vshll.u32 %v4357_v37, 16 }
 0x29c   : > { %v2159_v51 = vsel %vm709_vm3, %v2154_v28, %v2158_v29  ;;  %v2099_v0 = vmax.f32 %v7993_v21, 0.0  ;;  %v7995_v4 = vadd.f32 %v2043_v50, %v10031_v17  ;;  %v4892_v8 = vsel %vm4868_vm9, %v4888_v5, %v10071_v18  ;;  %v8532_v21 = vld [vmem:[%s11715_s5 + $0x108] sm:$0xff]   ;;  %v8533_v50 = vld [vmem:[%s11715_s5 + $0x150] sm:$0xff]  }
 0x29d   : > { %2203 = vst [vmem:[#allocation3 + $0x28] sm:$0xff] %v2159_v51  ;;  %v2100_v62 = vmax.f32 %v7994_v25, 0.0  ;;  %6037 = vmatprep.mubr.bf16.mxu1 %v4892_v8  ;;  %v4875_v22 = vrot.slane %v4873_v56, 4  ;;  %v4877_v3 = vrot.slane %v4419_v23, 3  ;;  %v4878_v44 = vrot.slane %v4403_v52, 4 }
 0x29e   : > { %v2101_v15 = vmax.f32 %v7995_v4, 0.0  ;;  %v4431_v12 = vshll.u32 %v2159_v51, 16  ;;  %v4443_v1 = vshrl.u32 %v2159_v51, 16  ;;  %v4423_v9 = vshll.u32 %v10077_v20, 16 }
 0x29f   : > { %v10085_v37 = vpack.c.bf16 %v2100_v62, %v2098_v55  ;;  %v4876_v26 = vor.u32 %v4875_v22, %v4872_v38  ;;  %v10087_v53 = vor.u32 %v4878_v44, %v4877_v3  ;;  %v4435_v10 = vshrl.u32 %v10077_v20, 16 }
 0x2a0   : > { %v10093_v41 = vpack.c.bf16 %v2101_v15, %v2099_v0  ;;  %v2047_v48 = vpop.f32.mrb[48].mxu0  ;;  %v10096_v27 = vrot.slane %v4431_v12, 1  ;;  %v4965_v49 = vrot.slane %v4443_v1, 3  ;;  %v4966_v4 = vrot.slane %v4431_v12, 4  ;;  %v8534_v12 = vld [vmem:[%s11715_s5 + $0x110] sm:$0xff]  }
 0x2a1   : > { %v3269_v28 = vpop.f32.mrb[12].mxu1  ;;  %v2160_v60 = vrot.slane %v10085_v37, 4  ;;  %v7996_v59 = vadd.f32 %v2047_v48, %v10028_v43  ;;  %v2049_v40 = vpop.f32.mrb[49].mxu0  ;;  %v4880_v52 = vsel %vm4868_vm9, %v4876_v26, %v10087_v53  ;;  %v10137_v62 = vrot.slane %v4423_v9, 1 }
 0x2a2   : > { %v8012_v39 = vadd.f32 %v3269_v28, %v10050_v24  ;;  %v3271_v58 = vpop.f32.mrb[13].mxu1  ;;  %v2162_v23 = vrot.slane %v10093_v41, 4  ;;  %v7997_v13 = vadd.f32 %v2049_v40, %v10031_v17  ;;  %v2051_v35 = vpop.f32.mrb[50].mxu0  ;;  %6038 = vmatmul.mubr.bf16.vlgmr.msra.gmra.mrb[44].mxu1 %v4880_v52  ;;  %v10131_v0 = vor.u32 %v4443_v1, %v10096_v27 }
 0x2a3   : > { %v8013_v7 = vadd.f32 %v3271_v58, %v10045_v47  ;;  %v3273_v32 = vpop.f32.mrb[14].mxu1  ;;  %v10112_v63 = vsel %vm709_vm3, %v2156_v19, %v2160_v60  ;;  %v2102_v38 = vmax.f32 %v7996_v59, 0.0  ;;  %v7998_v11 = vadd.f32 %v2051_v35, %v10028_v43  ;;  %v2053_v5 = vpop.f32.mrb[51].mxu0  ;;  %7699 = vmatpush3.bf16.msra.mxu1 %v8524_v45 }
 0x2a4   : > { %v3348_v6 = vmax.f32 %v8012_v39, 0.0  ;;  %v8014_v36 = vadd.f32 %v3273_v32, %v10050_v24  ;;  %v3275_v2 = vpop.f32.mrb[15].mxu1  ;;  %2204 = vst [vmem:[#allocation3 + $0x30] sm:$0xff] %v10112_v63  ;;  %v10122_v54 = vsel %vm709_vm3, %v2158_v29, %v2162_v23  ;;  %v2103_v55 = vmax.f32 %v7997_v13, 0.0  ;;  %7700 = vmatprep.subr.bf16.mxu1 %v8531_v31 }
 0x2a5   : > { %v3349_v14 = vmax.f32 %v8013_v7, 0.0  ;;  %v7999_v25 = vadd.f32 %v2053_v5, %v10031_v17  ;;  %2205 = vst [vmem:[#allocation3 + $0x38] sm:$0xff] %v10122_v54  ;;  %v2104_v56 = vmax.f32 %v7998_v11, 0.0  ;;  %v8015_v51 = vadd.f32 %v3275_v2, %v10045_v47 }
 0x2a6   : > { %v3350_v19 = vmax.f32 %v8014_v36, 0.0  ;;  %v4705_v22 = vrot.slane %v10077_v20, 1  ;;  %v10142_v28 = vor.u32 %v4966_v4, %v4965_v49  ;;  %v4961_v26 = vrot.slane %v4435_v10, 3  ;;  %v8535_v49 = vld [vmem:[%s11715_s5 + $0x158] sm:$0xff]  }
 0x2a7   : > { %v2105_v8 = vmax.f32 %v7999_v25, 0.0  ;;  %v10140_v3 = vpack.c.bf16 %v2104_v56, %v2102_v38  ;;  %v3351_v44 = vmax.f32 %v8015_v51, 0.0  ;;  %7701 = vmatpush3.bf16.msra.mxu1 %v8532_v21  ;;  %v10152_v31 = vor.u32 %v4435_v10, %v10137_v62  ;;  %v4392_v25 = vld [vmem:[#allocation3 + $0x8] sm:$0xf0]  ;;  %v8537_v51 = vld [vmem:[%s11715_s5 + $0x160] sm:$0xff]  }
 0x2a8   : > { %v10133_v29 = vpack.c.bf16 %v3350_v19, %v3348_v6  ;;  %v2057_v48 = vpop.f32.mrb[52].mxu0  ;;  %7702 = vmatprep.subr.bf16.mxu1 %v8533_v50 }
 0x2a9   : > { %v3279_v15 = vpop.f32.mrb[16].mxu1  ;;  %v10148_v45 = vpack.c.bf16 %v2105_v8, %v2103_v55  ;;  %v2164_v59 = vrot.slane %v10140_v3, 4  ;;  %v10158_v40 = vpack.c.bf16 %v3351_v44, %v3349_v14  ;;  %v8000_v7 = vadd.f32 %v2057_v48, %v10028_v43  ;;  %v2059_v32 = vpop.f32.mrb[53].mxu0  ;;  %v8536_v14 = vld [vmem:[%s11715_s5 + $0x118] sm:$0xff]  }
 0x2aa   : > { %v3412_v1 = vrot.slane %v10133_v29, 4  ;;  %v8016_v39 = vadd.f32 %v3279_v15, %v10050_v24  ;;  %v3281_v58 = vpop.f32.mrb[17].mxu1  ;;  %v8001_v35 = vadd.f32 %v2059_v32, %v10031_v17  ;;  %v2061_v36 = vpop.f32.mrb[54].mxu0  ;;  %v4962_v8 = vrot.slane %v4423_v9, 4 }
 0x2ab   : > { %v8017_v52 = vadd.f32 %v3281_v58, %v10045_v47  ;;  %v3283_v6 = vpop.f32.mrb[18].mxu1  ;;  %v2166_v10 = vrot.slane %v10148_v45, 4  ;;  %v10175_v11 = vsel %vm709_vm3, %v2160_v60, %v2164_v59  ;;  %v3413_v5 = vrot.slane %v10158_v40, 4  ;;  %v2063_v19 = vpop.f32.mrb[55].mxu0  ;;  %7703 = vmatpush3.bf16.msra.mxu1 %v8534_v12 }
 0x2ac   : > { %3460 = vst [vmem:[#allocation3 + $0x80] sm:$0xf0] %v3412_v1  ;;  %v3352_v13 = vmax.f32 %v8016_v39, 0.0  ;;  %v8018_v2 = vadd.f32 %v3283_v6, %v10050_v24  ;;  %v3285_v38 = vpop.f32.mrb[19].mxu1  ;;  %v2106_v21 = vmax.f32 %v8000_v7, 0.0  ;;  %2206 = vst [vmem:[#allocation3 + $0x40] sm:$0xff] %v10175_v11  ;;  %v8002_v60 = vadd.f32 %v2061_v36, %v10028_v43  ;;  %7704 = vmatprep.subr.bf16.mxu1 %v8535_v49 }
 0x2ad   : > { %v3353_v55 = vmax.f32 %v8017_v52, 0.0  ;;  %v10184_v50 = vsel %vm709_vm3, %v2162_v23, %v2166_v10  ;;  %v2107_v37 = vmax.f32 %v8001_v35, 0.0  ;;  %3461 = vst [vmem:[#allocation3 + $0x88] sm:$0xf0] %v3413_v5  ;;  %v8003_v4 = vadd.f32 %v2063_v19, %v10031_v17 }
 0x2ae   : > { %v3354_v56 = vmax.f32 %v8018_v2, 0.0  ;;  %2207 = vst [vmem:[#allocation3 + $0x48] sm:$0xff] %v10184_v50  ;;  %v8019_v41 = vadd.f32 %v3285_v38, %v10045_v47  ;;  %v4968_v23 = vsel %vm4868_vm9, %v10071_v18, %v10142_v28  ;;  %v2108_v44 = vmax.f32 %v8002_v60, 0.0  ;;  %v8538_v18 = vld [vmem:[%s11715_s5 + $0x120] sm:$0xff]  }
 0x2af   : > { %6045 = vmatprep.mubr.bf16.mxu1 %v4968_v23  ;;  %v4408_v12 = vshrl.u32 %v4392_v25, 16  ;;  %v4410_v48 = vshll.u32 %v4392_v25, 16  ;;  %v2109_v39 = vmax.f32 %v8003_v4, 0.0  ;;  %v10202_v49 = vor.u32 %v4962_v8, %v4961_v26  ;;  %7705 = vmatpush3.bf16.msra.mxu1 %v8536_v14 }
 0x2b0   : > { %v10200_v15 = vpack.c.bf16 %v3354_v56, %v3352_v13  ;;  %v3355_v58 = vmax.f32 %v8019_v41, 0.0  ;;  %v4434_v32 = vsel %vm962_vm5, %v10067_v57, %v10096_v27  ;;  %v10210_v9 = vpack.c.bf16 %v2108_v44, %v2106_v21  ;;  %v2067_v6 = vpop.f32.mrb[56].mxu0  ;;  %7706 = vmatprep.subr.bf16.mxu1 %v8537_v51  ;;  %v8539_v57 = vld [vmem:[%s11715_s5 + $0x168] sm:$0xff]  }
 0x2b1   : > { %v3289_v7 = vpop.f32.mrb[20].mxu1  ;;  %v4412_v35 = vrot.slane %v4410_v48, 1  ;;  %v10219_v27 = vpack.c.bf16 %v2109_v39, %v2107_v37  ;;  %v4964_v2 = vsel %vm4868_vm9, %v10087_v53, %v10202_v49  ;;  %v8004_v38 = vadd.f32 %v2067_v6, %v10028_v43  ;;  %v2069_v14 = vpop.f32.mrb[57].mxu0  ;;  %v4391_v39 = vld [vmem:[#allocation3] sm:$0xf0] }
 0x2b2   : > { %v3414_v52 = vrot.slane %v10200_v15, 4  ;;  %v10214_v13 = vadd.f32 %v3289_v7, %v10050_v24  ;;  %v3291_v26 = vpop.f32.mrb[21].mxu1  ;;  %v10221_v36 = vpack.c.bf16 %v3355_v58, %v3353_v55  ;;  %v2168_v19 = vrot.slane %v10210_v9, 4  ;;  %6046 = vmatmul.mubr.bf16.gmra.mrb[48].mxu1 %v4964_v2  ;;  %v2071_v60 = vpop.f32.mrb[58].mxu0  ;;  %v8541_v58 = vld [vmem:[%s11715_s5 + $0x170] sm:$0xff]  }
 0x2b3   : > { %v3293_v21 = vpop.f32.mrb[22].mxu1  ;;  %v10235_v37 = vadd.f32 %v2069_v14, %v10031_v17  ;;  %v2170_v56 = vrot.slane %v10219_v27, 4  ;;  %v2110_v4 = vmax.f32 %v8004_v38, 0.0  ;;  %v10240_v41 = vadd.f32 %v3291_v26, %v10045_v47  ;;  %v2073_v29 = vpop.f32.mrb[59].mxu0  ;;  %7707 = vmatpush3.bf16.msra.mxu1 %v8538_v18 }
 0x2b4   : > { %v3415_v25 = vsel %vm709_vm3, %v3412_v1, %v3414_v52  ;;  %v3356_v55 = vmax.f32 %v10214_v13, 0.0  ;;  %v3295_v53 = vpop.f32.mrb[23].mxu1  ;;  %v3416_v51 = vrot.slane %v10221_v36, 4  ;;  %v8540_v1 = vld [vmem:[%s11715_s5 + $0x128] sm:$0xff]   ;;  %v10250_v23 = vsel %vm709_vm3, %v2164_v59, %v2168_v19  ;;  %7708 = vmatprep.subr.bf16.mxu1 %v8539_v57 }
 0x2b5   : > { %3462 = vst [vmem:[#allocation3 + $0x90] sm:$0xff] %v3415_v25  ;;  %v2111_v8 = vmax.f32 %v10235_v37, 0.0  ;;  %v4413_v44 = vor.u32 %v4412_v35, %v4408_v12  ;;  %v4919_v48 = vshrl.u32 %v4434_v32, 16  ;;  %2208 = vst [vmem:[#allocation3 + $0x50] sm:$0xff] %v10250_v23  ;;  %v10262_v3 = vsel %vm709_vm3, %v2166_v10, %v2170_v56 }
 0x2b6   : > { %v10269_v59 = vsel %vm709_vm3, %v3413_v5, %v3416_v51  ;;  %v3357_v12 = vmax.f32 %v10240_v41, 0.0  ;;  %v4922_v7 = vshll.u32 %v4434_v32, 16  ;;  %2209 = vst [vmem:[#allocation3 + $0x58] sm:$0xff] %v10262_v3  ;;  %v8006_v10 = vadd.f32 %v2071_v60, %v10028_v43  ;;  %v8542_v32 = vld [vmem:[%s11715_s5 + $0x130] sm:$0xff]  }
 0x2b7   : > { %3463 = vst [vmem:[#allocation3 + $0x98] sm:$0xff] %v10269_v59  ;;  %v4418_v45 = vsel %vm962_vm5, %v4413_v44, %v10058_v42  ;;  %v4921_v18 = vrot.slane %v4919_v48, 3  ;;  %v8022_v6 = vadd.f32 %v3293_v21, %v10050_v24  ;;  %v4396_v5 = vshrl.u32 %v4391_v39, 16  ;;  %7709 = vmatpush3.bf16.msra.mxu1 %v8540_v1 }
 0x2b8   : > { %v4911_v13 = vshrl.u32 %v4418_v45, 16  ;;  %v4914_v40 = vshll.u32 %v4418_v45, 16  ;;  %v4924_v26 = vrot.slane %v4922_v7, 4  ;;  %v2112_v57 = vmax.f32 %v8006_v10, 0.0  ;;  %v10286_v14 = vpop.f32.mrb[60].mxu0  ;;  %7710 = vmatprep.subr.bf16.mxu1 %v8541_v58 }
 0x2b9   : > { %v10278_v35 = vpop.f32.mrb[24].mxu1  ;;  %v3358_v2 = vmax.f32 %v8022_v6, 0.0  ;;  %v4398_v38 = vshll.u32 %v4391_v39, 16  ;;  %v4426_v42 = vsel %vm962_vm5, %v10074_v61, %v10137_v62  ;;  %v10292_v44 = vpop.f32.mrb[61].mxu0 }
 0x2ba   : > { %v10288_v21 = vpop.f32.mrb[25].mxu1  ;;  %v4913_v25 = vrot.slane %v4911_v13, 3  ;;  %v4916_v60 = vrot.slane %v4914_v40, 4  ;;  %v10290_v41 = vor.u32 %v4924_v26, %v4921_v18  ;;  %v4902_v1 = vshrl.u32 %v4426_v42, 16  ;;  %v10300_v62 = vpop.f32.mrb[62].mxu0 }
 0x2bb   : > { %v10294_v48 = vpop.f32.mrb[26].mxu1  ;;  %v10296_v7 = vpack.c.bf16 %v2112_v57, %v2110_v4  ;;  %v10298_v39 = vpack.c.bf16 %v3358_v2, %v3356_v55  ;;  %v4400_v45 = vrot.slane %v4398_v38, 1  ;;  %v4905_v61 = vshll.u32 %v4426_v42, 16  ;;  %v10306_v40 = vpop.f32.mrb[63].mxu0  ;;  %7711 = vmatpush3.bf16.msra.mxu1 %v8542_v32  ;;  %v8543_v55 = vld [vmem:[%s11715_s5 + $0x178] sm:$0xff]  }
 0x2bc   : > { %v10302_v10 = vpop.f32.mrb[27].mxu1  ;;  %v4917_v58 = vor.u32 %v4916_v60, %v4913_v25  ;;  %v4904_v6 = vrot.slane %v4902_v1, 3  ;;  %v8007_v18 = vadd.f32 %v2073_v29, %v10031_v17  ;;  %v8023_v13 = vadd.f32 %v3295_v53, %v10045_v47  ;;  %7712 = vmatprep.subr.bf16.mxu1 %v8543_v55  ;;  %v8544_v32 = vld [vmem:[%s11715_s5 + $0x138] sm:$0xff]  }
 0x2bd   : > { %v2172_v4 = vrot.slane %v10296_v7, 4  ;;  %v3418_v26 = vrot.slane %v10298_v39, 4  ;;  %v4401_v57 = vor.u32 %v4400_v45, %v4396_v5  ;;  %v4907_v2 = vrot.slane %v4905_v61, 4  ;;  %v8564_v7 = vld [vmem:[%s11715_s5 + $0x58] sm:$0xff]  }
 0x2be   : > { %v4926_v38 = vsel %vm4868_vm9, %v4917_v58, %v10290_v41  ;;  %v2113_v42 = vmax.f32 %v8007_v18, 0.0  ;;  %v3359_v29 = vmax.f32 %v8023_v13, 0.0  ;;  %v4447_v53 = vshll.u32 %v10122_v54, 16 }
 0x2bf   : > { %6198 = vmatprep.mubr.bf16.mxu0 %v4926_v38  ;;  %v10324_v5 = vsel %vm709_vm3, %v2168_v19, %v2172_v4  ;;  %v10331_v25 = vsel %vm709_vm3, %v3414_v52, %v3418_v26  ;;  %v4406_v60 = vsel %vm962_vm5, %v4401_v57, %v10062_v33  ;;  %v10335_v1 = vor.u32 %v4907_v2, %v4904_v6 }
 0x2c0   : > { %2210 = vst [vmem:[#allocation3 + $0x60] sm:$0xff] %v10324_v5  ;;  %3464 = vst [vmem:[#allocation3 + $0xa0] sm:$0xff] %v10331_v25  ;;  %v4894_v9 = vshrl.u32 %v4406_v60, 16  ;;  %v4897_v45 = vshll.u32 %v4406_v60, 16  ;;  %v10341_v19 = vpack.c.bf16 %v2113_v42, %v2111_v8  ;;  %v10343_v61 = vpack.c.bf16 %v3359_v29, %v3357_v12  ;;  %7713 = vmatpush3.bf16.msra.mxu1 %v8544_v32 }
 0x2c1   : > { %v10345_v15 = vpop.f32.mrb[28].mxu1  ;;  %v4449_v52 = vrot.slane %v4447_v53, 1  ;;  %v4459_v33 = vshrl.u32 %v10122_v54, 16  ;;  %v5010_v58 = vrot.slane %v4447_v53, 4  ;;  %v4439_v6 = vshll.u32 %v10112_v63, 16  ;;  %7844 = vmatprep.subr.bf16.mxu1 %v9960_v34 }
 0x2c2   : > { %v10349_v18 = vpop.f32.mrb[29].mxu1  ;;  %v4896_v13 = vrot.slane %v4894_v9, 3  ;;  %v4899_v55 = vrot.slane %v4897_v45, 4  ;;  %v2174_v37 = vrot.slane %v10341_v19, 4  ;;  %v3420_v8 = vrot.slane %v10343_v61, 4 }
 0x2c3   : > { %v10354_v12 = vpop.f32.mrb[30].mxu1  ;;  %v10356_v57 = vor.u32 %v4459_v33, %v4449_v52  ;;  %v5009_v2 = vrot.slane %v4459_v33, 3  ;;  %v4441_v38 = vrot.slane %v4439_v6, 1  ;;  %v4451_v54 = vshrl.u32 %v10112_v63, 16 }
 0x2c4   : > { %v10359_v42 = vpop.f32.mrb[31].mxu1  ;;  %v4900_v29 = vor.u32 %v4899_v55, %v4896_v13  ;;  %v10366_v34 = vsel %vm709_vm3, %v2170_v56, %v2174_v37  ;;  %v10373_v53 = vsel %vm709_vm3, %v3416_v51, %v3420_v8  ;;  %v5006_v32 = vrot.slane %v4439_v6, 4 }
 0x2c5   : > { %2211 = vst [vmem:[#allocation3 + $0x68] sm:$0xff] %v10366_v34  ;;  %3465 = vst [vmem:[#allocation3 + $0xa8] sm:$0xff] %v10373_v53  ;;  %v10377_v63 = vor.u32 %v5010_v58, %v5009_v2  ;;  %v10379_v60 = vor.u32 %v4451_v54, %v4441_v38  ;;  %v5005_v27 = vrot.slane %v4451_v54, 3  ;;  %v8008_v56 = vadd.f32 %v10286_v14, %v10028_v43 }
 0x2c6   : > { %v4909_v9 = vsel %vm4868_vm9, %v4900_v29, %v10335_v1  ;;  %v8024_v36 = vadd.f32 %v10278_v35, %v10050_v24  ;;  %v8009_v51 = vadd.f32 %v10292_v44, %v10031_v17  ;;  %v8025_v45 = vadd.f32 %v10288_v21, %v10045_v47  ;;  %v8559_v21 = vld [vmem:[%s11715_s5] sm:$0xff]  }
 0x2c7   : > { %6199 = vmatmul.mubr.bf16.vlgmr.msra.gmra.mrb[76].mxu0 %v4909_v9  ;;  %v5012_v33 = vsel %vm4868_vm9, %v10142_v28, %v10377_v63  ;;  %v10394_v58 = vor.u32 %v5006_v32, %v5005_v27  ;;  %v2114_v14 = vmax.f32 %v8008_v56, 0.0  ;;  %v4450_v6 = vsel %vm962_vm5, %v10131_v0, %v4449_v52  ;;  %v8560_v32 = vld [vmem:[%s11715_s5 + $0x48] sm:$0xff]  }
 0x2c8   : > { %6053 = vmatprep.mubr.bf16.mxu1 %v5012_v33  ;;  %v3360_v13 = vmax.f32 %v8024_v36, 0.0  ;;  %v2115_v35 = vmax.f32 %v8009_v51, 0.0  ;;  %v3361_v55 = vmax.f32 %v8025_v45, 0.0  ;;  %v4979_v2 = vshrl.u32 %v4450_v6, 16  ;;  %7811 = vmatpush3.bf16.msra.mxu0 %v8559_v21 }
 0x2c9   : > { %v10398_v44 = vpop.f32.mrb[32].mxu1  ;;  %v5008_v28 = vsel %vm4868_vm9, %v10202_v49, %v10394_v58  ;;  %v4982_v54 = vshll.u32 %v4450_v6, 16  ;;  %v8010_v0 = vadd.f32 %v10300_v62, %v10028_v43  ;;  %v8026_v52 = vadd.f32 %v10294_v48, %v10050_v24  ;;  %7812 = vmatprep.subr.bf16.mxu0 %v8560_v32 }
 0x2ca   : > { %v10410_v29 = vpop.f32.mrb[33].mxu1  ;;  %6054 = vmatmul.mubr.bf16.gmra.mrb[52].mxu1 %v5008_v28  ;;  %v4981_v27 = vrot.slane %v4979_v2, 3  ;;  %v4442_v56 = vsel %vm962_vm5, %v10152_v31, %v4441_v38  ;;  %v8011_v49 = vadd.f32 %v10306_v40, %v10031_v17  ;;  %v8027_v43 = vadd.f32 %v10302_v10, %v10045_v47  ;;  %v8561_v17 = vld [vmem:[%s11715_s5 + $0x8] sm:$0xff]   ;;  %v8562_v28 = vld [vmem:[%s11715_s5 + $0x50] sm:$0xff]  }
 0x2cb   : > { %v10421_v62 = vpop.f32.mrb[34].mxu1  ;;  %v4984_v48 = vrot.slane %v4982_v54, 4  ;;  %v2116_v9 = vmax.f32 %v8010_v0, 0.0  ;;  %v3362_v36 = vmax.f32 %v8026_v52, 0.0  ;;  %v4970_v51 = vshrl.u32 %v4442_v56, 16 }
 0x2cc   : > { %v10423_v45 = vpop.f32.mrb[35].mxu1  ;;  %v4973_v33 = vshll.u32 %v4442_v56, 16  ;;  %v2117_v6 = vmax.f32 %v8011_v49, 0.0  ;;  %v3363_v2 = vmax.f32 %v8027_v43, 0.0  ;;  %v4463_v21 = vshll.u32 %v10184_v50, 16  ;;  %7813 = vmatpush3.bf16.msra.mxu0 %v8561_v17 }
 0x2cd   : > { %v10429_v31 = vor.u32 %v4984_v48, %v4981_v27  ;;  %v2132_v10 = vpack.c.bf16 %v2116_v9, %v2114_v14  ;;  %v10431_v40 = vpack.c.bf16 %v3362_v36, %v3360_v13  ;;  %v4972_v38 = vrot.slane %v4970_v51, 3  ;;  %7814 = vmatprep.subr.bf16.mxu0 %v8562_v28 }
 0x2ce   : > { %v4975_v54 = vrot.slane %v4973_v33, 4  ;;  %v2133_v0 = vpack.c.bf16 %v2117_v6, %v2115_v35  ;;  %v10436_v52 = vpack.c.bf16 %v3363_v2, %v3361_v55  ;;  %v4465_v32 = vrot.slane %v4463_v21, 1  ;;  %v8563_v55 = vld [vmem:[%s11715_s5 + $0x10] sm:$0xff]  }
 0x2cf   : > { %v4986_v56 = vsel %vm4868_vm9, %v10290_v41, %v10429_v31  ;;  %v2176_v27 = vrot.slane %v2132_v10, 4  ;;  %v3422_v14 = vrot.slane %v10431_v40, 4  ;;  %v4475_v13 = vshrl.u32 %v10184_v50, 16 }
 0x2d0   : > { %6206 = vmatprep.mubr.bf16.mxu0 %v4986_v56  ;;  %v10443_v49 = vor.u32 %v4975_v54, %v4972_v38  ;;  %v2178_v43 = vrot.slane %v2133_v0, 4  ;;  %v3424_v48 = vrot.slane %v10436_v52, 4  ;;  %v5054_v9 = vrot.slane %v4463_v21, 4  ;;  %7815 = vmatpush3.bf16.msra.mxu0 %v8563_v55  ;;  %v8566_v0 = vld [vmem:[%s11715_s5 + $0x60] sm:$0xff]  }
 0x2d1   : > { %v10446_v35 = vpop.f32.mrb[36].mxu1  ;;  %v10454_v41 = vsel %vm709_vm3, %v2172_v4, %v2176_v27  ;;  %2214 = vst [vmem:[#allocation3 + $0x80] sm:$0xf] %v2176_v27  ;;  %v10461_v50 = vsel %vm709_vm3, %v3418_v26, %v3422_v14  ;;  %v10463_v36 = vor.u32 %v4475_v13, %v4465_v32  ;;  %v5053_v51 = vrot.slane %v4475_v13, 3  ;;  %7816 = vmatprep.subr.bf16.mxu0 %v8564_v7 }
 0x2d2   : > { %v10465_v33 = vpop.f32.mrb[37].mxu1  ;;  %2212 = vst [vmem:[#allocation3 + $0x70] sm:$0xff] %v10454_v41  ;;  %3466 = vst [vmem:[#allocation3 + $0xb0] sm:$0xff] %v10461_v50  ;;  %v4977_v39 = vsel %vm4868_vm9, %v10335_v1, %v10443_v49  ;;  %v10478_v4 = vsel %vm709_vm3, %v2174_v37, %v2178_v43  ;;  %v10485_v26 = vsel %vm709_vm3, %v3420_v8, %v3424_v48  ;;  %v4455_v6 = vshll.u32 %v10175_v11, 16 }
 0x2d3   : > { %2215 = vst [vmem:[#allocation3 + $0x88] sm:$0xf] %v2178_v43  ;;  %v10488_v2 = vpop.f32.mrb[38].mxu1  ;;  %6207 = vmatmul.mubr.bf16.gmra.mrb[80].mxu0 %v4977_v39  ;;  %2213 = vst [vmem:[#allocation3 + $0x78] sm:$0xff] %v10478_v4  ;;  %v10492_v1 = vor.u32 %v5054_v9, %v5053_v51  ;;  %v4467_v19 = vshrl.u32 %v10175_v11, 16  ;;  %v8028_v37 = vadd.f32 %v10345_v15, %v10050_v24  ;;  %v8565_v11 = vld [vmem:[%s11715_s5 + $0x18] sm:$0xff]  }
 0x2d4   : > { %3467 = vst [vmem:[#allocation3 + $0xb8] sm:$0xff] %v10485_v26  ;;  %v8029_v61 = vadd.f32 %v10349_v18, %v10045_v47  ;;  %v10499_v8 = vpop.f32.mrb[39].mxu1  ;;  %v4457_v21 = vrot.slane %v4455_v6, 1  ;;  %v5050_v17 = vrot.slane %v4455_v6, 4  ;;  %v4466_v10 = vsel %vm962_vm5, %v10356_v57, %v4465_v32  ;;  %7817 = vmatpush3.bf16.msra.mxu0 %v8565_v11  ;;  %v8567_v6 = vld [vmem:[%s11715_s5 + $0x20] sm:$0xff]  }
 0x2d5   : > { %v8030_v38 = vadd.f32 %v10354_v12, %v10050_v24  ;;  %v5056_v15 = vsel %vm4868_vm9, %v10377_v63, %v10492_v1  ;;  %v5049_v18 = vrot.slane %v4467_v19, 3  ;;  %v3364_v28 = vmax.f32 %v8028_v37, 0.0  ;;  %7818 = vmatprep.subr.bf16.mxu0 %v8566_v0 }
 0x2d6   : > { %v3365_v54 = vmax.f32 %v8029_v61, 0.0  ;;  %6061 = vmatprep.mubr.bf16.mxu1 %v5056_v15  ;;  %v10514_v57 = vor.u32 %v4467_v19, %v4457_v21  ;;  %v5023_v12 = vshrl.u32 %v4466_v10, 16  ;;  %v5026_v32 = vshll.u32 %v4466_v10, 16 }
 0x2d7   : > { %v3366_v56 = vmax.f32 %v8030_v38, 0.0  ;;  %v10516_v27 = vor.u32 %v5050_v17, %v5049_v18  ;;  %v4458_v13 = vsel %vm962_vm5, %v10379_v60, %v4457_v21  ;;  %v8031_v63 = vadd.f32 %v10359_v42, %v10045_v47  ;;  %v8568_v21 = vld [vmem:[%s11715_s5 + $0x68] sm:$0xff]  }
 0x2d8   : > { %v4479_v43 = vshll.u32 %v10262_v3, 16  ;;  %v5025_v9 = vrot.slane %v5023_v12, 3  ;;  %v5028_v55 = vrot.slane %v5026_v32, 4  ;;  %v5014_v7 = vshrl.u32 %v4458_v13, 16  ;;  %7819 = vmatpush3.bf16.msra.mxu0 %v8567_v6 }
 0x2d9   : > { %v10523_v51 = vpack.c.bf16 %v3366_v56, %v3364_v28  ;;  %v10525_v39 = vpop.f32.mrb[40].mxu1  ;;  %v5052_v60 = vsel %vm4868_vm9, %v10394_v58, %v10516_v27  ;;  %v5017_v19 = vshll.u32 %v4458_v13, 16  ;;  %v3367_v42 = vmax.f32 %v8031_v63, 0.0  ;;  %7820 = vmatprep.subr.bf16.mxu0 %v8568_v21  ;;  %v8569_v13 = vld [vmem:[%s11715_s5 + $0x28] sm:$0xff]  }
 0x2da   : > { %v4481_v37 = vrot.slane %v4479_v43, 1  ;;  %v10533_v61 = vpop.f32.mrb[41].mxu1  ;;  %6062 = vmatmul.mubr.bf16.gmra.mrb[56].mxu1 %v5052_v60  ;;  %v10538_v17 = vor.u32 %v5028_v55, %v5025_v9  ;;  %v5016_v38 = vrot.slane %v5014_v7, 3  ;;  %v4491_v11 = vshrl.u32 %v10262_v3, 16 }
 0x2db   : > { %v3426_v10 = vrot.slane %v10523_v51, 4  ;;  %v10542_v15 = vpop.f32.mrb[42].mxu1  ;;  %v5019_v58 = vrot.slane %v5017_v19, 4  ;;  %v10544_v18 = vpack.c.bf16 %v3367_v42, %v3365_v54  ;;  %v5098_v28 = vrot.slane %v4479_v43, 4 }
 0x2dc   : > { %v4471_v0 = vshll.u32 %v10250_v23, 16  ;;  %v10547_v12 = vpop.f32.mrb[43].mxu1  ;;  %v5030_v32 = vsel %vm4868_vm9, %v10429_v31, %v10538_v17  ;;  %v10559_v56 = vor.u32 %v4491_v11, %v4481_v37  ;;  %v5097_v54 = vrot.slane %v4491_v11, 3  ;;  %7821 = vmatpush3.bf16.msra.mxu0 %v8569_v13 }
 0x2dd   : > { %v10557_v3 = vsel %vm709_vm3, %v3422_v14, %v3426_v10  ;;  %6214 = vmatprep.mubr.bf16.mxu0 %v5030_v32  ;;  %v10565_v63 = vor.u32 %v5019_v58, %v5016_v38  ;;  %v3428_v31 = vrot.slane %v10544_v18, 4  ;;  %v4483_v40 = vshrl.u32 %v10250_v23, 16  ;;  %v8570_v14 = vld [vmem:[%s11715_s5 + $0x70] sm:$0xff]  }
 0x2de   : > { %3468 = vst [vmem:[#allocation3 + $0xc0] sm:$0xff] %v10557_v3  ;;  %v4473_v43 = vrot.slane %v4471_v0, 1  ;;  %7822 = vmatprep.subr.bf16.mxu0 %v8570_v14  ;;  %v5099_v9 = vor.u32 %v5098_v28, %v5097_v54  ;;  %v5094_v55 = vrot.slane %v4471_v0, 4  ;;  %v8032_v7 = vadd.f32 %v10398_v44, %v10050_v24  ;;  %v8571_v58 = vld [vmem:[%s11715_s5 + $0x30] sm:$0xff]   ;;  %v8572_v0 = vld [vmem:[%s11715_s5 + $0x78] sm:$0xff]  }
 0x2df   : > { %v8033_v6 = vadd.f32 %v10410_v29, %v10045_v47  ;;  %v5021_v60 = vsel %vm4868_vm9, %v10443_v49, %v10565_v63  ;;  %v10584_v23 = vsel %vm709_vm3, %v3424_v48, %v3428_v31  ;;  %v5093_v42 = vrot.slane %v4483_v40, 3 }
 0x2e0   : > { %v10586_v19 = vor.u32 %v4483_v40, %v4473_v43  ;;  %6215 = vmatmul.mubr.bf16.gmra.mrb[84].mxu0 %v5021_v60  ;;  %3469 = vst [vmem:[#allocation3 + $0xc8] sm:$0xff] %v10584_v23  ;;  %v5100_v44 = vsel %vm4868_vm9, %v10492_v1, %v5099_v9  ;;  %v3368_v29 = vmax.f32 %v8032_v7, 0.0  ;;  %v4482_v49 = vsel %vm962_vm5, %v10463_v36, %v4481_v37 }
 0x2e1   : > { %v3369_v21 = vmax.f32 %v8033_v6, 0.0  ;;  %6069 = vmatprep.mubr.bf16.mxu1 %v5100_v44  ;;  %v10593_v38 = vor.u32 %v5094_v55, %v5093_v42  ;;  %v5067_v52 = vshrl.u32 %v4482_v49, 16  ;;  %v5070_v48 = vshll.u32 %v4482_v49, 16  ;;  %7823 = vmatpush3.bf16.msra.mxu0 %v8571_v58  ;;  %v8573_v6 = vld [vmem:[%s11715_s5 + $0x38] sm:$0xff]   ;;  %v8574_v49 = vld [vmem:[%s11715_s5 + $0x140] sm:$0xff]  }
 0x2e2   : > { %v8034_v11 = vadd.f32 %v10421_v62, %v10050_v24  ;;  %v4474_v1 = vsel %vm962_vm5, %v10514_v57, %v4473_v43  ;;  %v8035_v28 = vadd.f32 %v10423_v45, %v10045_v47  ;;  %v4495_v36 = vshll.u32 %v10366_v34, 16  ;;  %7824 = vmatprep.subr.bf16.mxu0 %v8572_v0 }
 0x2e3   : > { %v4507_v37 = vshrl.u32 %v10366_v34, 16  ;;  %v5096_v62 = vsel %vm4868_vm9, %v10516_v27, %v10593_v38  ;;  %v5069_v32 = vrot.slane %v5067_v52, 3  ;;  %v5072_v54 = vrot.slane %v5070_v48, 4 }
 0x2e4   : > { %v3370_v13 = vmax.f32 %v8034_v11, 0.0  ;;  %6070 = vmatmul.mubr.bf16.gmra.mrb[60].mxu1 %v5096_v62  ;;  %v5058_v57 = vshrl.u32 %v4474_v1, 16  ;;  %v5061_v43 = vshll.u32 %v4474_v1, 16  ;;  %v3371_v45 = vmax.f32 %v8035_v28, 0.0 }
 0x2e5   : > { %v4497_v40 = vrot.slane %v4495_v36, 1  ;;  %v10612_v14 = vor.u32 %v5072_v54, %v5069_v32  ;;  %v5141_v55 = vrot.slane %v4507_v37, 3  ;;  %v5142_v7 = vrot.slane %v4495_v36, 4  ;;  %7825 = vmatpush3.bf16.msra.mxu0 %v8573_v6 }
 0x2e6   : > { %v10614_v34 = vpack.c.bf16 %v3370_v13, %v3368_v29  ;;  %v5060_v27 = vrot.slane %v5058_v57, 3  ;;  %v5063_v60 = vrot.slane %v5061_v43, 4  ;;  %v10619_v42 = vpack.c.bf16 %v3371_v45, %v3369_v21  ;;  %7878 = vmatprep.subr.bf16.mxu0 %v8574_v49 }
 0x2e7   : > { %v10621_v44 = vor.u32 %v4507_v37, %v4497_v40  ;;  %v5074_v29 = vsel %vm4868_vm9, %v10538_v17, %v10612_v14  ;;  %v10630_v48 = vor.u32 %v5142_v7, %v5141_v55  ;;  %v4487_v11 = vshll.u32 %v10324_v5, 16 }
 0x2e8   : > { %v3430_v52 = vrot.slane %v10614_v34, 4  ;;  %6222 = vmatprep.mubr.bf16.mxu0 %v5074_v29  ;;  %v5064_v21 = vor.u32 %v5063_v60, %v5060_v27  ;;  %v3432_v58 = vrot.slane %v10619_v42, 4  ;;  %v4499_v1 = vshrl.u32 %v10324_v5, 16 }
 0x2e9   : > { %v8036_v28 = vadd.f32 %v10446_v35, %v10050_v24  ;;  %v5144_v17 = vsel %vm4868_vm9, %v5099_v9, %v10630_v48  ;;  %v4489_v37 = vrot.slane %v4487_v11, 1  ;;  %v5138_v0 = vrot.slane %v4487_v11, 4 }
 0x2ea   : > { %v10640_v36 = vsel %vm709_vm3, %v3426_v10, %v3430_v52  ;;  %v5065_v62 = vsel %vm4868_vm9, %v10565_v63, %v5064_v21  ;;  %v10652_v5 = vsel %vm709_vm3, %v3428_v31, %v3432_v58  ;;  %6077 = vmatprep.mubr.bf16.mxu1 %v5144_v17  ;;  %v5137_v35 = vrot.slane %v4499_v1, 3 }
 0x2eb   : > { %3470 = vst [vmem:[#allocation3 + $0xd0] sm:$0xff] %v10640_v36  ;;  %v3372_v51 = vmax.f32 %v8036_v28, 0.0  ;;  %6223 = vmatmul.mubr.bf16.gmra.mrb[88].mxu0 %v5065_v62  ;;  %3471 = vst [vmem:[#allocation3 + $0xd8] sm:$0xff] %v10652_v5  ;;  %v10655_v10 = vor.u32 %v4499_v1, %v4489_v37  ;;  %v8037_v9 = vadd.f32 %v10465_v33, %v10045_v47  ;;  %v4511_v27 = vshll.u32 %v10478_v4, 16  ;;  %v4374_v28 = vld [vmem:[#allocation3 + $0x88] sm:$0xff] }
 0x2ec   : > { %v4498_v63 = vsel %vm962_vm5, %v10559_v56, %v4497_v40  ;;  %v8038_v18 = vadd.f32 %v10488_v2, %v10050_v24  ;;  %v5139_v32 = vor.u32 %v5138_v0, %v5137_v35  ;;  %v4490_v13 = vsel %vm962_vm5, %v10586_v19, %v4489_v37 }
 0x2ed   : > { %v5111_v31 = vshrl.u32 %v4498_v63, 16  ;;  %v5114_v54 = vshll.u32 %v4498_v63, 16  ;;  %v3373_v57 = vmax.f32 %v8037_v9, 0.0  ;;  %v5102_v45 = vshrl.u32 %v4490_v13, 16 }
 0x2ee   : > { %v3374_v43 = vmax.f32 %v8038_v18, 0.0  ;;  %v5105_v34 = vshll.u32 %v4490_v13, 16  ;;  %v5140_v55 = vsel %vm4868_vm9, %v10593_v38, %v5139_v32  ;;  %v8039_v56 = vadd.f32 %v10499_v8, %v10045_v47 }
 0x2ef   : > { %v5113_v33 = vrot.slane %v5111_v31, 3  ;;  %v5116_v7 = vrot.slane %v5114_v54, 4  ;;  %6078 = vmatmul.mubr.bf16.gmra.mrb[64].mxu1 %v5140_v55  ;;  %v5104_v40 = vrot.slane %v5102_v45, 3  ;;  %v4523_v49 = vshrl.u32 %v10478_v4, 16 }
 0x2f0   : > { %v10669_v2 = vpack.c.bf16 %v3374_v43, %v3372_v51  ;;  %v5107_v6 = vrot.slane %v5105_v34, 4  ;;  %v3375_v60 = vmax.f32 %v8039_v56, 0.0  ;;  %v4503_v29 = vshll.u32 %v10454_v41, 16 }
 0x2f1   : > { %v10672_v19 = vor.u32 %v5116_v7, %v5113_v33  ;;  %v4513_v1 = vrot.slane %v4511_v27, 1  ;;  %v5186_v8 = vrot.slane %v4511_v27, 4  ;;  %v5185_v0 = vrot.slane %v4523_v49, 3 }
 0x2f2   : > { %v3434_v38 = vrot.slane %v10669_v2, 4  ;;  %v10677_v11 = vor.u32 %v5107_v6, %v5104_v40  ;;  %v10682_v37 = vpack.c.bf16 %v3375_v60, %v3373_v57  ;;  %v4505_v62 = vrot.slane %v4503_v29, 1 }
 0x2f3   : > { %v5118_v17 = vsel %vm4868_vm9, %v10612_v14, %v10672_v19  ;;  %v4525_v51 = vor.u32 %v4523_v49, %v4513_v1  ;;  %v4515_v9 = vshrl.u32 %v10454_v41, 16  ;;  %v5187_v63 = vor.u32 %v5186_v8, %v5185_v0  ;;  %v4373_v8 = vld [vmem:[#allocation3 + $0x80] sm:$0xff] }
 0x2f4   : > { %6230 = vmatprep.mubr.bf16.mxu0 %v5118_v17  ;;  %v10687_v4 = vsel %vm709_vm3, %v3430_v52, %v3434_v38  ;;  %v5109_v35 = vsel %vm4868_vm9, %v5064_v21, %v10677_v11  ;;  %v3436_v14 = vrot.slane %v10682_v37, 4  ;;  %v5182_v18 = vrot.slane %v4503_v29, 4 }
 0x2f5   : > { %3472 = vst [vmem:[#allocation3 + $0xe0] sm:$0xff] %v10687_v4  ;;  %6231 = vmatmul.mubr.bf16.gmra.mrb[92].mxu0 %v5109_v35  ;;  %v4527_v31 = vshll.u32 %v4374_v28, 16  ;;  %v10694_v54 = vor.u32 %v4515_v9, %v4505_v62  ;;  %v5181_v13 = vrot.slane %v4515_v9, 3  ;;  %v4539_v57 = vshrl.u32 %v4374_v28, 16 }
 0x2f6   : > { %v8040_v52 = vadd.f32 %v10525_v39, %v10050_v24  ;;  %v10703_v41 = vsel %vm709_vm3, %v3432_v58, %v3436_v14  ;;  %v5188_v21 = vsel %vm4868_vm9, %v10630_v48, %v5187_v63  ;;  %v8041_v39 = vadd.f32 %v10533_v61, %v10045_v47 }
 0x2f7   : > { %v4529_v43 = vrot.slane %v4527_v31, 1  ;;  %v5230_v45 = vrot.slane %v4527_v31, 4  ;;  %3473 = vst [vmem:[#allocation3 + $0xe8] sm:$0xff] %v10703_v41  ;;  %6085 = vmatprep.mubr.bf16.mxu1 %v5188_v21  ;;  %v10708_v34 = vor.u32 %v5182_v18, %v5181_v13  ;;  %v5229_v55 = vrot.slane %v4539_v57, 3 }
 0x2f8   : > { %v3376_v33 = vmax.f32 %v8040_v52, 0.0  ;;  %v4514_v42 = vsel %vm962_vm5, %v10621_v44, %v4513_v1  ;;  %v8042_v48 = vadd.f32 %v10542_v15, %v10050_v24  ;;  %v4506_v58 = vsel %vm962_vm5, %v10655_v10, %v4505_v62 }
 0x2f9   : > { %v10712_v7 = vor.u32 %v4539_v57, %v4529_v43  ;;  %v5184_v56 = vsel %vm4868_vm9, %v5139_v32, %v10708_v34  ;;  %v10722_v40 = vor.u32 %v5230_v45, %v5229_v55  ;;  %v3377_v6 = vmax.f32 %v8041_v39, 0.0 }
 0x2fa   : > { %v5155_v27 = vshrl.u32 %v4514_v42, 16  ;;  %6086 = vmatmul.mubr.bf16.gmra.mrb[68].mxu1 %v5184_v56  ;;  %v5158_v61 = vshll.u32 %v4514_v42, 16  ;;  %v3378_v60 = vmax.f32 %v8042_v48, 0.0  ;;  %v5146_v49 = vshrl.u32 %v4506_v58, 16 }
 0x2fb   : > { %v5149_v29 = vshll.u32 %v4506_v58, 16  ;;  %v5232_v44 = vsel %vm4868_vm9, %v5187_v63, %v10722_v40  ;;  %v8043_v15 = vadd.f32 %v10547_v12, %v10045_v47  ;;  %v4530_v10 = vsel %vm962_vm5, %v4525_v51, %v4529_v43  ;;  %v4375_v47 = vld [vmem:[#allocation3 + $0x90] sm:$0xff] }
 0x2fc   : > { %v5157_v24 = vrot.slane %v5155_v27, 3  ;;  %6093 = vmatprep.mubr.bf16.mxu1 %v5232_v44  ;;  %v5160_v32 = vrot.slane %v5158_v61, 4  ;;  %v3394_v1 = vpack.c.bf16 %v3378_v60, %v3376_v33  ;;  %v5148_v28 = vrot.slane %v5146_v49, 3 }
 0x2fd   : > { %v5151_v17 = vrot.slane %v5149_v29, 4  ;;  %v3379_v0 = vmax.f32 %v8043_v15, 0.0  ;;  %v5199_v62 = vshrl.u32 %v4530_v10, 16  ;;  %v5202_v35 = vshll.u32 %v4530_v10, 16 }
 0x2fe   : > { %v4519_v9 = vshll.u32 %v4373_v8, 16  ;;  %v5161_v18 = vor.u32 %v5160_v32, %v5157_v24  ;;  %v3438_v31 = vrot.slane %v3394_v1, 4  ;;  %v4531_v57 = vshrl.u32 %v4373_v8, 16 }
 0x2ff   : > { %v5152_v13 = vor.u32 %v5151_v17, %v5148_v28  ;;  %v3395_v63 = vpack.c.bf16 %v3379_v0, %v3377_v6  ;;  %v5201_v52 = vrot.slane %v5199_v62, 3  ;;  %v5204_v21 = vrot.slane %v5202_v35, 4 }
 0x300   : > { %v4521_v45 = vrot.slane %v4519_v9, 1  ;;  %v5162_v12 = vsel %vm4868_vm9, %v10672_v19, %v5161_v18  ;;  %v10734_v51 = vsel %vm709_vm3, %v3434_v38, %v3438_v31  ;;  %3476 = vst [vmem:[#allocation3 + $0x100] sm:$0xf] %v3438_v31  ;;  %v5225_v55 = vrot.slane %v4531_v57, 3 }
 0x301   : > { %v5153_v43 = vsel %vm4868_vm9, %v10677_v11, %v5152_v13  ;;  %6238 = vmatprep.mubr.bf16.mxu0 %v5162_v12  ;;  %3474 = vst [vmem:[#allocation3 + $0xf0] sm:$0xff] %v10734_v51  ;;  %v3440_v33 = vrot.slane %v3395_v63, 4  ;;  %v5205_v39 = vor.u32 %v5204_v21, %v5201_v52  ;;  %v5226_v48 = vrot.slane %v4519_v9, 4 }
 0x302   : > { %v4533_v42 = vor.u32 %v4531_v57, %v4521_v45  ;;  %6239 = vmatmul.mubr.bf16.gmra.mrb[96].mxu0 %v5153_v43  ;;  %v4543_v19 = vshll.u32 %v10269_v59, 16  ;;  %v4555_v2 = vshrl.u32 %v10269_v59, 16  ;;  %v4522_v38 = vsel %vm962_vm5, %v10694_v54, %v4521_v45 }
 0x303   : > { %v4535_v58 = vshll.u32 %v4375_v47, 16  ;;  %v10746_v11 = vsel %vm709_vm3, %v3436_v14, %v3440_v33  ;;  %3477 = vst [vmem:[#allocation3 + $0x108] sm:$0xf] %v3440_v33  ;;  %v5206_v56 = vsel %vm4868_vm9, %v5161_v18, %v5205_v39  ;;  %v5227_v6 = vor.u32 %v5226_v48, %v5225_v55 }
 0x304   : > { %v5190_v27 = vshrl.u32 %v4522_v38, 16  ;;  %3475 = vst [vmem:[#allocation3 + $0xf8] sm:$0xff] %v10746_v11  ;;  %6246 = vmatprep.mubr.bf16.mxu0 %v5206_v56  ;;  %v4545_v61 = vrot.slane %v4543_v19, 1  ;;  %v5273_v60 = vrot.slane %v4555_v2, 3  ;;  %v5274_v59 = vrot.slane %v4543_v19, 4 }
 0x305   : > { %v5193_v49 = vshll.u32 %v4522_v38, 16  ;;  %v5228_v54 = vsel %vm4868_vm9, %v10708_v34, %v5227_v6  ;;  %v4537_v37 = vrot.slane %v4535_v58, 1  ;;  %v4547_v8 = vshrl.u32 %v4375_v47, 16 }
 0x306   : > { %v5192_v29 = vrot.slane %v5190_v27, 3  ;;  %6094 = vmatmul.mubr.bf16.gmra.mrb[72].mxu1 %v5228_v54  ;;  %v4557_v14 = vor.u32 %v4555_v2, %v4545_v61  ;;  %v5275_v44 = vor.u32 %v5274_v59, %v5273_v60  ;;  %v4546_v15 = vsel %vm962_vm5, %v10712_v7, %v4545_v61 }
 0x307   : > { %v5195_v24 = vrot.slane %v5193_v49, 4  ;;  %v5243_v10 = vshrl.u32 %v4546_v15, 16  ;;  %v5246_v32 = vshll.u32 %v4546_v15, 16  ;;  %v4549_v1 = vor.u32 %v4547_v8, %v4537_v37 }
 0x308   : > { %v5269_v28 = vrot.slane %v4547_v8, 3  ;;  %v5276_v17 = vsel %vm4868_vm9, %v10722_v40, %v5275_v44  ;;  %v5270_v62 = vrot.slane %v4535_v58, 4  ;;  %v4559_v34 = vshll.u32 %v10373_v53, 16 }
 0x309   : > { %v5196_v0 = vor.u32 %v5195_v24, %v5192_v29  ;;  %6101 = vmatprep.mubr.bf16.mxu1 %v5276_v17  ;;  %v5245_v35 = vrot.slane %v5243_v10, 3  ;;  %v5248_v9 = vrot.slane %v5246_v32, 4  ;;  %v4571_v18 = vshrl.u32 %v10373_v53, 16 }
 0x30a   : > { %v4538_v31 = vsel %vm962_vm5, %v4533_v42, %v4537_v37  ;;  %v5271_v57 = vor.u32 %v5270_v62, %v5269_v28  ;;  %v4561_v63 = vrot.slane %v4559_v34, 1  ;;  %v5318_v52 = vrot.slane %v4559_v34, 4 }
 0x30b   : > { %v5197_v7 = vsel %vm4868_vm9, %v5152_v13, %v5196_v0  ;;  %v5249_v21 = vor.u32 %v5248_v9, %v5245_v35  ;;  %v5317_v45 = vrot.slane %v4571_v18, 3  ;;  %v5234_v40 = vshrl.u32 %v4538_v31, 16 }
 0x30c   : > { %6247 = vmatmul.mubr.bf16.gmra.mrb[100].mxu0 %v5197_v7  ;;  %v5237_v47 = vshll.u32 %v4538_v31, 16  ;;  %v5272_v12 = vsel %vm4868_vm9, %v5227_v6, %v5271_v57  ;;  %v4573_v43 = vor.u32 %v4571_v18, %v4561_v63  ;;  %v4562_v55 = vsel %vm962_vm5, %v4557_v14, %v4561_v63 }
 0x30d   : > { %v4551_v33 = vshll.u32 %v10331_v25, 16  ;;  %v5250_v53 = vsel %vm4868_vm9, %v5205_v39, %v5249_v21  ;;  %v5319_v42 = vor.u32 %v5318_v52, %v5317_v45  ;;  %v5236_v48 = vrot.slane %v5234_v40, 3 }
 0x30e   : > { %v5239_v13 = vrot.slane %v5237_v47, 4  ;;  %6254 = vmatprep.mubr.bf16.mxu0 %v5250_v53  ;;  %6102 = vmatmul.mubr.bf16.gmra.mrb[76].mxu1 %v5272_v12  ;;  %v5287_v19 = vshrl.u32 %v4562_v55, 16  ;;  %v5290_v2 = vshll.u32 %v4562_v55, 16  ;;  %v4563_v58 = vshrl.u32 %v10331_v25, 16 }
 0x30f   : > { %v4553_v38 = vrot.slane %v4551_v33, 1  ;;  %v5320_v56 = vsel %vm4868_vm9, %v5275_v44, %v5319_v42  ;;  %v5314_v27 = vrot.slane %v4551_v33, 4  ;;  %v4575_v61 = vshll.u32 %v10485_v26, 16 }
 0x310   : > { %v5240_v6 = vor.u32 %v5239_v13, %v5236_v48  ;;  %6109 = vmatprep.mubr.bf16.mxu1 %v5320_v56  ;;  %v5289_v60 = vrot.slane %v5287_v19, 3  ;;  %v5292_v59 = vrot.slane %v5290_v2, 4  ;;  %v5313_v49 = vrot.slane %v4563_v58, 3 }
 0x311   : > { %v4565_v39 = vor.u32 %v4563_v58, %v4553_v38  ;;  %v4577_v29 = vrot.slane %v4575_v61, 1  ;;  %v4587_v37 = vshrl.u32 %v10485_v26, 16  ;;  %v5362_v8 = vrot.slane %v4575_v61, 4 }
 0x312   : > { %v5241_v54 = vsel %vm4868_vm9, %v5196_v0, %v5240_v6  ;;  %v5293_v14 = vor.u32 %v5292_v59, %v5289_v60  ;;  %v5315_v24 = vor.u32 %v5314_v27, %v5313_v49  ;;  %v4554_v25 = vsel %vm962_vm5, %v4549_v1, %v4553_v38 }
 0x313   : > { %v4567_v44 = vshll.u32 %v10461_v50, 16  ;;  %v4589_v15 = vor.u32 %v4587_v37, %v4577_v29  ;;  %v5361_v10 = vrot.slane %v4587_v37, 3  ;;  %v5278_v32 = vshrl.u32 %v4554_v25, 16 }
 0x314   : > { %6255 = vmatmul.mubr.bf16.gmra.mrb[104].mxu0 %v5241_v54  ;;  %v5281_v28 = vshll.u32 %v4554_v25, 16  ;;  %v5294_v17 = vsel %vm4868_vm9, %v5249_v21, %v5293_v14  ;;  %v5316_v62 = vsel %vm4868_vm9, %v5271_v57, %v5315_v24  ;;  %v4578_v0 = vsel %vm962_vm5, %v4573_v43, %v4577_v29 }
 0x315   : > { %v4569_v34 = vrot.slane %v4567_v44, 1  ;;  %6262 = vmatprep.mubr.bf16.mxu0 %v5294_v17  ;;  %v5363_v26 = vor.u32 %v5362_v8, %v5361_v10  ;;  %v5280_v35 = vrot.slane %v5278_v32, 3  ;;  %v5331_v18 = vshrl.u32 %v4578_v0, 16 }
 0x316   : > { %v5283_v9 = vrot.slane %v5281_v28, 4  ;;  %6110 = vmatmul.mubr.bf16.gmra.mrb[80].mxu1 %v5316_v62  ;;  %v5334_v1 = vshll.u32 %v4578_v0, 16  ;;  %v4579_v31 = vshrl.u32 %v10461_v50, 16  ;;  %v5358_v7 = vrot.slane %v4567_v44, 4 }
 0x317   : > { %v4591_v63 = vshll.u32 %v10584_v23, 16  ;;  %v5364_v52 = vsel %vm4868_vm9, %v5319_v42, %v5363_v26  ;;  %v5333_v45 = vrot.slane %v5331_v18, 3  ;;  %v4603_v57 = vshrl.u32 %v10584_v23, 16 }
 0x318   : > { %v5284_v21 = vor.u32 %v5283_v9, %v5280_v35  ;;  %6117 = vmatprep.mubr.bf16.mxu1 %v5364_v52  ;;  %v5336_v40 = vrot.slane %v5334_v1, 4  ;;  %v4581_v47 = vor.u32 %v4579_v31, %v4569_v34  ;;  %v5357_v12 = vrot.slane %v4579_v31, 3 }
 0x319   : > { %v4593_v43 = vrot.slane %v4591_v63, 1  ;;  %v5405_v33 = vrot.slane %v4603_v57, 3  ;;  %v5406_v53 = vrot.slane %v4591_v63, 4  ;;  %v4570_v50 = vsel %vm962_vm5, %v4565_v39, %v4569_v34 }
 0x31a   : > { %v5285_v55 = vsel %vm4868_vm9, %v5240_v6, %v5284_v21  ;;  %v5337_v48 = vor.u32 %v5336_v40, %v5333_v45  ;;  %v5359_v13 = vor.u32 %v5358_v7, %v5357_v12  ;;  %v5322_v2 = vshrl.u32 %v4570_v50, 16 }
 0x31b   : > { %v4605_v19 = vor.u32 %v4603_v57, %v4593_v43  ;;  %v5407_v42 = vor.u32 %v5406_v53, %v5405_v33  ;;  %v5325_v38 = vshll.u32 %v4570_v50, 16  ;;  %v4594_v23 = vsel %vm962_vm5, %v4589_v15, %v4593_v43 }
 0x31c   : > { %6263 = vmatmul.mubr.bf16.gmra.mrb[108].mxu0 %v5285_v55  ;;  %v4583_v58 = vshll.u32 %v10557_v3, 16  ;;  %v5338_v56 = vsel %vm4868_vm9, %v5293_v14, %v5337_v48  ;;  %v5360_v27 = vsel %vm4868_vm9, %v5315_v24, %v5359_v13  ;;  %v5324_v6 = vrot.slane %v5322_v2, 3 }
 0x31d   : > { %v5375_v61 = vshrl.u32 %v4594_v23, 16  ;;  %6270 = vmatprep.mubr.bf16.mxu0 %v5338_v56  ;;  %v5408_v60 = vsel %vm4868_vm9, %v5363_v26, %v5407_v42  ;;  %v5327_v59 = vrot.slane %v5325_v38, 4  ;;  %v5378_v39 = vshll.u32 %v4594_v23, 16 }
 0x31e   : > { %v4585_v49 = vrot.slane %v4583_v58, 1  ;;  %6118 = vmatmul.mubr.bf16.gmra.mrb[84].mxu1 %v5360_v27  ;;  %v4595_v29 = vshrl.u32 %v10557_v3, 16  ;;  %v5402_v37 = vrot.slane %v4583_v58, 4  ;;  %v4607_v8 = vshll.u32 %v10652_v5, 16 }
 0x31f   : > { %v5377_v54 = vrot.slane %v5375_v61, 3  ;;  %6125 = vmatprep.mubr.bf16.mxu1 %v5408_v60  ;;  %v5328_v25 = vor.u32 %v5327_v59, %v5324_v6  ;;  %v5380_v14 = vrot.slane %v5378_v39, 4  ;;  %v4619_v24 = vshrl.u32 %v10652_v5, 16 }
 0x320   : > { %v4586_v44 = vsel %vm962_vm5, %v4581_v47, %v4585_v49  ;;  %v4597_v15 = vor.u32 %v4595_v29, %v4585_v49  ;;  %v5401_v10 = vrot.slane %v4595_v29, 3  ;;  %v4609_v32 = vrot.slane %v4607_v8, 1  ;;  %v10790_v3 = vpop.f32.mrb[64].mxu0 }
 0x321   : > { %v5450_v28 = vrot.slane %v4607_v8, 4  ;;  %v5329_v17 = vsel %vm4868_vm9, %v5284_v21, %v5328_v25  ;;  %v5381_v62 = vor.u32 %v5380_v14, %v5377_v54  ;;  %v5449_v0 = vrot.slane %v4619_v24, 3  ;;  %v10793_v1 = vpop.f32.mrb[65].mxu0 }
 0x322   : > { %v5366_v34 = vshrl.u32 %v4586_v44, 16  ;;  %v5403_v26 = vor.u32 %v5402_v37, %v5401_v10  ;;  %v4621_v35 = vor.u32 %v4619_v24, %v4609_v32  ;;  %v5369_v9 = vshll.u32 %v4586_v44, 16  ;;  %v10796_v52 = vpop.f32.mrb[66].mxu0 }
 0x323   : > { %v4610_v18 = vsel %vm962_vm5, %v4605_v19, %v4609_v32  ;;  %v5382_v5 = vsel %vm4868_vm9, %v5337_v48, %v5381_v62  ;;  %v5451_v31 = vor.u32 %v5450_v28, %v5449_v0  ;;  %v4599_v40 = vshll.u32 %v10640_v36, 16  ;;  %v10800_v47 = vpop.f32.mrb[67].mxu0 }
 0x324   : > { %6271 = vmatmul.mubr.bf16.gmra.mrb[112].mxu0 %v5329_v17  ;;  %v5368_v7 = vrot.slane %v5366_v34, 3  ;;  %v5419_v63 = vshrl.u32 %v4610_v18, 16  ;;  %v5404_v21 = vsel %vm4868_vm9, %v5359_v13, %v5403_v26  ;;  %v5371_v45 = vrot.slane %v5369_v9, 4 }
 0x325   : > { %6278 = vmatprep.mubr.bf16.mxu0 %v5382_v5  ;;  %v5422_v57 = vshll.u32 %v4610_v18, 16  ;;  %v5452_v12 = vsel %vm4868_vm9, %v5407_v42, %v5451_v31  ;;  %v4611_v55 = vshrl.u32 %v10640_v36, 16  ;;  %v4623_v33 = vshll.u32 %v10703_v41, 16 }
 0x326   : > { %v5421_v43 = vrot.slane %v5419_v63, 3  ;;  %6126 = vmatmul.mubr.bf16.gmra.mrb[88].mxu1 %v5404_v21  ;;  %v5372_v53 = vor.u32 %v5371_v45, %v5368_v7  ;;  %v4601_v48 = vrot.slane %v4599_v40, 1  ;;  %v5446_v19 = vrot.slane %v4599_v40, 4 }
 0x327   : > { %v5424_v50 = vrot.slane %v5422_v57, 4  ;;  %6133 = vmatprep.mubr.bf16.mxu1 %v5452_v12  ;;  %v5445_v13 = vrot.slane %v4611_v55, 3  ;;  %v4625_v2 = vrot.slane %v4623_v33, 1  ;;  %v4635_v38 = vshrl.u32 %v10703_v41, 16 }
 0x328   : > { %v5494_v23 = vrot.slane %v4623_v33, 4  ;;  %v5373_v58 = vsel %vm4868_vm9, %v5328_v25, %v5372_v53  ;;  %v4613_v42 = vor.u32 %v4611_v55, %v4601_v48  ;;  %v4602_v27 = vsel %vm962_vm5, %v4597_v15, %v4601_v48  ;;  %v10808_v59 = vpop.f32.mrb[68].mxu0  ;;  %v10827_v33 = vld [vmem:[#allocation3 + $0x108] sm:$0xf] }
 0x329   : > { %v5425_v56 = vor.u32 %v5424_v50, %v5421_v43  ;;  %v5447_v36 = vor.u32 %v5446_v19, %v5445_v13  ;;  %v4637_v6 = vor.u32 %v4635_v38, %v4625_v2  ;;  %v5493_v61 = vrot.slane %v4635_v38, 3  ;;  %v10813_v29 = vpop.f32.mrb[69].mxu0 }
 0x32a   : > { %v5410_v60 = vshrl.u32 %v4602_v27, 16  ;;  %v5413_v49 = vshll.u32 %v4602_v27, 16  ;;  %v4626_v54 = vsel %vm962_vm5, %v4621_v35, %v4625_v2  ;;  %v4615_v41 = vshll.u32 %v10687_v4, 16  ;;  %v10816_v24 = vpop.f32.mrb[70].mxu0 }
 0x32b   : > { %v5426_v39 = vsel %vm4868_vm9, %v5381_v62, %v5425_v56  ;;  %v5448_v37 = vsel %vm4868_vm9, %v5403_v26, %v5447_v36  ;;  %v5495_v8 = vor.u32 %v5494_v23, %v5493_v61  ;;  %v5463_v14 = vshrl.u32 %v4626_v54, 16  ;;  %v10819_v28 = vpop.f32.mrb[71].mxu0 }
 0x32c   : > { %6279 = vmatmul.mubr.bf16.gmra.mrb[116].mxu0 %v5373_v58  ;;  %v5412_v25 = vrot.slane %v5410_v60, 3  ;;  %v5415_v44 = vrot.slane %v5413_v49, 4  ;;  %v5466_v15 = vshll.u32 %v4626_v54, 16  ;;  %v4617_v10 = vrot.slane %v4615_v41, 1 }
 0x32d   : > { %6286 = vmatprep.mubr.bf16.mxu0 %v5426_v39  ;;  %v4627_v32 = vshrl.u32 %v10687_v4, 16  ;;  %v5496_v17 = vsel %vm4868_vm9, %v5451_v31, %v5495_v8  ;;  %v5465_v62 = vrot.slane %v5463_v14, 3  ;;  %v5490_v0 = vrot.slane %v4615_v41, 4  ;;  %v10844_v41 = vld [vmem:[#allocation3 + $0x100] sm:$0xf] }
 0x32e   : > { %v4639_v34 = vshll.u32 %v10746_v11, 16  ;;  %6134 = vmatmul.mubr.bf16.gmra.mrb[92].mxu1 %v5448_v37  ;;  %v5416_v26 = vor.u32 %v5415_v44, %v5412_v25  ;;  %v5468_v35 = vrot.slane %v5466_v15, 4  ;;  %v4651_v7 = vshrl.u32 %v10746_v11, 16 }
 0x32f   : > { %v4629_v9 = vor.u32 %v4627_v32, %v4617_v10  ;;  %v5489_v18 = vrot.slane %v4627_v32, 3  ;;  %6141 = vmatprep.mubr.bf16.mxu1 %v5496_v17  ;;  %v4618_v4 = vsel %vm962_vm5, %v4613_v42, %v4617_v10  ;;  %v4631_v58 = vshll.u32 %v10734_v51, 16 }
 0x330   : > { %v4641_v5 = vrot.slane %v4639_v34, 1  ;;  %v5538_v63 = vrot.slane %v4639_v34, 4  ;;  %v5417_v21 = vsel %vm4868_vm9, %v5372_v53, %v5416_v26  ;;  %v5469_v45 = vor.u32 %v5468_v35, %v5465_v62  ;;  %v10829_v50 = vpop.f32.mrb[72].mxu0 }
 0x331   : > { %v5491_v31 = vor.u32 %v5490_v0, %v5489_v18  ;;  %v5454_v57 = vshrl.u32 %v4618_v4, 16  ;;  %v5537_v12 = vrot.slane %v4651_v7, 3  ;;  %v5457_v43 = vshll.u32 %v4618_v4, 16  ;;  %v10833_v2 = vpop.f32.mrb[73].mxu0 }
 0x332   : > { %v4653_v40 = vor.u32 %v4651_v7, %v4641_v5  ;;  %v4642_v55 = vsel %vm962_vm5, %v4637_v6, %v4641_v5  ;;  %v5470_v48 = vsel %vm4868_vm9, %v5425_v56, %v5469_v45  ;;  %v10836_v42 = vpop.f32.mrb[74].mxu0  ;;  %v4643_v6 = vshrl.u32 %v10734_v51, 16 }
 0x333   : > { %v5492_v11 = vsel %vm4868_vm9, %v5447_v36, %v5491_v31  ;;  %v5456_v19 = vrot.slane %v5454_v57, 3  ;;  %v5507_v13 = vshrl.u32 %v4642_v55, 16  ;;  %v5539_v53 = vor.u32 %v5538_v63, %v5537_v12  ;;  %v10841_v61 = vpop.f32.mrb[75].mxu0 }
 0x334   : > { %6287 = vmatmul.mubr.bf16.gmra.mrb[120].mxu0 %v5417_v21  ;;  %v5459_v38 = vrot.slane %v5457_v43, 4  ;;  %v5510_v23 = vshll.u32 %v4642_v55, 16  ;;  %v4655_v56 = vshll.u32 %v10827_v33, 16  ;;  %v4662_v36 = vshrl.u32 %v10827_v33, 16 }
 0x335   : > { %6294 = vmatprep.mubr.bf16.mxu0 %v5470_v48  ;;  %v5509_v27 = vrot.slane %v5507_v13, 3  ;;  %v5540_v60 = vsel %vm4868_vm9, %v5495_v8, %v5539_v53  ;;  %v4633_v54 = vrot.slane %v4631_v58, 1  ;;  %v5533_v37 = vrot.slane %v4643_v6, 3  ;;  %v8576_v13 = vld [vmem:[#allocation3 + $0x18] sm:$0xff] }
 0x336   : > { %v5460_v39 = vor.u32 %v5459_v38, %v5456_v19  ;;  %v5512_v49 = vrot.slane %v5510_v23, 4  ;;  %6142 = vmatmul.mubr.bf16.gmra.mrb[96].mxu1 %v5492_v11  ;;  %v5534_v25 = vrot.slane %v4631_v58, 4  ;;  %v10846_v14 = vrot.slane %v4655_v56, 1  ;;  %v10868_v38 = vld [vmem:[#allocation3 + $0x28] sm:$0xff] }
 0x337   : > { %v5581_v51 = vrot.slane %v4662_v36, 3  ;;  %6149 = vmatprep.mubr.bf16.mxu1 %v5540_v60  ;;  %v4645_v10 = vor.u32 %v4643_v6, %v4633_v54  ;;  %v5582_v32 = vrot.slane %v4655_v56, 4  ;;  %v4634_v17 = vsel %vm962_vm5, %v4629_v9, %v4633_v54 }
 0x338   : > { %v5461_v44 = vsel %vm4868_vm9, %v5416_v26, %v5460_v39  ;;  %v5513_v15 = vor.u32 %v5512_v49, %v5509_v27  ;;  %v5535_v8 = vor.u32 %v5534_v25, %v5533_v37  ;;  %v4658_v62 = vsel %vm962_vm5, %v4653_v40, %v10846_v14 }
 0x339   : > { %v4647_v0 = vshll.u32 %v10844_v41, 16  ;;  %v5583_v35 = vor.u32 %v5582_v32, %v5581_v51  ;;  %v5498_v18 = vshrl.u32 %v4634_v17, 16  ;;  %v5501_v5 = vshll.u32 %v4634_v17, 16 }
 0x33a   : > { %v5514_v34 = vsel %vm4868_vm9, %v5469_v45, %v5513_v15  ;;  %v5536_v7 = vsel %vm4868_vm9, %v5491_v31, %v5535_v8  ;;  %v5551_v63 = vshrl.u32 %v4658_v62, 16  ;;  %v5554_v26 = vshll.u32 %v4658_v62, 16  ;;  %v3642_v45 = vld [vmem:[%s11714_s4] sm:$0x3]  ;;  %v8575_v31 = vld [vmem:[#allocation3 + $0x8] sm:$0xf0] }
 0x33b   : > { %v10857_v4 = vrot.slane %v4647_v0, 1  ;;  %v5584_v21 = vsel %vm4868_vm9, %v5539_v53, %v5583_v35  ;;  %v5500_v9 = vrot.slane %v5498_v18, 3  ;;  %v5503_v57 = vrot.slane %v5501_v5, 4 }
 0x33c   : > { %6295 = vmatmul.mubr.bf16.gmra.mrb[124].mxu0 %v5461_v44  ;;  %v4659_v40 = vshrl.u32 %v10844_v41, 16  ;;  %v5553_v12 = vrot.slane %v5551_v63, 3  ;;  %v5556_v43 = vrot.slane %v5554_v26, 4  ;;  %v5578_v55 = vrot.slane %v4647_v0, 4 }
 0x33d   : > { %6302 = vmatprep.mubr.bf16.mxu0 %v5514_v34  ;;  %v4702_v48 = vrot.slane %v8575_v31, 1  ;;  %v10864_v11 = vor.u32 %v5503_v57, %v5500_v9  ;;  %v4703_v53 = vrot.slane %v8576_v13, 1  ;;  %v4707_v23 = vrot.slane %v10868_v38, 1 }
 0x33e   : > { %v5577_v19 = vrot.slane %v4659_v40, 3  ;;  %6150 = vmatmul.mubr.bf16.gmra.mrb[100].mxu1 %v5536_v7  ;;  %v10871_v58 = vor.u32 %v5556_v43, %v5553_v12  ;;  %v10874_v27 = vrot.slane %v3642_v45, %v10019_v16  ;;  %v10877_v6 = vrot.slane %v3642_v45, %v10025_v46 }
 0x33f   : > { %v4650_v56 = vsel %vm962_vm5, %v4645_v10, %v10857_v4  ;;  %6157 = vmatprep.mubr.bf16.mxu1 %v5584_v21  ;;  %v5505_v60 = vsel %vm4868_vm9, %v5460_v39, %v10864_v11  ;;  %v4704_v54 = vsel %vm1043_vm8, %v4702_v48, %v4703_v53  ;;  %v4708_v37 = vsel %vm1043_vm8, %v4703_v53, %v4707_v23 }
 0x340   : > { %v5579_v49 = vor.u32 %v5578_v55, %v5577_v19  ;;  %v5558_v16 = vsel %vm4868_vm9, %v5513_v15, %v10871_v58  ;;  %v4945_v25 = vshrl.u32 %v4704_v54, 16  ;;  %v4948_v46 = vshll.u32 %v4704_v54, 16 }
 0x341   : > { %v4953_v51 = vshrl.u32 %v4708_v37, 16  ;;  %v4956_v10 = vshll.u32 %v4708_v37, 16  ;;  %v8044_v32 = vadd.f32 %v10790_v3, %v10874_v27  ;;  %v8045_v39 = vadd.f32 %v10793_v1, %v10877_v6 }
 0x342   : > { %v5580_v44 = vsel %vm4868_vm9, %v5535_v8, %v5579_v49  ;;  %v4947_v17 = vrot.slane %v4945_v25, 3  ;;  %v4950_v62 = vrot.slane %v4948_v46, 4  ;;  %v8046_v34 = vadd.f32 %v10796_v52, %v10874_v27  ;;  %v8578_v52 = vld [vmem:[#allocation3] sm:$0xf0] }
 0x343   : > { %v4955_v0 = vrot.slane %v4953_v51, 3  ;;  %v4958_v15 = vrot.slane %v4956_v10, 4  ;;  %v4295_v35 = vmax.f32 %v8044_v32, 0.0  ;;  %v4296_v18 = vmax.f32 %v8045_v39, 0.0 }
 0x344   : > { %6303 = vmatmul.mubr.bf16.gmra.mrb[128].mxu0 %v5505_v60  ;;  %v8047_v8 = vadd.f32 %v10800_v47, %v10877_v6  ;;  %v4951_v5 = vor.u32 %v4950_v62, %v4947_v17  ;;  %v4297_v7 = vmax.f32 %v8046_v34, 0.0  ;;  %v5542_v3 = vshrl.u32 %v4650_v56, 16  ;;  %v8579_v47 = vld [vmem:[#allocation3 + $0x10] sm:$0xff] }
 0x345   : > { %6310 = vmatprep.mubr.bf16.mxu0 %v5558_v16  ;;  %v5545_v63 = vshll.u32 %v4650_v56, 16  ;;  %v10898_v26 = vor.u32 %v4958_v15, %v4955_v0  ;;  %v4664_v21 = vor.u32 %v4662_v36, %v10846_v14  ;;  %v4699_v9 = vrot.slane %v8578_v52, 1 }
 0x346   : > { %v4298_v1 = vmax.f32 %v8047_v8, 0.0  ;;  %6158 = vmatmul.mubr.bf16.gmra.mrb[104].mxu1 %v5580_v44  ;;  %v10903_v57 = vpack.c.bf16 %v4297_v7, %v4295_v35  ;;  %v5544_v45 = vrot.slane %v5542_v3, 3  ;;  %v4700_v43 = vrot.slane %v8579_v47, 1  ;;  %v8580_v44 = vld [vmem:[#allocation3 + $0x38] sm:$0xff] }
 0x347   : > { %v5547_v12 = vrot.slane %v5545_v63, 4  ;;  %v4960_v55 = vsel %vm4868_vm9, %v4951_v5, %v10898_v26  ;;  %v5595_v48 = vshrl.u32 %v4664_v21, 16  ;;  %v5598_v19 = vshll.u32 %v4664_v21, 16  ;;  %v8581_v63 = vld [vmem:[#allocation3 + $0x30] sm:$0xff] }
 0x348   : > { %v10907_v31 = vpack.c.bf16 %v4298_v1, %v4296_v18  ;;  %6359 = vmatprep.mubr.bf16.mxu1 %v4960_v55  ;;  %v4331_v33 = vrot.slane %v10903_v57, 4  ;;  %v4701_v14 = vsel %vm1043_vm8, %v4699_v9, %v4700_v43  ;;  %v4706_v13 = vsel %vm1043_vm8, %v4700_v43, %v4705_v22 }
 0x349   : > { %v10910_v36 = vor.u32 %v5547_v12, %v5544_v45  ;;  %v5597_v56 = vrot.slane %v5595_v48, 3  ;;  %v5600_v60 = vrot.slane %v5598_v19, 4  ;;  %v4928_v49 = vshrl.u32 %v4701_v14, 16 }
 0x34a   : > { %v4332_v53 = vrot.slane %v10907_v31, 4  ;;  %4349 = vst [vmem:[#allocation3 + $0x100] sm:$0xf0] %v4331_v33  ;;  %v4931_v37 = vshll.u32 %v4701_v14, 16  ;;  %v4936_v16 = vshrl.u32 %v4706_v13, 16  ;;  %v4939_v25 = vshll.u32 %v4706_v13, 16 }
 0x34b   : > { %v5549_v54 = vsel %vm4868_vm9, %v10864_v11, %v10910_v36  ;;  %v5601_v46 = vor.u32 %v5600_v60, %v5597_v56  ;;  %v4930_v51 = vrot.slane %v4928_v49, 3  ;;  %v4711_v10 = vrot.slane %v8580_v44, 1  ;;  %v8584_v14 = vld [vmem:[%s11715_s5 + $0xc8] sm:$0xff]  }
 0x34c   : > { %4350 = vst [vmem:[#allocation3 + $0x108] sm:$0xf0] %v4332_v53  ;;  %6311 = vmatmul.mubr.bf16.gmra.mrb[132].mxu0 %v5549_v54  ;;  %v8048_v32 = vadd.f32 %v10808_v59, %v10874_v27  ;;  %v4933_v39 = vrot.slane %v4931_v37, 4  ;;  %v4938_v17 = vrot.slane %v4936_v16, 3  ;;  %v4941_v62 = vrot.slane %v4939_v25, 4 }
 0x34d   : > { %v8049_v11 = vadd.f32 %v10813_v29, %v10877_v6  ;;  %v5602_v0 = vsel %vm4868_vm9, %v10871_v58, %v5601_v46  ;;  %v4712_v34 = vsel %vm1043_vm8, %v4707_v23, %v4711_v10  ;;  %v8050_v35 = vadd.f32 %v10816_v24, %v10874_v27  ;;  %v8585_v46 = vld [vmem:[%s11715_s5 + $0x88] sm:$0xff]  }
 0x34e   : > { %v4299_v15 = vmax.f32 %v8048_v32, 0.0  ;;  %6318 = vmatprep.mubr.bf16.mxu0 %v5602_v0  ;;  %v4934_v18 = vor.u32 %v4933_v39, %v4930_v51  ;;  %v10935_v59 = vor.u32 %v4941_v62, %v4938_v17  ;;  %v4997_v8 = vshrl.u32 %v4712_v34, 16  ;;  %v8587_v17 = vld [vmem:[#allocation3 + $0x40] sm:$0xff]  ;;  %v10994_v0 = vld [vmem:[#allocation3 + $0x50] sm:$0xff] }
 0x34f   : > { %v5000_v5 = vshll.u32 %v4712_v34, 16  ;;  %v4300_v7 = vmax.f32 %v8049_v11, 0.0  ;;  %v4301_v3 = vmax.f32 %v8050_v35, 0.0  ;;  %v8051_v29 = vadd.f32 %v10819_v28, %v10877_v6  ;;  %v8582_v28 = vld [vmem:[%s11715_s5 + $0x80] sm:$0xff]  }
 0x350   : > { %v4661_v38 = vor.u32 %v4659_v40, %v10857_v4  ;;  %v4943_v23 = vsel %vm4868_vm9, %v4934_v18, %v10935_v59  ;;  %v4999_v58 = vrot.slane %v4997_v8, 3  ;;  %v4709_v1 = vrot.slane %v8581_v63, 1  ;;  %v8583_v40 = vld [vmem:[#allocation3 + $0x48] sm:$0xff]  ;;  %v8588_v11 = vld [vmem:[#allocation3 + $0x58] sm:$0xff] }
 0x351   : > { %v5002_v24 = vrot.slane %v5000_v5, 4  ;;  %6360 = vmatmul.mubr.bf16.vlgmr.msra.gmra.mrb[108].mxu1 %v4943_v23  ;;  %v10944_v21 = vpack.c.bf16 %v4301_v3, %v4299_v15  ;;  %v4302_v52 = vmax.f32 %v8051_v29, 0.0  ;;  %v4715_v12 = vrot.slane %v8583_v40, 1  ;;  %v11008_v5 = vld [vmem:[#allocation3 + $0x68] sm:$0xff] }
 0x352   : > { %v5586_v9 = vshrl.u32 %v4661_v38, 16  ;;  %v5589_v45 = vshll.u32 %v4661_v38, 16  ;;  %7845 = vmatpush3.bf16.msra.mxu1 %v8582_v28  ;;  %v4710_v4 = vsel %vm1043_vm8, %v4705_v22, %v4709_v1  ;;  %v8052_v47 = vadd.f32 %v10829_v50, %v10874_v27 }
 0x353   : > { %v5003_v41 = vor.u32 %v5002_v24, %v4999_v58  ;;  %v4333_v43 = vrot.slane %v10944_v21, 4  ;;  %v10955_v55 = vpack.c.bf16 %v4302_v52, %v4300_v7  ;;  %7846 = vmatprep.subr.bf16.mxu1 %v8584_v14  ;;  %v4988_v22 = vshrl.u32 %v4710_v4, 16  ;;  %v8592_v7 = vld [vmem:[%s11715_s5 + $0xd8] sm:$0xff]   ;;  %v8595_v21 = vld [vmem:[%s11715_s5 + $0xa0] sm:$0xff]  }
 0x354   : > { %v5588_v48 = vrot.slane %v5586_v9, 3  ;;  %v5591_v19 = vrot.slane %v5589_v45, 4  ;;  %v4991_v13 = vshll.u32 %v4710_v4, 16  ;;  %v4716_v56 = vsel %vm1043_vm8, %v4711_v10, %v4715_v12  ;;  %v8586_v10 = vld [vmem:[%s11715_s5 + $0xd0] sm:$0xff]  }
 0x355   : > { %v5004_v20 = vsel %vm4868_vm9, %v10898_v26, %v5003_v41  ;;  %v10968_v50 = vsel %vm709_vm3, %v4331_v33, %v4333_v43  ;;  %v4335_v60 = vrot.slane %v10955_v55, 4  ;;  %v5041_v54 = vshrl.u32 %v4716_v56, 16 }
 0x356   : > { %6367 = vmatprep.mubr.bf16.mxu1 %v5004_v20  ;;  %v5592_v49 = vor.u32 %v5591_v19, %v5588_v48  ;;  %v4990_v37 = vrot.slane %v4988_v22, 3  ;;  %v4993_v16 = vrot.slane %v4991_v13, 4  ;;  %v5044_v25 = vshll.u32 %v4716_v56, 16  ;;  %7847 = vmatpush3.bf16.msra.mxu1 %v8585_v46  ;;  %v8594_v48 = vld [vmem:[%s11715_s5 + $0xe0] sm:$0xff]   ;;  %v6559_v13 = vld [vmem:[#allocation3 + $0x108] sm:$0xf8] }
 0x357   : > { %v4303_v26 = vmax.f32 %v8052_v47, 0.0  ;;  %v10979_v57 = vsel %vm709_vm3, %v4332_v53, %v4335_v60  ;;  %v5043_v51 = vrot.slane %v5041_v54, 3  ;;  %v8053_v44 = vadd.f32 %v10833_v2, %v10877_v6  ;;  %7848 = vmatprep.subr.bf16.mxu1 %v8586_v10 }
 0x358   : > { %v5593_v33 = vsel %vm4868_vm9, %v10910_v36, %v5592_v49  ;;  %v10988_v32 = vor.u32 %v4993_v16, %v4990_v37  ;;  %v5046_v39 = vrot.slane %v5044_v25, 4  ;;  %v8054_v31 = vadd.f32 %v10836_v42, %v10874_v27  ;;  %v8590_v42 = vld [vmem:[%s11715_s5 + $0x90] sm:$0xff]  }
 0x359   : > { %6319 = vmatmul.mubr.bf16.gmra.mrb[136].mxu0 %v5593_v33  ;;  %v8055_v53 = vadd.f32 %v10841_v61, %v10877_v6  ;;  %v4304_v36 = vmax.f32 %v8053_v44, 0.0  ;;  %v4713_v62 = vrot.slane %v8587_v17, 1  ;;  %v4719_v2 = vrot.slane %v8588_v11, 1 }
 0x35a   : > { %v4717_v34 = vrot.slane %v10994_v0, 1  ;;  %v4995_v15 = vsel %vm4868_vm9, %v10935_v59, %v10988_v32  ;;  %v5047_v35 = vor.u32 %v5046_v39, %v5043_v51  ;;  %v4305_v18 = vmax.f32 %v8054_v31, 0.0  ;;  %7849 = vmatpush3.bf16.msra.mxu1 %v8590_v42  ;;  %v8596_v51 = vld [vmem:[%s11715_s5 + $0xe8] sm:$0xff]  }
 0x35b   : > { %v4306_v8 = vmax.f32 %v8055_v53, 0.0  ;;  %6368 = vmatmul.mubr.bf16.gmra.mrb[112].mxu1 %v4995_v15  ;;  %v4714_v61 = vsel %vm1043_vm8, %v4709_v1, %v4713_v62  ;;  %v4720_v27 = vsel %vm1043_vm8, %v4715_v12, %v4719_v2  ;;  %v4723_v59 = vrot.slane %v11008_v5, 1  ;;  %7850 = vmatprep.subr.bf16.mxu1 %v8592_v7  ;;  %v6558_v53 = vld [vmem:[#allocation3 + $0x100] sm:$0xf8]  ;;  %v8603_v5 = vld [vmem:[%s11715_s5 + $0xb8] sm:$0xff]  }
 0x35c   : > { %v4718_v6 = vsel %vm1043_vm8, %v4713_v62, %v4717_v34  ;;  %v5048_v3 = vsel %vm4868_vm9, %v5003_v41, %v5047_v35  ;;  %v4317_v29 = vsel %vm911_vm7, %v4305_v18, 0.0  ;;  %v5032_v23 = vshrl.u32 %v4714_v61, 16  ;;  %v8593_v41 = vld [vmem:[%s11715_s5 + $0x98] sm:$0xff]   ;;  %v8597_v18 = vld [vmem:[%s11715_s5 + $0xa8] sm:$0xff]  }
 0x35d   : > { %v4318_v38 = vsel %vm911_vm7, %v4306_v8, 0.0  ;;  %6375 = vmatprep.mubr.bf16.mxu1 %v5048_v3  ;;  %v4323_v58 = vpack.c.bf16 %v4317_v29, %v4303_v26  ;;  %v5035_v63 = vshll.u32 %v4714_v61, 16  ;;  %v5085_v1 = vshrl.u32 %v4720_v27, 16 }
 0x35e   : > { %v4324_v24 = vpack.c.bf16 %v4318_v38, %v4304_v36  ;;  %v5034_v52 = vrot.slane %v5032_v23, 3  ;;  %v5088_v9 = vshll.u32 %v4720_v27, 16  ;;  %v5076_v45 = vshrl.u32 %v4718_v6, 16  ;;  %7851 = vmatpush3.bf16.msra.mxu1 %v8593_v41 }
 0x35f   : > { %v5079_v28 = vshll.u32 %v4718_v6, 16  ;;  %v4337_v4 = vrot.slane %v4323_v58, 4  ;;  %v5037_v12 = vrot.slane %v5035_v63, 4  ;;  %v5087_v47 = vrot.slane %v5085_v1, 3  ;;  %7852 = vmatprep.subr.bf16.mxu1 %v8594_v48  ;;  %v8598_v6 = vld [vmem:[%s11715_s5 + $0xf0] sm:$0xff]   ;;  %v8599_v63 = vld [vmem:[#allocation3 + $0x60] sm:$0xff] }
 0x360   : > { %v4339_v40 = vrot.slane %v4324_v24, 4  ;;  %v5090_v19 = vrot.slane %v5088_v9, 4  ;;  %v5078_v14 = vrot.slane %v5076_v45, 3  ;;  %v4724_v22 = vsel %vm1043_vm8, %v4719_v2, %v4723_v59  ;;  %v11079_v45 = vld [vmem:[#allocation3 + $0x78] sm:$0xff] }
 0x361   : > { %v5081_v20 = vrot.slane %v5079_v28, 4  ;;  %v11031_v56 = vsel %vm709_vm3, %v4333_v43, %v4337_v4  ;;  %4355 = vst [vmem:[#allocation3 + $0x130] sm:$0xf] %v4337_v4  ;;  %v5038_v54 = vor.u32 %v5037_v12, %v5034_v52  ;;  %v5129_v37 = vshrl.u32 %v4724_v22, 16  ;;  %v8601_v4 = vld [vmem:[%s11715_s5 + $0xb0] sm:$0xff]  }
 0x362   : > { %v11036_v49 = vsel %vm709_vm3, %v4335_v60, %v4339_v40  ;;  %4356 = vst [vmem:[#allocation3 + $0x138] sm:$0xf] %v4339_v40  ;;  %v5091_v16 = vor.u32 %v5090_v19, %v5087_v47  ;;  %v5132_v26 = vshll.u32 %v4724_v22, 16  ;;  %v6590_v46 = vshll.u32 %v10979_v57, 16  ;;  %7853 = vmatpush3.bf16.msra.mxu1 %v8595_v21  ;;  %v8602_v19 = vld [vmem:[%s11715_s5 + $0xf8] sm:$0xff]  }
 0x363   : > { %v11038_v25 = vor.u32 %v5081_v20, %v5078_v14  ;;  %v5039_v43 = vsel %vm4868_vm9, %v10988_v32, %v5038_v54  ;;  %v5131_v55 = vrot.slane %v5129_v37, 3  ;;  %v6602_v60 = vshrl.u32 %v10979_v57, 16  ;;  %7854 = vmatprep.subr.bf16.mxu1 %v8596_v51 }
 0x364   : > { %v6667_v33 = vshrl.u32 %v6559_v13, 16  ;;  %6376 = vmatmul.mubr.bf16.gmra.mrb[116].mxu1 %v5039_v43  ;;  %v5092_v44 = vsel %vm4868_vm9, %v5047_v35, %v5091_v16  ;;  %v5134_v39 = vrot.slane %v5132_v26, 4  ;;  %v11053_v31 = vrot.slane %v6590_v46, 1 }
 0x365   : > { %v5083_v10 = vsel %vm4868_vm9, %v5038_v54, %v11038_v25  ;;  %6383 = vmatprep.mubr.bf16.mxu1 %v5092_v44  ;;  %v6670_v36 = vshll.u32 %v6559_v13, 16  ;;  %v6674_v17 = vrot.slane %v6602_v60, 3  ;;  %v6675_v62 = vrot.slane %v6590_v46, 4  ;;  %v8606_v44 = vld [vmem:[%s11715_s5 + $0x140] sm:$0xff]  }
 0x366   : > { %v6669_v32 = vrot.slane %v6667_v33, 3  ;;  %v11055_v11 = vor.u32 %v5134_v39, %v5131_v55  ;;  %v11058_v2 = vor.u32 %v6602_v60, %v11053_v31  ;;  %v6578_v15 = vshll.u32 %v10968_v50, 16  ;;  %7855 = vmatpush3.bf16.msra.mxu1 %v8597_v18  ;;  %v8605_v60 = vld [vmem:[#allocation3 + $0x70] sm:$0xff]  ;;  %v11123_v39 = vld [vmem:[%s11715_s5 + $0x148] sm:$0xff]  }
 0x367   : > { %v6594_v35 = vshrl.u32 %v10968_v50, 16  ;;  %v6672_v8 = vrot.slane %v6670_v36, 4  ;;  %v11065_v42 = vor.u32 %v6675_v62, %v6674_v17  ;;  %v6655_v61 = vshrl.u32 %v6558_v53, 16  ;;  %7856 = vmatprep.subr.bf16.mxu1 %v8598_v6 }
 0x368   : > { %v6658_v27 = vshll.u32 %v6558_v53, 16  ;;  %v5136_v7 = vsel %vm4868_vm9, %v5091_v16, %v11055_v11  ;;  %v11072_v3 = vrot.slane %v6578_v15, 1  ;;  %v6663_v38 = vrot.slane %v6578_v15, 4 }
 0x369   : > { %v6662_v29 = vrot.slane %v6594_v35, 3  ;;  %v6673_v23 = vor.u32 %v6672_v8, %v6669_v32  ;;  %v6657_v58 = vrot.slane %v6655_v61, 3  ;;  %v4721_v1 = vrot.slane %v8599_v63, 1 }
 0x36a   : > { %v6660_v24 = vrot.slane %v6658_v27, 4  ;;  %v11075_v52 = vor.u32 %v6594_v35, %v11072_v3  ;;  %v4727_v28 = vrot.slane %v11079_v45, 1  ;;  %v6606_v41 = vshll.u32 %v11036_v49, 16  ;;  %7857 = vmatpush3.bf16.msra.mxu1 %v8601_v4  ;;  %v11134_v35 = vld [vmem:[#allocation3 + $0x138] sm:$0xf] }
 0x36b   : > { %v11077_v9 = vor.u32 %v6663_v38, %v6662_v29  ;;  %v6677_v40 = vsel %vm4868_vm9, %v6673_v23, %v11065_v42  ;;  %v4722_v47 = vsel %vm1043_vm8, %v4717_v34, %v4721_v1  ;;  %v6618_v48 = vshrl.u32 %v11036_v49, 16  ;;  %7858 = vmatprep.subr.bf16.mxu1 %v8602_v19  ;;  %v8609_v38 = vld [vmem:[#allocation3 + $0x88] sm:$0xff]  ;;  %v11153_v23 = vld [vmem:[#allocation3 + $0x130] sm:$0xf] }
 0x36c   : > { %v6661_v12 = vor.u32 %v6660_v24, %v6657_v58  ;;  %6384 = vmatmul.mubr.bf16.gmra.mrb[120].mxu1 %v5083_v10  ;;  %6884 = vmatprep.mubr.bf16.mxu0 %v6677_v40  ;;  %v5120_v14 = vshrl.u32 %v4722_v47, 16  ;;  %v5123_v20 = vshll.u32 %v4722_v47, 16  ;;  %v4728_v22 = vsel %vm1043_vm8, %v4723_v59, %v4727_v28  ;;  %v11113_v59 = vld [vmem:[%s11715_s5 + $0x100] sm:$0xff]   ;;  %v11168_v40 = vld [vmem:[#allocation3 + $0x80] sm:$0xff] }
 0x36d   : > { %v11100_v0 = vrot.slane %v6606_v41, 1  ;;  %6391 = vmatprep.mubr.bf16.mxu1 %v5136_v7  ;;  %v5173_v13 = vshrl.u32 %v4728_v22, 16  ;;  %v5176_v54 = vshll.u32 %v4728_v22, 16  ;;  %v6750_v37 = vrot.slane %v6618_v48, 3  ;;  %v11147_v7 = vld [vmem:[%s11715_s5 + $0x108] sm:$0xff]   ;;  %v11177_v22 = vld [vmem:[%s11715_s5 + $0x110] sm:$0xff]  }
 0x36e   : > { %v6665_v34 = vsel %vm4868_vm9, %v6661_v12, %v11077_v9  ;;  %v5122_v16 = vrot.slane %v5120_v14, 3  ;;  %v5125_v26 = vrot.slane %v5123_v20, 4  ;;  %v6751_v21 = vrot.slane %v6606_v41, 4  ;;  %7859 = vmatpush3.bf16.msra.mxu1 %v8603_v5 }
 0x36f   : > { %6885 = vmatmul.mubr.bf16.vlgmr.msra.gmra.mrb[140].mxu0 %v6665_v34  ;;  %v11105_v46 = vor.u32 %v6618_v48, %v11100_v0  ;;  %v5175_v43 = vrot.slane %v5173_v13, 3  ;;  %v5178_v55 = vrot.slane %v5176_v54, 4  ;;  %v4725_v33 = vrot.slane %v8605_v60, 1  ;;  %7964 = vmatprep.subr.bf16.mxu1 %v8606_v44  ;;  %v11190_v54 = vld [vmem:[#allocation3 + $0x108] sm:$0xf0] }
 0x370   : > { %7879 = vmatpush3.bf16.msra.mxu0 %v11113_v59  ;;  %v6598_v51 = vshll.u32 %v11031_v56, 16  ;;  %v5126_v10 = vor.u32 %v5125_v26, %v5122_v16  ;;  %v11126_v53 = vor.u32 %v6751_v21, %v6750_v37  ;;  %v6610_v32 = vshrl.u32 %v11031_v56, 16 }
 0x371   : > { %7880 = vmatprep.subr.bf16.mxu0 %v11123_v39  ;;  %v11129_v36 = vor.u32 %v5178_v55, %v5175_v43  ;;  %v4726_v17 = vsel %vm1043_vm8, %v4721_v1, %v4725_v33  ;;  %v11755_v63 = vshll.u32 %v11134_v35, 16  ;;  %v11753_v1 = vshrl.u32 %v11134_v35, 16 }
 0x372   : > { %v11132_v62 = vrot.slane %v6598_v51, 1  ;;  %v6747_v15 = vrot.slane %v6598_v51, 4  ;;  %v5127_v18 = vsel %vm4868_vm9, %v11038_v25, %v5126_v10  ;;  %v6753_v8 = vsel %vm4868_vm9, %v11065_v42, %v11126_v53 }
 0x373   : > { %v5164_v61 = vshrl.u32 %v4726_v17, 16  ;;  %v5167_v27 = vshll.u32 %v4726_v17, 16  ;;  %v5180_v6 = vsel %vm4868_vm9, %v11055_v11, %v11129_v36  ;;  %6892 = vmatprep.mubr.bf16.mxu0 %v6753_v8  ;;  %v6746_v29 = vrot.slane %v6610_v32, 3  ;;  %v11158_v11 = vld [vmem:[%s11715_s5 + $0x150] sm:$0xff]  }
 0x374   : > { %7881 = vmatpush3.bf16.msra.mxu0 %v11147_v7  ;;  %v11151_v25 = vor.u32 %v6610_v32, %v11132_v62  ;;  %v4731_v42 = vrot.slane %v8609_v38, 1  ;;  %6392 = vmatmul.mubr.bf16.gmra.mrb[124].mxu1 %v5127_v18  ;;  %v4729_v12 = vrot.slane %v11168_v40, 1  ;;  %v11754_v14 = vshll.u32 %v11153_v23, 16  ;;  %v8614_v18 = vld [vmem:[#allocation3 + $0x98] sm:$0xff] }
 0x375   : > { %7882 = vmatprep.subr.bf16.mxu0 %v11158_v11  ;;  %v5166_v58 = vrot.slane %v5164_v61, 3  ;;  %v5169_v24 = vrot.slane %v5167_v27, 4  ;;  %6399 = vmatprep.mubr.bf16.mxu1 %v5180_v6  ;;  %v11163_v41 = vor.u32 %v6747_v15, %v6746_v29  ;;  %v11172_v20 = vpop.f32.mrb[44].mxu1  ;;  %v6795_v34 = vrot.slane %v11755_v63, 4 }
 0x376   : > { %v4732_v4 = vsel %vm1043_vm8, %v4727_v28, %v4731_v42  ;;  %v6794_v28 = vrot.slane %v11753_v1, 3  ;;  %v4730_v13 = vsel %vm1043_vm8, %v4725_v33, %v4729_v12  ;;  %v11192_v37 = vpop.f32.mrb[45].mxu1  ;;  %v11750_v16 = vrot.slane %v11031_v56, 1 }
 0x377   : > { %v5170_v47 = vor.u32 %v5169_v24, %v5166_v58  ;;  %v5217_v48 = vshrl.u32 %v4732_v4, 16  ;;  %v5220_v19 = vshll.u32 %v4732_v4, 16  ;;  %v6749_v45 = vsel %vm4868_vm9, %v11077_v9, %v11163_v41  ;;  %v11198_v9 = vld [vmem:[%s11715_s5 + $0x158] sm:$0xff]   ;;  %v11201_v43 = vpop.f32.mrb[46].mxu1  ;;  %v11228_v4 = vld [vmem:[%s11715_s5 + $0x160] sm:$0xff]  }
 0x378   : > { %7883 = vmatpush3.bf16.msra.mxu0 %v11177_v22  ;;  %v5208_v5 = vshrl.u32 %v4730_v13, 16  ;;  %v6796_v60 = vor.u32 %v6795_v34, %v6794_v28  ;;  %v5211_v33 = vshll.u32 %v4730_v13, 16  ;;  %v11752_v51 = vshrl.u32 %v11153_v23, 16  ;;  %v11205_v44 = vpop.f32.mrb[47].mxu1  ;;  %11821 = vst [vmem:[#allocation8_spill] sm:$0xff] %v11228_v4  ;;  %v11240_v13 = vld [vmem:[#allocation3 + $0xa8] sm:$0xff] }
 0x379   : > { %6893 = vmatmul.mubr.bf16.gmra.mrb[144].mxu0 %v6749_v45  ;;  %v5219_v26 = vrot.slane %v5217_v48, 3  ;;  %v5222_v21 = vrot.slane %v5220_v19, 4  ;;  %7884 = vmatprep.subr.bf16.mxu0 %v11198_v9  ;;  %v5171_v55 = vsel %vm4868_vm9, %v5126_v10, %v5170_v47  ;;  %v6791_v15 = vrot.slane %v11754_v14, 4  ;;  %v11214_v10 = vld [vmem:[%s11715_s5 + $0x118] sm:$0xff]  }
 0x37a   : > { %v5210_v17 = vrot.slane %v5208_v5, 3  ;;  %v4735_v8 = vrot.slane %v8614_v18, 1  ;;  %v6797_v61 = vsel %vm4868_vm9, %v11126_v53, %v6796_v60  ;;  %v5213_v27 = vrot.slane %v5211_v33, 4  ;;  %v11248_v5 = vld [vmem:[%s11715_s5 + $0x120] sm:$0xff]  }
 0x37b   : > { %v5223_v32 = vor.u32 %v5222_v21, %v5219_v26  ;;  %v6790_v6 = vrot.slane %v11752_v51, 3  ;;  %v6643_v29 = vrot.slane %v11190_v54, 1  ;;  %6900 = vmatprep.mubr.bf16.mxu0 %v6797_v61  ;;  %v6644_v58 = vrot.slane %v10979_v57, 1  ;;  %v11243_v21 = vld [vmem:[#allocation3 + $0x100] sm:$0xf0]  ;;  %11822 = vst [vmem:[#allocation7_spill] sm:$0xff] %v11248_v5 }
 0x37c   : > { %7885 = vmatpush3.bf16.msra.mxu0 %v11214_v10  ;;  %6400 = vmatmul.mubr.bf16.gmra.mrb[128].mxu1 %v5171_v55  ;;  %v4736_v53 = vsel %vm1043_vm8, %v4731_v42, %v4735_v8  ;;  %v11751_v24 = vrot.slane %v11036_v49, 1  ;;  %v11231_v48 = vor.u32 %v5213_v27, %v5210_v17  ;;  %v11237_v42 = vld [vmem:[#allocation3 + $0x90] sm:$0xff]  ;;  %v4739_v26 = vrot.slane %v11240_v13, 1 }
 0x37d   : > { %v5224_v38 = vsel %vm4868_vm9, %v11129_v36, %v5223_v32  ;;  %7886 = vmatprep.subr.bf16.mxu0 %v11228_v4  ;;  %v6792_v19 = vor.u32 %v6791_v15, %v6790_v6  ;;  %v5261_v45 = vshrl.u32 %v4736_v53, 16  ;;  %v5264_v36 = vshll.u32 %v4736_v53, 16  ;;  %v11258_v6 = vld [vmem:[%s11715_s5 + $0x168] sm:$0xff]  }
 0x37e   : > { %6407 = vmatprep.mubr.bf16.mxu1 %v5224_v38  ;;  %v6645_v28 = vsel %vm1043_vm8, %v6643_v29, %v6644_v58  ;;  %v6649_v57 = vsel %vm1043_vm8, %v6644_v58, %v11751_v24  ;;  %v4733_v34 = vrot.slane %v11237_v42, 1  ;;  %v5215_v55 = vsel %vm4868_vm9, %v5170_v47, %v11231_v48  ;;  %11823 = vst [vmem:[#allocation10_spill] sm:$0xff] %v11258_v6 }
 0x37f   : > { %v6793_v60 = vsel %vm4868_vm9, %v11163_v41, %v6792_v19  ;;  %v5263_v33 = vrot.slane %v5261_v45, 3  ;;  %v5266_v17 = vrot.slane %v5264_v36, 4  ;;  %v6730_v15 = vshrl.u32 %v6645_v28, 16 }
 0x380   : > { %7887 = vmatpush3.bf16.msra.mxu0 %v11248_v5  ;;  %v6733_v18 = vshll.u32 %v6645_v28, 16  ;;  %v6738_v61 = vshrl.u32 %v6649_v57, 16  ;;  %v6741_v27 = vshll.u32 %v6649_v57, 16  ;;  %v4734_v47 = vsel %vm1043_vm8, %v4729_v12, %v4733_v34  ;;  %v11272_v28 = vld [vmem:[%s11715_s5 + $0x128] sm:$0xff]  }
 0x381   : > { %6901 = vmatmul.mubr.bf16.gmra.mrb[148].mxu0 %v6793_v60  ;;  %7888 = vmatprep.subr.bf16.mxu0 %v11258_v6  ;;  %v5267_v29 = vor.u32 %v5266_v17, %v5263_v33  ;;  %v4740_v41 = vsel %vm1043_vm8, %v4735_v8, %v4739_v26  ;;  %v6640_v38 = vrot.slane %v11243_v21, 1  ;;  %v6732_v53 = vrot.slane %v6730_v15, 3  ;;  %11824 = vst [vmem:[#allocation11_spill] sm:$0xff] %v11272_v28  ;;  %v11280_v60 = vld [vmem:[%s11715_s5 + $0x170] sm:$0xff]  }
 0x382   : > { %v6735_v58 = vrot.slane %v6733_v18, 4  ;;  %v6740_v19 = vrot.slane %v6738_v61, 3  ;;  %v6743_v45 = vrot.slane %v6741_v27, 4  ;;  %v5252_v40 = vshrl.u32 %v4734_v47, 16  ;;  %11825 = vst [vmem:[#allocation12_spill] sm:$0xff] %v11280_v60  ;;  %v8623_v61 = vld [vmem:[#allocation3 + $0xa0] sm:$0xff] }
 0x383   : > { %v5268_v36 = vsel %vm4868_vm9, %v5223_v32, %v5267_v29  ;;  %v5255_v12 = vshll.u32 %v4734_v47, 16  ;;  %v5305_v57 = vshrl.u32 %v4740_v41, 16  ;;  %v5308_v32 = vshll.u32 %v4740_v41, 16 }
 0x384   : > { %7889 = vmatpush3.bf16.msra.mxu0 %v11272_v28  ;;  %6408 = vmatmul.mubr.bf16.gmra.mrb[132].mxu1 %v5215_v55  ;;  %v6736_v8 = vor.u32 %v6735_v58, %v6732_v53  ;;  %v11275_v42 = vor.u32 %v6743_v45, %v6740_v19  ;;  %v6641_v33 = vrot.slane %v10968_v50, 1  ;;  %v5254_v17 = vrot.slane %v5252_v40, 3  ;;  %v11295_v50 = vld [vmem:[%s11715_s5 + $0x130] sm:$0xff]  }
 0x385   : > { %7890 = vmatprep.subr.bf16.mxu0 %v11280_v60  ;;  %6415 = vmatprep.mubr.bf16.mxu1 %v5268_v36  ;;  %v5257_v15 = vrot.slane %v5255_v12, 4  ;;  %v5307_v18 = vrot.slane %v5305_v57, 3  ;;  %v4737_v27 = vrot.slane %v8623_v61, 1  ;;  %v5310_v47 = vrot.slane %v5308_v32, 4  ;;  %v11290_v19 = vpop.f32.mrb[48].mxu1  ;;  %11826 = vst [vmem:[#allocation13_spill] sm:$0xff] %v11295_v50 }
 0x386   : > { %v6745_v55 = vsel %vm4868_vm9, %v6736_v8, %v11275_v42  ;;  %v6642_v53 = vsel %vm1043_vm8, %v6640_v38, %v6641_v33  ;;  %v6647_v58 = vsel %vm1043_vm8, %v6641_v33, %v11750_v16  ;;  %v11300_v38 = vpop.f32.mrb[49].mxu1  ;;  %v11305_v57 = vld [vmem:[%s11715_s5 + $0x178] sm:$0xff]   ;;  %v8626_v33 = vld [vmem:[#allocation3 + $0xb8] sm:$0xff] }
 0x387   : > { %6998 = vmatprep.mubr.bf16.mxu0 %v6745_v55  ;;  %v11298_v41 = vor.u32 %v5257_v15, %v5254_v17  ;;  %v6713_v45 = vshrl.u32 %v6642_v53, 16  ;;  %v6716_v36 = vshll.u32 %v6642_v53, 16  ;;  %v6721_v40 = vshrl.u32 %v6647_v58, 16  ;;  %11827 = vst [vmem:[#allocation14_spill] sm:$0xff] %v11305_v57  ;;  %v11309_v17 = vpop.f32.mrb[50].mxu1 }
 0x388   : > { %7891 = vmatpush3.bf16.msra.mxu0 %v11295_v50  ;;  %v5311_v12 = vor.u32 %v5310_v47, %v5307_v18  ;;  %v6724_v8 = vshll.u32 %v6647_v58, 16  ;;  %v4738_v32 = vsel %vm1043_vm8, %v4733_v34, %v4737_v27  ;;  %v4743_v61 = vrot.slane %v8626_v33, 1  ;;  %v11314_v53 = vpop.f32.mrb[51].mxu1  ;;  %v11320_v34 = vld [vmem:[%s11715_s5 + $0x138] sm:$0xff]  }
 0x389   : > { %7892 = vmatprep.subr.bf16.mxu0 %v11305_v57  ;;  %v5259_v15 = vsel %vm4868_vm9, %v11231_v48, %v11298_v41  ;;  %v6715_v55 = vrot.slane %v6713_v45, 3  ;;  %v6718_v18 = vrot.slane %v6716_v36, 4  ;;  %v6723_v47 = vrot.slane %v6721_v40, 3  ;;  %11828 = vst [vmem:[#allocation15_spill] sm:$0xff] %v11320_v34  ;;  %v8628_v45 = vld [vmem:[#allocation3 + $0xb0] sm:$0xff]  ;;  %v8629_v40 = vld [vmem:[#allocation3 + $0xc8] sm:$0xff] }
 0x38a   : > { %v5312_v16 = vsel %vm4868_vm9, %v5267_v29, %v5311_v12  ;;  %v6726_v24 = vrot.slane %v6724_v8, 4  ;;  %v5296_v51 = vshrl.u32 %v4738_v32, 16  ;;  %v5299_v58 = vshll.u32 %v4738_v32, 16 }
 0x38b   : > { %v6719_v33 = vor.u32 %v6718_v18, %v6715_v55  ;;  %v4744_v48 = vsel %vm1043_vm8, %v4739_v26, %v4743_v61  ;;  %v4741_v36 = vrot.slane %v8628_v45, 1  ;;  %v4747_v1 = vrot.slane %v8629_v40, 1  ;;  %v8630_v18 = vld [vmem:[#allocation3 + $0xc0] sm:$0xff] }
 0x38c   : > { %7893 = vmatpush3.bf16.msra.mxu0 %v11320_v34  ;;  %6416 = vmatmul.mubr.bf16.gmra.mrb[136].mxu1 %v5259_v15  ;;  %v11326_v29 = vor.u32 %v6726_v24, %v6723_v47  ;;  %v5298_v8 = vrot.slane %v5296_v51, 3  ;;  %v5301_v32 = vrot.slane %v5299_v58, 4  ;;  %v5349_v14 = vshrl.u32 %v4744_v48, 16 }
 0x38d   : > { %6423 = vmatprep.mubr.bf16.mxu1 %v5312_v16  ;;  %v5352_v63 = vshll.u32 %v4744_v48, 16  ;;  %v4742_v30 = vsel %vm1043_vm8, %v4737_v27, %v4741_v36  ;;  %v4748_v55 = vsel %vm1043_vm8, %v4743_v61, %v4747_v1  ;;  %v4745_v13 = vrot.slane %v8630_v18, 1  ;;  %v8631_v48 = vld [vmem:[#allocation3 + $0xd8] sm:$0xff] }
 0x38e   : > { %v6728_v26 = vsel %vm4868_vm9, %v6719_v33, %v11326_v29  ;;  %v5351_v45 = vrot.slane %v5349_v14, 3  ;;  %v5340_v34 = vshrl.u32 %v4742_v30, 16  ;;  %v5343_v24 = vshll.u32 %v4742_v30, 16 }
 0x38f   : > { %6999 = vmatmul.mubr.bf16.vlgmr.msra.gmra.mrb[152].mxu0 %v6728_v26  ;;  %v5354_v15 = vrot.slane %v5352_v63, 4  ;;  %v5393_v47 = vshrl.u32 %v4748_v55, 16  ;;  %v5396_v51 = vshll.u32 %v4748_v55, 16  ;;  %v5302_v58 = vor.u32 %v5301_v32, %v5298_v8 }
 0x390   : > { %v5342_v40 = vrot.slane %v5340_v34, 3  ;;  %v4746_v16 = vsel %vm1043_vm8, %v4741_v36, %v4745_v13  ;;  %v4751_v27 = vrot.slane %v8631_v48, 1  ;;  %v5345_v61 = vrot.slane %v5343_v24, 4 }
 0x391   : > { %v5355_v57 = vor.u32 %v5354_v15, %v5351_v45  ;;  %v5395_v50 = vrot.slane %v5393_v47, 3  ;;  %v5398_v18 = vrot.slane %v5396_v51, 4  ;;  %v5384_v60 = vshrl.u32 %v4746_v16, 16  ;;  %v8632_v15 = vld [vmem:[#allocation3 + $0xd0] sm:$0xff] }
 0x392   : > { %v5387_v28 = vshll.u32 %v4746_v16, 16  ;;  %v4752_v14 = vsel %vm1043_vm8, %v4747_v1, %v4751_v27  ;;  %v7492_v63 = vadd.f32 %v11192_v37, %v11172_v20  ;;  %v5303_v30 = vsel %vm4868_vm9, %v11298_v41, %v5302_v58  ;;  %v8633_v37 = vld [vmem:[#allocation3 + $0xe8] sm:$0xff] }
 0x393   : > { %v5437_v33 = vshrl.u32 %v4752_v14, 16  ;;  %v5356_v34 = vsel %vm4868_vm9, %v5311_v12, %v5355_v57  ;;  %v5440_v36 = vshll.u32 %v4752_v14, 16  ;;  %v5346_v8 = vor.u32 %v5345_v61, %v5342_v40  ;;  %v11346_v12 = vld [vmem:[%s11716_s6] ss:$0 sm:$0xff] }
 0x394   : > { %6424 = vmatmul.mubr.bf16.gmra.mrb[140].mxu1 %v5303_v30  ;;  %v11339_v32 = vor.u32 %v5398_v18, %v5395_v50  ;;  %v5386_v55 = vrot.slane %v5384_v60, 3  ;;  %v7495_v26 = vadd.f32 %v11205_v44, %v11201_v43  ;;  %v5389_v1 = vrot.slane %v5387_v28, 4  ;;  %v8634_v43 = vld [vmem:[#allocation3 + $0xe0] sm:$0xff] }
 0x395   : > { %6431 = vmatprep.mubr.bf16.mxu1 %v5356_v34  ;;  %v5439_v45 = vrot.slane %v5437_v33, 3  ;;  %v4749_v20 = vrot.slane %v8632_v15, 1  ;;  %v4755_v24 = vrot.slane %v8633_v37, 1  ;;  %v5442_v41 = vrot.slane %v5440_v36, 4  ;;  %v4394_v34 = vld [vmem:[#allocation3 + $0x108] sm:$0x1f] }
 0x396   : > { %v11350_v50 = vadd.f32 %v11300_v38, %v11290_v19  ;;  %v11354_v60 = vadd.f32 %v11314_v53, %v11309_v17  ;;  %v4753_v44 = vrot.slane %v8634_v43, 1  ;;  %v11829_v51 = vshll.u32 %v11134_v35, 16  ;;  %v8635_v37 = vld [vmem:[#allocation3 + $0xf8] sm:$0xff] }
 0x397   : > { %v4750_v28 = vsel %vm1043_vm8, %v4745_v13, %v4749_v20  ;;  %v4756_v47 = vsel %vm1043_vm8, %v4751_v27, %v4755_v24  ;;  %v5347_v19 = vsel %vm4868_vm9, %v5302_v58, %v5346_v8  ;;  %v6040_v38 = vadd.f32 %v7492_v63, %v11346_v12 }
 0x398   : > { %v11360_v40 = vrot.slane %v11829_v51, 1  ;;  %v5428_v16 = vshrl.u32 %v4750_v28, 16  ;;  %v5431_v48 = vshll.u32 %v4750_v28, 16  ;;  %v5481_v61 = vshrl.u32 %v4756_v47, 16 }
 0x399   : > { %v5484_v18 = vshll.u32 %v4756_v47, 16  ;;  %v4754_v53 = vsel %vm1043_vm8, %v4749_v20, %v4753_v44  ;;  %v5400_v13 = vsel %vm4868_vm9, %v5355_v57, %v11339_v32  ;;  %v5390_v14 = vor.u32 %v5389_v1, %v5386_v55  ;;  %v8636_v55 = vld [vmem:[#allocation3 + $0xf0] sm:$0xff] }
 0x39a   : > { %v7602_v17 = vpop.f32.mrb[76].mxu0  ;;  %v11367_v27 = vor.u32 %v5442_v41, %v5439_v45  ;;  %v6043_v30 = vadd.f32 %v7495_v26, %v11346_v12  ;;  %v5472_v36 = vshrl.u32 %v4754_v53, 16  ;;  %v5475_v15 = vshll.u32 %v4754_v53, 16 }
 0x39b   : > { %v7603_v33 = vpop.f32.mrb[77].mxu0  ;;  %v4759_v63 = vrot.slane %v8635_v37, 1  ;;  %v5430_v28 = vrot.slane %v5428_v16, 3  ;;  %v5433_v20 = vrot.slane %v5431_v48, 4  ;;  %v5483_v47 = vrot.slane %v5481_v61, 3 }
 0x39c   : > { %6432 = vmatmul.mubr.bf16.gmra.mrb[144].mxu1 %v5347_v19  ;;  %v7604_v58 = vadd.f32 %v7603_v33, %v7602_v17  ;;  %v7605_v43 = vpop.f32.mrb[78].mxu0  ;;  %v4757_v1 = vrot.slane %v8636_v55, 1  ;;  %v5486_v45 = vrot.slane %v5484_v18, 4  ;;  %v4763_v6 = vrot.slane %v4394_v34, 1 }
 0x39d   : > { %6439 = vmatprep.mubr.bf16.mxu1 %v5400_v13  ;;  %v7502_v51 = vpop.f32.mrb[52].mxu1  ;;  %v7606_v57 = vpop.f32.mrb[79].mxu0  ;;  %v4760_v26 = vsel %vm1043_vm8, %v4755_v24, %v4759_v63  ;;  %v5474_v53 = vrot.slane %v5472_v36, 3  ;;  %v5477_v17 = vrot.slane %v5475_v15, 4  ;;  %v5391_v16 = vsel %vm4868_vm9, %v5346_v8, %v5390_v14 }
 0x39e   : > { %v11370_v41 = vadd.f32 %v7604_v58, %v6040_v38  ;;  %v7503_v19 = vpop.f32.mrb[53].mxu1  ;;  %v5525_v33 = vshrl.u32 %v4760_v26, 16  ;;  %v5528_v37 = vshll.u32 %v4760_v26, 16  ;;  %v7607_v48 = vadd.f32 %v7606_v57, %v7605_v43 }
 0x39f   : > { %v7505_v5 = vpop.f32.mrb[54].mxu1  ;;  %v7504_v61 = vadd.f32 %v7503_v19, %v7502_v51  ;;  %v4758_v4 = vsel %vm1043_vm8, %v4753_v44, %v4757_v1  ;;  %v5444_v24 = vsel %vm4868_vm9, %v11339_v32, %v11367_v27  ;;  %v5434_v34 = vor.u32 %v5433_v20, %v5430_v28 }
 0x3a0   : > { %11830 = vst [vmem:[#allocation16_spill] sm:$0xff] %v11370_v41  ;;  %v7506_v13 = vpop.f32.mrb[55].mxu1  ;;  %v5527_v55 = vrot.slane %v5525_v33, 3  ;;  %v5530_v18 = vrot.slane %v5528_v37, 4  ;;  %v5516_v58 = vshrl.u32 %v4758_v4, 16  ;;  %v11378_v36 = vadd.f32 %v7607_v48, %v6043_v30 }
 0x3a1   : > { %v7507_v38 = vadd.f32 %v7506_v13, %v7505_v5  ;;  %v4393_v41 = vld [vmem:[#allocation3 + $0x100] sm:$0x1f]  ;;  %v5519_v15 = vshll.u32 %v4758_v4, 16  ;;  %v5487_v26 = vor.u32 %v5486_v45, %v5483_v47  ;;  %v5478_v8 = vor.u32 %v5477_v17, %v5474_v53 }
 0x3a2   : > { %v5518_v43 = vrot.slane %v5516_v58, 3  ;;  %v4764_v51 = vsel %vm1043_vm8, %v4759_v63, %v4763_v6  ;;  %v11381_v5 = vrot.slane %v4393_v41, 1  ;;  %v11831_v33 = vshll.u32 %v11153_v23, 16 }
 0x3a3   : > { %v5521_v44 = vrot.slane %v5519_v15, 4  ;;  %v5569_v57 = vshrl.u32 %v4764_v51, 16  ;;  %v5572_v19 = vshll.u32 %v4764_v51, 16  ;;  %v6048_v32 = vadd.f32 %v11350_v50, %v11346_v12 }
 0x3a4   : > { %6440 = vmatmul.mubr.bf16.gmra.mrb[148].mxu1 %v5391_v16  ;;  %v11385_v37 = vrot.slane %v11831_v33, 1  ;;  %v6051_v4 = vadd.f32 %v11354_v60, %v11346_v12  ;;  %v5531_v30 = vor.u32 %v5530_v18, %v5527_v55  ;;  %v5435_v63 = vsel %vm4868_vm9, %v5390_v14, %v5434_v34 }
 0x3a5   : > { %6447 = vmatprep.mubr.bf16.mxu1 %v5444_v24  ;;  %v4762_v20 = vsel %vm1043_vm8, %v4757_v1, %v11381_v5  ;;  %v5613_v47 = vshrl.u32 %v4763_v6, 16  ;;  %v5616_v45 = vshll.u32 %v4763_v6, 16  ;;  %v5488_v41 = vsel %vm4868_vm9, %v11367_v27, %v5487_v26 }
 0x3a6   : > { %v7608_v28 = vpop.f32.mrb[80].mxu0  ;;  %v11396_v53 = vor.u32 %v5521_v44, %v5518_v43  ;;  %v5571_v16 = vrot.slane %v5569_v57, 3  ;;  %v5574_v50 = vrot.slane %v5572_v19, 4  ;;  %v5479_v48 = vsel %vm4868_vm9, %v5434_v34, %v5478_v8 }
 0x3a7   : > { %v7609_v17 = vpop.f32.mrb[81].mxu0  ;;  %v11400_v60 = vadd.f32 %v7504_v61, %v11346_v12  ;;  %v5560_v55 = vshrl.u32 %v4762_v20, 16  ;;  %v5532_v1 = vsel %vm4868_vm9, %v5487_v26, %v5531_v30  ;;  %v11404_v6 = vadd.f32 %v7507_v38, %v11346_v12 }
 0x3a8   : > { %v7610_v14 = vadd.f32 %v7609_v17, %v7608_v28  ;;  %v7611_v13 = vpop.f32.mrb[82].mxu0  ;;  %v5563_v27 = vshll.u32 %v4762_v20, 16  ;;  %v6583_v58 = vshrl.u32 %v11190_v54, 16  ;;  %v11409_v43 = vrot.slane %v5613_v47, 3 }
 0x3a9   : > { %v7612_v18 = vpop.f32.mrb[83].mxu0  ;;  %v11411_v34 = vrot.slane %v5616_v45, 4  ;;  %v11415_v61 = vsel %vm4868_vm9, %v5478_v8, %v11396_v53  ;;  %v11417_v51 = vor.u32 %v5574_v50, %v5571_v16  ;;  %v5604_v38 = vshrl.u32 %v11381_v5, 16 }
 0x3aa   : > { %v11407_v24 = vadd.f32 %v7610_v14, %v6048_v32  ;;  %v7613_v15 = vadd.f32 %v7612_v18, %v7611_v13  ;;  %v6585_v26 = vshll.u32 %v11190_v54, 16  ;;  %v11423_v57 = vrot.slane %v5560_v55, 3 }
 0x3ab   : > { %v6609_v19 = vsel %vm962_vm5, %v11058_v2, %v11100_v0  ;;  %v6573_v33 = vshll.u32 %v11243_v21, 16  ;;  %v11429_v32 = vrot.slane %v5563_v27, 4  ;;  %v6571_v47 = vshrl.u32 %v11243_v21, 16 }
 0x3ac   : > { %6448 = vmatmul.mubr.bf16.gmra.mrb[152].mxu1 %v5435_v63  ;;  %v11421_v44 = vadd.f32 %v7613_v15, %v6051_v4  ;;  %v6587_v28 = vrot.slane %v6585_v26, 1  ;;  %v6704_v20 = vshrl.u32 %v6609_v19, 16  ;;  %v6707_v63 = vshll.u32 %v6609_v19, 16 }
 0x3ad   : > { %6455 = vmatprep.mubr.bf16.mxu1 %v5488_v41  ;;  %v7508_v8 = vpop.f32.mrb[56].mxu1  ;;  %v6575_v4 = vrot.slane %v6573_v33, 1  ;;  %v6601_v45 = vsel %vm962_vm5, %v11075_v52, %v11132_v62  ;;  %v6625_v2 = vsel %vm962_vm5, %v11105_v46, %v11360_v40  ;;  %v5576_v15 = vsel %vm4868_vm9, %v5531_v30, %v11417_v51 }
 0x3ae   : > { %v7509_v54 = vpop.f32.mrb[57].mxu1  ;;  %v6588_v16 = vor.u32 %v6587_v28, %v6583_v58  ;;  %v6706_v50 = vrot.slane %v6704_v20, 3  ;;  %v6709_v14 = vrot.slane %v6707_v63, 4  ;;  %v6687_v55 = vshrl.u32 %v6601_v45, 16 }
 0x3af   : > { %v11438_v0 = vadd.f32 %v7509_v54, %v7508_v8  ;;  %v7511_v41 = vpop.f32.mrb[58].mxu1  ;;  %v6576_v13 = vor.u32 %v6575_v4, %v6571_v47  ;;  %v6690_v18 = vshll.u32 %v6601_v45, 16  ;;  %v6764_v62 = vshrl.u32 %v6625_v2, 16 }
 0x3b0   : > { %v7512_v21 = vpop.f32.mrb[59].mxu1  ;;  %v6593_v46 = vsel %vm962_vm5, %v6588_v16, %v11053_v31  ;;  %v6710_v8 = vor.u32 %v6709_v14, %v6706_v50  ;;  %v6689_v47 = vrot.slane %v6687_v55, 3  ;;  %v6617_v50 = vsel %vm962_vm5, %v11151_v25, %v11385_v37 }
 0x3b1   : > { %v11442_v27 = vadd.f32 %v7512_v21, %v7511_v41  ;;  %v6696_v26 = vshrl.u32 %v6593_v46, 16  ;;  %v6699_v19 = vshll.u32 %v6593_v46, 16  ;;  %v6581_v58 = vsel %vm962_vm5, %v6576_v13, %v11072_v3 }
 0x3b2   : > { %v6679_v28 = vshrl.u32 %v6581_v58, 16  ;;  %v6682_v20 = vshll.u32 %v6581_v58, 16  ;;  %v6692_v45 = vrot.slane %v6690_v18, 4  ;;  %v6766_v31 = vrot.slane %v6764_v62, 3 }
 0x3b3   : > { %v7614_v33 = vpop.f32.mrb[84].mxu0  ;;  %v6698_v63 = vrot.slane %v6696_v26, 3  ;;  %v6701_v4 = vrot.slane %v6699_v19, 4  ;;  %v6767_v46 = vshll.u32 %v6625_v2, 16  ;;  %v6755_v19 = vshrl.u32 %v6617_v50, 16 }
 0x3b4   : > { %6456 = vmatmul.mubr.bf16.gmra.mrb[156].mxu1 %v5479_v48  ;;  %v7615_v54 = vpop.f32.mrb[85].mxu0  ;;  %v6681_v30 = vrot.slane %v6679_v28, 3  ;;  %v6684_v21 = vrot.slane %v6682_v20, 4  ;;  %v6693_v3 = vor.u32 %v6692_v45, %v6689_v47  ;;  %v11832_v48 = vshrl.u32 %v11134_v35, 16  ;;  %v6568_v20 = vld [vmem:[#allocation3 + $0x130] sm:$0x1f] }
 0x3b5   : > { %6463 = vmatprep.mubr.bf16.mxu1 %v5532_v1  ;;  %v7616_v41 = vadd.f32 %v7615_v54, %v7614_v33  ;;  %v7617_v16 = vpop.f32.mrb[86].mxu0  ;;  %v6702_v52 = vor.u32 %v6701_v4, %v6698_v63  ;;  %v6769_v62 = vrot.slane %v6767_v46, 4  ;;  %v6758_v58 = vshll.u32 %v6617_v50, 16 }
 0x3b6   : > { %v7618_v17 = vpop.f32.mrb[87].mxu0  ;;  %v6631_v14 = vor.u32 %v11832_v48, %v11360_v40  ;;  %v6685_v18 = vor.u32 %v6684_v21, %v6681_v30  ;;  %v6757_v54 = vrot.slane %v6755_v19, 3  ;;  %v11484_v50 = vrot.slane %v6568_v20, 1 }
 0x3b7   : > { %v11458_v13 = vadd.f32 %v7616_v41, %v11400_v60  ;;  %v7514_v1 = vpop.f32.mrb[60].mxu1  ;;  %v7619_v55 = vadd.f32 %v7618_v17, %v7617_v16  ;;  %v11461_v2 = vsel %vm4868_vm9, %v6702_v52, %v6710_v8  ;;  %v6770_v60 = vor.u32 %v6769_v62, %v6766_v31  ;;  %v6569_v17 = vld [vmem:[#allocation3 + $0x138] sm:$0x1f] }
 0x3b8   : > { %v7515_v26 = vpop.f32.mrb[61].mxu1  ;;  %v6808_v33 = vshrl.u32 %v6631_v14, 16  ;;  %v11469_v40 = vsel %vm4868_vm9, %v6685_v18, %v6693_v3  ;;  %v6760_v63 = vrot.slane %v6758_v58, 4  ;;  %v6811_v4 = vshll.u32 %v6631_v14, 16 }
 0x3b9   : > { %v11464_v25 = vadd.f32 %v7619_v55, %v11404_v6  ;;  %v11466_v28 = vadd.f32 %v7515_v26, %v7514_v1  ;;  %v7517_v35 = vpop.f32.mrb[62].mxu1  ;;  %v11473_v41 = vrot.slane %v5604_v38, 3  ;;  %v11476_v6 = vsel %vm4868_vm9, %v6710_v8, %v6770_v60 }
 0x3ba   : > { %v7518_v47 = vpop.f32.mrb[63].mxu1  ;;  %v6810_v52 = vrot.slane %v6808_v33, 3  ;;  %v11833_v16 = vshrl.u32 %v11153_v23, 16  ;;  %v6761_v31 = vor.u32 %v6760_v63, %v6757_v54  ;;  %v6813_v21 = vrot.slane %v6811_v4, 4 }
 0x3bb   : > { %v7519_v45 = vadd.f32 %v7518_v47, %v7517_v35  ;;  %v11482_v46 = vrot.slane %v6569_v17, 1  ;;  %v6064_v38 = vadd.f32 %v11438_v0, %v11346_v12  ;;  %v5566_v8 = vor.u32 %v11429_v32, %v11423_v57 }
 0x3bc   : > { %v6628_v30 = vor.u32 %v11833_v16, %v11385_v37  ;;  %6464 = vmatmul.mubr.bf16.gmra.mrb[160].mxu1 %v11415_v61  ;;  %v11491_v23 = vsel %vm4868_vm9, %v6693_v3, %v6761_v31  ;;  %v6814_v37 = vor.u32 %v6813_v21, %v6810_v52  ;;  %v11834_v61 = vrot.slane %v11036_v49, 1 }
 0x3bd   : > { %6471 = vmatprep.mubr.bf16.mxu1 %v5576_v15  ;;  %v11835_v15 = vrot.slane %v11031_v56, 1  ;;  %v6067_v49 = vadd.f32 %v11442_v27, %v11346_v12 }
 0x3be   : > { %v6799_v48 = vshrl.u32 %v6628_v30, 16  ;;  %v6802_v14 = vshll.u32 %v6628_v30, 16  ;;  %v7620_v1 = vpop.f32.mrb[88].mxu0  ;;  %v6653_v55 = vsel %vm1043_vm8, %v11834_v61, %v11482_v46  ;;  %v11502_v3 = vsel %vm4868_vm9, %v6770_v60, %v6814_v37 }
 0x3bf   : > { %v6651_v0 = vsel %vm1043_vm8, %v11835_v15, %v11484_v50  ;;  %v7621_v18 = vpop.f32.mrb[89].mxu0  ;;  %v6782_v32 = vshrl.u32 %v6653_v55, 16  ;;  %v6785_v26 = vshll.u32 %v6653_v55, 16  ;;  %v5567_v30 = vsel %vm4868_vm9, %v11396_v53, %v5566_v8 }
 0x3c0   : > { %v6801_v62 = vrot.slane %v6799_v48, 3  ;;  %v6804_v57 = vrot.slane %v6802_v14, 4  ;;  %v7622_v19 = vadd.f32 %v7621_v18, %v7620_v1  ;;  %v7623_v58 = vpop.f32.mrb[90].mxu0  ;;  %v6773_v33 = vshrl.u32 %v6651_v0, 16 }
 0x3c1   : > { %v6776_v35 = vshll.u32 %v6651_v0, 16  ;;  %v7624_v17 = vpop.f32.mrb[91].mxu0  ;;  %v6784_v56 = vrot.slane %v6782_v32, 3  ;;  %v6787_v47 = vrot.slane %v6785_v26, 4  ;;  %v11836_v60 = vshll.u32 %v11381_v5, 16 }
 0x3c2   : > { %v6805_v20 = vor.u32 %v6804_v57, %v6801_v62  ;;  %v11506_v54 = vadd.f32 %v7622_v19, %v6064_v38  ;;  %v7520_v63 = vpop.f32.mrb[64].mxu1  ;;  %v7625_v52 = vadd.f32 %v7624_v17, %v7623_v58  ;;  %v6775_v4 = vrot.slane %v6773_v33, 3 }
 0x3c3   : > { %v6778_v16 = vrot.slane %v6776_v35, 4  ;;  %v5609_v21 = vrot.slane %v11836_v60, 4  ;;  %v7521_v48 = vpop.f32.mrb[65].mxu1  ;;  %v11515_v27 = vor.u32 %v6787_v47, %v6784_v56  ;;  %v11837_v38 = vor.u32 %v11411_v34, %v11409_v43 }
 0x3c4   : > { %v11513_v14 = vsel %vm4868_vm9, %v6761_v31, %v6805_v20  ;;  %6472 = vmatmul.mubr.bf16.gmra.mrb[164].mxu1 %v5567_v30  ;;  %v11522_v37 = vadd.f32 %v7625_v52, %v6067_v49  ;;  %v7522_v61 = vadd.f32 %v7521_v48, %v7520_v63  ;;  %v7523_v53 = vpop.f32.mrb[66].mxu1  ;;  %v6072_v18 = vadd.f32 %v11466_v28, %v11346_v12 }
 0x3c5   : > { %v5620_v1 = vsel %vm4868_vm9, %v11417_v51, %v11837_v38  ;;  %v11524_v55 = vor.u32 %v6778_v16, %v6775_v4  ;;  %v7524_v5 = vpop.f32.mrb[67].mxu1  ;;  %v11529_v31 = vsel %vm4868_vm9, %v11275_v42, %v11515_v27  ;;  %v5610_v34 = vor.u32 %v5609_v21, %v11473_v41 }
 0x3c6   : > { %6479 = vmatprep.mubr.bf16.mxu1 %v5620_v1  ;;  %v7525_v15 = vadd.f32 %v7524_v5, %v7523_v53  ;;  %v6075_v26 = vadd.f32 %v7519_v45, %v11346_v12  ;;  %v11838_v53 = vld [vmem:[#allocation8_spill] sm:$0xff] }
 0x3c7   : > { %v11534_v43 = vsel %vm4868_vm9, %v11326_v29, %v11524_v55  ;;  %v5611_v42 = vsel %vm4868_vm9, %v5566_v8, %v5610_v34 }
 0x3c8   : > { %v7626_v51 = vpop.f32.mrb[92].mxu0  ;;  %v6083_v63 = vadd.f32 %v7525_v15, %v11346_v12 }
 0x3c9   : > { %v7627_v0 = vpop.f32.mrb[93].mxu0 }
 0x3ca   : > { %v7628_v62 = vadd.f32 %v7627_v0, %v7626_v51  ;;  %v7629_v57 = vpop.f32.mrb[94].mxu0  ;;  %v11839_v0 = vld [vmem:[#allocation7_spill] sm:$0xff] }
 0x3cb   : > { %v7630_v32 = vpop.f32.mrb[95].mxu0 }
 0x3cc   : > { %v11541_v19 = vadd.f32 %v7628_v62, %v6072_v18  ;;  %v7631_v58 = vadd.f32 %v7630_v32, %v7629_v57  ;;  %6480 = vmatmul.mubr.bf16.gmra.mrb[168].mxu1 %v5611_v42  ;;  %v11840_v18 = vld [vmem:[#allocation10_spill] sm:$0xff] }
 0x3cd   : > { %6941 = vmatprep.mubr.bf16.mxu1 %v11461_v2  ;;  %v7526_v29 = vpop.f32.mrb[68].mxu1  ;;  %v6080_v2 = vadd.f32 %v7522_v61, %v11346_v12 }
 0x3ce   : > { %v11544_v41 = vadd.f32 %v7631_v58, %v6075_v26  ;;  %v7527_v33 = vpop.f32.mrb[69].mxu1  ;;  %v6826_v58 = vshrl.u32 %v11482_v46, 16 }
 0x3cf   : > { %v7528_v35 = vadd.f32 %v7527_v33, %v7526_v29  ;;  %v7529_v49 = vpop.f32.mrb[70].mxu1  ;;  %v11841_v29 = vld [vmem:[#allocation11_spill] sm:$0xff] }
 0x3d0   : > { %v7530_v28 = vpop.f32.mrb[71].mxu1 }
 0x3d1   : > { %v7531_v17 = vadd.f32 %v7530_v28, %v7529_v49  ;;  %v6088_v48 = vadd.f32 %v7528_v35, %v11346_v12 }
 0x3d4   : > { %6942 = vmatmul.mubr.bf16.vlgmr.msra.gmra.mrb[172].mxu1 %v11469_v40 }
 0x3d5   : > { %7972 = vmatpush3.bf16.msra.mxu1 %v11113_v59  ;;  %6949 = vmatprep.mubr.bf16.mxu1 %v11476_v6  ;;  %v7632_v45 = vpop.f32.mrb[96].mxu0 }
 0x3d6   : > { %7965 = vmatprep.subr.bf16.mxu1 %v11123_v39  ;;  %v7633_v8 = vpop.f32.mrb[97].mxu0 }
 0x3d7   : > { %v7634_v20 = vadd.f32 %v7633_v8, %v7632_v45  ;;  %v7635_v56 = vpop.f32.mrb[98].mxu0 }
 0x3d8   : > { %v7636_v47 = vpop.f32.mrb[99].mxu0 }
 0x3d9   : > { %7973 = vmatpush3.bf16.msra.mxu1 %v11147_v7  ;;  %v11553_v52 = vadd.f32 %v7634_v20, %v6080_v2  ;;  %v7532_v40 = vpop.f32.mrb[72].mxu1  ;;  %v7637_v4 = vadd.f32 %v7636_v47, %v7635_v56  ;;  %v6828_v47 = vrot.slane %v6826_v58, 3 }
 0x3da   : > { %7966 = vmatprep.subr.bf16.mxu1 %v11158_v11  ;;  %v7533_v59 = vpop.f32.mrb[73].mxu1 }
 0x3db   : > { %v11556_v6 = vadd.f32 %v7637_v4, %v6083_v63  ;;  %v7534_v39 = vadd.f32 %v7533_v59, %v7532_v40  ;;  %v7535_v16 = vpop.f32.mrb[74].mxu1  ;;  %v11844_v4 = vld [vmem:[#allocation14_spill] sm:$0xff] }
 0x3dc   : > { %6950 = vmatmul.mubr.bf16.gmra.mrb[176].mxu1 %v11491_v23  ;;  %v7536_v30 = vpop.f32.mrb[75].mxu1  ;;  %v6091_v23 = vadd.f32 %v7531_v17, %v11346_v12 }
 0x3dd   : > { %7974 = vmatpush3.bf16.msra.mxu1 %v11177_v22  ;;  %6957 = vmatprep.mubr.bf16.mxu1 %v11502_v3  ;;  %v7537_v60 = vadd.f32 %v7536_v30, %v7535_v16  ;;  %v6096_v32 = vadd.f32 %v7534_v39, %v11346_v12  ;;  %v6817_v16 = vshrl.u32 %v11484_v50, 16  ;;  %v6820_v30 = vshll.u32 %v11484_v50, 16 }
 0x3de   : > { %7967 = vmatprep.subr.bf16.mxu1 %v11198_v9 }
 0x3df   : > { %v7638_v7 = vpop.f32.mrb[100].mxu0  ;;  %v6099_v49 = vadd.f32 %v7537_v60, %v11346_v12 }
 0x3e0   : > { %v7639_v21 = vpop.f32.mrb[101].mxu0 }
 0x3e1   : > { %v7640_v11 = vadd.f32 %v7639_v21, %v7638_v7  ;;  %v7641_v38 = vpop.f32.mrb[102].mxu0  ;;  %7975 = vmatpush3.bf16.msra.mxu1 %v11214_v10  ;;  %v7538_v1 = vpop.f32.mrb[76].mxu1 }
 0x3e2   : > { %v7642_v61 = vpop.f32.mrb[103].mxu0  ;;  %7968 = vmatprep.subr.bf16.mxu1 %v11838_v53  ;;  %v7539_v5 = vpop.f32.mrb[77].mxu1 }
 0x3e3   : > { %v11566_v22 = vadd.f32 %v7640_v11, %v6088_v48  ;;  %v7643_v3 = vadd.f32 %v7642_v61, %v7641_v38  ;;  %v7540_v15 = vadd.f32 %v7539_v5, %v7538_v1  ;;  %v7541_v9 = vpop.f32.mrb[78].mxu1  ;;  %v11845_v11 = vld [vmem:[#allocation15_spill] sm:$0xff] }
 0x3e4   : > { %6958 = vmatmul.mubr.bf16.gmra.mrb[180].mxu1 %v11513_v14  ;;  %v7542_v51 = vpop.f32.mrb[79].mxu1  ;;  %v6829_v14 = vshll.u32 %v11482_v46, 16  ;;  %v11843_v46 = vld [vmem:[#allocation13_spill] sm:$0xff] }
 0x3e5   : > { %v11569_v34 = vadd.f32 %v7643_v3, %v6091_v23  ;;  %7976 = vmatpush3.bf16.msra.mxu1 %v11839_v0  ;;  %7006 = vmatprep.mubr.bf16.mxu1 %v11529_v31  ;;  %v7543_v10 = vadd.f32 %v7542_v51, %v7541_v9  ;;  %v11842_v31 = vld [vmem:[#allocation12_spill] sm:$0xff]  ;;  %v6104_v60 = vadd.f32 %v7540_v15, %v11346_v12  ;;  %v6819_v51 = vrot.slane %v6817_v16, 3 }
 0x3e6   : > { %7969 = vmatprep.subr.bf16.mxu1 %v11840_v18  ;;  %v6831_v63 = vrot.slane %v6829_v14, 4  ;;  %v6822_v0 = vrot.slane %v6820_v30, 4 }
 0x3e7   : > { %v7644_v62 = vpop.f32.mrb[104].mxu0  ;;  %v6107_v61 = vadd.f32 %v7543_v10, %v11346_v12 }
 0x3e8   : > { %v7645_v57 = vpop.f32.mrb[105].mxu0  ;;  %v6832_v7 = vor.u32 %v6831_v63, %v6828_v47  ;;  %v6823_v10 = vor.u32 %v6822_v0, %v6819_v51 }
 0x3e9   : > { %v7646_v26 = vadd.f32 %v7645_v57, %v7644_v62  ;;  %v7647_v42 = vpop.f32.mrb[106].mxu0  ;;  %7977 = vmatpush3.bf16.msra.mxu1 %v11841_v29  ;;  %v7544_v33 = vpop.f32.mrb[80].mxu1 }
 0x3ea   : > { %v7648_v35 = vpop.f32.mrb[107].mxu0  ;;  %7970 = vmatprep.subr.bf16.mxu1 %v11842_v31  ;;  %v7545_v45 = vpop.f32.mrb[81].mxu1  ;;  %v6833_v50 = vsel %vm4868_vm9, %v11515_v27, %v6832_v7 }
 0x3eb   : > { %v11580_v28 = vadd.f32 %v7646_v26, %v6096_v32  ;;  %v7649_v17 = vadd.f32 %v7648_v35, %v7647_v42  ;;  %v7546_v8 = vadd.f32 %v7545_v45, %v7544_v33  ;;  %v7547_v2 = vpop.f32.mrb[82].mxu1 }
 0x3ec   : > { %v7548_v56 = vpop.f32.mrb[83].mxu1 }
 0x3ed   : > { %v11582_v20 = vadd.f32 %v7649_v17, %v6099_v49  ;;  %7978 = vmatpush3.bf16.msra.mxu1 %v11843_v46  ;;  %v7549_v40 = vadd.f32 %v7548_v56, %v7547_v2  ;;  %v6112_v26 = vadd.f32 %v7546_v8, %v11346_v12  ;;  %v6824_v49 = vsel %vm4868_vm9, %v11524_v55, %v6823_v10 }
 0x3ee   : > { %7971 = vmatprep.subr.bf16.mxu1 %v11844_v4 }
 0x3ef   : > { %v7650_v59 = vpop.f32.mrb[108].mxu0  ;;  %v6115_v33 = vadd.f32 %v7549_v40, %v11346_v12 }
 0x3f0   : > { %v7651_v39 = vpop.f32.mrb[109].mxu0 }
 0x3f1   : > { %v7652_v21 = vadd.f32 %v7651_v39, %v7650_v59  ;;  %v7653_v48 = vpop.f32.mrb[110].mxu0  ;;  %7979 = vmatpush3.bf16.msra.mxu1 %v11845_v11  ;;  %v7550_v38 = vpop.f32.mrb[84].mxu1 }
 0x3f2   : > { %v7654_v1 = vpop.f32.mrb[111].mxu0  ;;  %v7551_v3 = vpop.f32.mrb[85].mxu1 }
 0x3f3   : > { %v11591_v23 = vadd.f32 %v7652_v21, %v6104_v60  ;;  %v7655_v53 = vadd.f32 %v7654_v1, %v7653_v48  ;;  %v7552_v5 = vadd.f32 %v7551_v3, %v7550_v38  ;;  %v7553_v9 = vpop.f32.mrb[86].mxu1 }
 0x3f4   : > { %7007 = vmatmul.mubr.bf16.vlgmr.msra.gmra.mrb[184].mxu1 %v11534_v43  ;;  %v7554_v18 = vpop.f32.mrb[87].mxu1 }
 0x3f5   : > { %v11596_v15 = vadd.f32 %v7655_v53, %v6107_v61  ;;  %7014 = vmatprep.mubr.bf16.mxu1 %v6833_v50  ;;  %v7555_v62 = vadd.f32 %v7554_v18, %v7553_v9  ;;  %v6120_v63 = vadd.f32 %v7552_v5, %v11346_v12 }
 0x3f7   : > { %v7656_v57 = vpop.f32.mrb[112].mxu0  ;;  %v6123_v39 = vadd.f32 %v7555_v62, %v11346_v12 }
 0x3f8   : > { %v7657_v32 = vpop.f32.mrb[113].mxu0 }
 0x3f9   : > { %v7658_v42 = vadd.f32 %v7657_v32, %v7656_v57  ;;  %v7659_v58 = vpop.f32.mrb[114].mxu0  ;;  %v7556_v14 = vpop.f32.mrb[88].mxu1 }
 0x3fa   : > { %v7660_v29 = vpop.f32.mrb[115].mxu0  ;;  %v7557_v27 = vpop.f32.mrb[89].mxu1 }
 0x3fb   : > { %v11600_v43 = vadd.f32 %v7658_v42, %v6112_v26  ;;  %v7661_v35 = vadd.f32 %v7660_v29, %v7659_v58  ;;  %v7558_v31 = vadd.f32 %v7557_v27, %v7556_v14  ;;  %v7559_v17 = vpop.f32.mrb[90].mxu1 }
 0x3fc   : > { %7015 = vmatmul.mubr.bf16.gmra.mrb[188].mxu1 %v6824_v49  ;;  %v7560_v2 = vpop.f32.mrb[91].mxu1 }
 0x3fd   : > { %v11604_v45 = vadd.f32 %v7661_v35, %v6115_v33  ;;  %v7561_v8 = vadd.f32 %v7560_v2, %v7559_v17  ;;  %v6128_v61 = vadd.f32 %v7558_v31, %v11346_v12 }
 0x3ff   : > { %v7662_v56 = vpop.f32.mrb[116].mxu0  ;;  %v6131_v51 = vadd.f32 %v7561_v8, %v11346_v12 }
 0x400   : > { %v7663_v47 = vpop.f32.mrb[117].mxu0 }
 0x401   : > { %v7664_v46 = vadd.f32 %v7663_v47, %v7662_v56  ;;  %v7665_v40 = vpop.f32.mrb[118].mxu0  ;;  %v7562_v4 = vpop.f32.mrb[92].mxu1 }
 0x402   : > { %v7666_v59 = vpop.f32.mrb[119].mxu0  ;;  %v7563_v30 = vpop.f32.mrb[93].mxu1 }
 0x403   : > { %v11608_v16 = vadd.f32 %v7664_v46, %v6120_v63  ;;  %v7667_v55 = vadd.f32 %v7666_v59, %v7665_v40  ;;  %v7564_v60 = vadd.f32 %v7563_v30, %v7562_v4  ;;  %v7565_v7 = vpop.f32.mrb[94].mxu1 }
 0x404   : > { %v7566_v48 = vpop.f32.mrb[95].mxu1 }
 0x405   : > { %v11610_v21 = vadd.f32 %v7667_v55, %v6123_v39  ;;  %v7567_v11 = vadd.f32 %v7566_v48, %v7565_v7  ;;  %v6136_v14 = vadd.f32 %v7564_v60, %v11346_v12 }
 0x407   : > { %v7668_v38 = vpop.f32.mrb[120].mxu0  ;;  %v6139_v49 = vadd.f32 %v7567_v11, %v11346_v12 }
 0x408   : > { %v7669_v1 = vpop.f32.mrb[121].mxu0 }
 0x409   : > { %v7670_v53 = vadd.f32 %v7669_v1, %v7668_v38  ;;  %v7671_v3 = vpop.f32.mrb[122].mxu0  ;;  %v7568_v5 = vpop.f32.mrb[96].mxu1 }
 0x40a   : > { %v7672_v9 = vpop.f32.mrb[123].mxu0  ;;  %v7569_v18 = vpop.f32.mrb[97].mxu1 }
 0x40b   : > { %v11614_v0 = vadd.f32 %v7670_v53, %v6128_v61  ;;  %v7673_v50 = vadd.f32 %v7672_v9, %v7671_v3  ;;  %v7570_v62 = vadd.f32 %v7569_v18, %v7568_v5  ;;  %v7571_v57 = vpop.f32.mrb[98].mxu1 }
 0x40c   : > { %v7572_v32 = vpop.f32.mrb[99].mxu1 }
 0x40d   : > { %v11616_v10 = vadd.f32 %v7673_v50, %v6131_v51  ;;  %v7573_v26 = vadd.f32 %v7572_v32, %v7571_v57  ;;  %v6144_v59 = vadd.f32 %v7570_v62, %v11346_v12 }
 0x40f   : > { %v7674_v42 = vpop.f32.mrb[124].mxu0  ;;  %v6147_v7 = vadd.f32 %v7573_v26, %v11346_v12 }
 0x410   : > { %v7675_v58 = vpop.f32.mrb[125].mxu0 }
 0x411   : > { %v7676_v29 = vadd.f32 %v7675_v58, %v7674_v42  ;;  %v7677_v33 = vpop.f32.mrb[126].mxu0  ;;  %v7574_v35 = vpop.f32.mrb[100].mxu1 }
 0x412   : > { %v7678_v27 = vpop.f32.mrb[127].mxu0  ;;  %v7575_v2 = vpop.f32.mrb[101].mxu1 }
 0x413   : > { %v11620_v31 = vadd.f32 %v7676_v29, %v6136_v14  ;;  %v7679_v17 = vadd.f32 %v7678_v27, %v7677_v33  ;;  %v7576_v8 = vadd.f32 %v7575_v2, %v7574_v35  ;;  %v7577_v56 = vpop.f32.mrb[102].mxu1 }
 0x414   : > { %v7578_v63 = vpop.f32.mrb[103].mxu1 }
 0x415   : > { %v11622_v47 = vadd.f32 %v7679_v17, %v6139_v49  ;;  %v7579_v46 = vadd.f32 %v7578_v63, %v7577_v56  ;;  %v6152_v50 = vadd.f32 %v7576_v8, %v11346_v12  ;;  %v11846_v49 = vld [vmem:[#allocation16_spill] sm:$0xff] }
 0x417   : > { %v7680_v40 = vpop.f32.mrb[128].mxu0  ;;  %v6155_v32 = vadd.f32 %v7579_v46, %v11346_v12 }
 0x418   : > { %v7681_v4 = vpop.f32.mrb[129].mxu0 }
 0x419   : > { %v7682_v39 = vadd.f32 %v7681_v4, %v7680_v40  ;;  %v7683_v55 = vpop.f32.mrb[130].mxu0  ;;  %v7580_v30 = vpop.f32.mrb[104].mxu1 }
 0x41a   : > { %v7684_v60 = vpop.f32.mrb[131].mxu0  ;;  %v7581_v38 = vpop.f32.mrb[105].mxu1 }
 0x41b   : > { %v11626_v48 = vadd.f32 %v7682_v39, %v6144_v59  ;;  %v7685_v11 = vadd.f32 %v7684_v60, %v7683_v55  ;;  %v7582_v1 = vadd.f32 %v7581_v38, %v7580_v30  ;;  %v7583_v61 = vpop.f32.mrb[106].mxu1 }
 0x41c   : > { %v7584_v3 = vpop.f32.mrb[107].mxu1 }
 0x41d   : > { %v11628_v53 = vadd.f32 %v7685_v11, %v6147_v7  ;;  %v7585_v5 = vadd.f32 %v7584_v3, %v7583_v61  ;;  %v6160_v46 = vadd.f32 %v7582_v1, %v11346_v12 }
 0x41f   : > { %v7686_v9 = vpop.f32.mrb[132].mxu0  ;;  %v6163_v7 = vadd.f32 %v7585_v5, %v11346_v12 }
 0x420   : > { %v7687_v51 = vpop.f32.mrb[133].mxu0 }
 0x421   : > { %v7688_v18 = vadd.f32 %v7687_v51, %v7686_v9  ;;  %v7689_v62 = vpop.f32.mrb[134].mxu0 }
 0x422   : > { %v7690_v57 = vpop.f32.mrb[135].mxu0 }
 0x423   : > { %v11632_v26 = vadd.f32 %v7688_v18, %v6152_v50  ;;  %v7691_v42 = vadd.f32 %v7690_v57, %v7689_v62 }
 0x424   : > { %v7714_v14 = vpop.f32.mrb[108].mxu1 }
 0x425   : > { %v11634_v58 = vadd.f32 %v7691_v42, %v6155_v32  ;;  %v7715_v29 = vpop.f32.mrb[109].mxu1 }
 0x426   : > { %v7716_v33 = vadd.f32 %v7715_v29, %v7714_v14  ;;  %v7717_v35 = vpop.f32.mrb[110].mxu1 }
 0x427   : > { %v7718_v27 = vpop.f32.mrb[111].mxu1 }
 0x428   : > { %v6362_v17 = vadd.f32 %v7716_v33, %v11846_v49  ;;  %v7719_v2 = vadd.f32 %v7718_v27, %v7717_v35 }
 0x42a   : > { %v6365_v8 = vadd.f32 %v7719_v2, %v11378_v36  ;;  %v6488_v63 = vmax.f32 %v6362_v17, 0.0 }
 0x42c   : > { %v7692_v56 = vpop.f32.mrb[136].mxu0  ;;  %v6489_v40 = vmax.f32 %v6365_v8, 0.0 }
 0x42d   : > { %v7693_v4 = vpop.f32.mrb[137].mxu0 }
 0x42e   : > { %v7694_v59 = vadd.f32 %v7693_v4, %v7692_v56  ;;  %v7695_v39 = vpop.f32.mrb[138].mxu0  ;;  %v6520_v55 = vadd.f32 %v6489_v40, %v6488_v63  ;;  %v7720_v60 = vpop.f32.mrb[112].mxu1 }
 0x42f   : > { %v7696_v30 = vpop.f32.mrb[139].mxu0  ;;  %v7721_v61 = vpop.f32.mrb[113].mxu1 }
 0x430   : > { %v11640_v11 = vadd.f32 %v7694_v59, %v6160_v46  ;;  %v7697_v38 = vadd.f32 %v7696_v30, %v7695_v39  ;;  %v7722_v3 = vadd.f32 %v7721_v61, %v7720_v60  ;;  %v7723_v9 = vpop.f32.mrb[114].mxu1 }
 0x431   : > { %v7724_v51 = vpop.f32.mrb[115].mxu1 }
 0x432   : > { %v11642_v36 = vadd.f32 %v7697_v38, %v6163_v7  ;;  %v6370_v50 = vadd.f32 %v7722_v3, %v11407_v24  ;;  %v7725_v18 = vadd.f32 %v7724_v51, %v7723_v9 }
 0x434   : > { %v6490_v1 = vmax.f32 %v6370_v50, 0.0  ;;  %v6373_v62 = vadd.f32 %v7725_v18, %v11421_v44 }
 0x436   : > { %v6521_v57 = vadd.f32 %v6520_v55, %v6490_v1  ;;  %v6491_v32 = vmax.f32 %v6373_v62, 0.0 }
 0x437   : > { %v7726_v42 = vpop.f32.mrb[116].mxu1 }
 0x438   : > { %v6522_v14 = vadd.f32 %v6521_v57, %v6491_v32  ;;  %v7727_v12 = vpop.f32.mrb[117].mxu1 }
 0x439   : > { %v7728_v5 = vadd.f32 %v7727_v12, %v7726_v42  ;;  %v7729_v29 = vpop.f32.mrb[118].mxu1 }
 0x43a   : > { %v7730_v33 = vpop.f32.mrb[119].mxu1 }
 0x43b   : > { %v6378_v35 = vadd.f32 %v7728_v5, %v11458_v13  ;;  %v7731_v27 = vadd.f32 %v7730_v33, %v7729_v29 }
 0x43d   : > { %v6492_v49 = vmax.f32 %v6378_v35, 0.0  ;;  %v6381_v17 = vadd.f32 %v7731_v27, %v11464_v25 }
 0x43f   : > { %v6523_v2 = vadd.f32 %v6522_v14, %v6492_v49  ;;  %v6493_v24 = vmax.f32 %v6381_v17, 0.0  ;;  %v7732_v8 = vpop.f32.mrb[120].mxu1 }
 0x440   : > { %v7733_v56 = vpop.f32.mrb[121].mxu1 }
 0x441   : > { %v6524_v63 = vadd.f32 %v6523_v2, %v6493_v24  ;;  %v7734_v44 = vadd.f32 %v7733_v56, %v7732_v8  ;;  %v7735_v40 = vpop.f32.mrb[122].mxu1 }
 0x442   : > { %v7826_v4 = vpop.f32.mrb[140].mxu0  ;;  %v7736_v46 = vpop.f32.mrb[123].mxu1 }
 0x443   : > { %v7827_v59 = vpop.f32.mrb[141].mxu0  ;;  %v6386_v39 = vadd.f32 %v7734_v44, %v11506_v54  ;;  %v7737_v55 = vadd.f32 %v7736_v46, %v7735_v40 }
 0x444   : > { %v11649_v30 = vadd.f32 %v7827_v59, %v7826_v4  ;;  %v7829_v13 = vpop.f32.mrb[142].mxu0 }
 0x445   : > { %v7830_v60 = vpop.f32.mrb[143].mxu0  ;;  %v6494_v7 = vmax.f32 %v6386_v39, 0.0  ;;  %v6389_v25 = vadd.f32 %v7737_v55, %v11522_v37 }
 0x446   : > { %v11652_v38 = vadd.f32 %v7830_v60, %v7829_v13 }
 0x447   : > { %v6525_v61 = vadd.f32 %v6524_v63, %v6494_v7  ;;  %v6495_v3 = vmax.f32 %v6389_v25, 0.0  ;;  %v7738_v9 = vpop.f32.mrb[124].mxu1 }
 0x448   : > { %v7739_v51 = vpop.f32.mrb[125].mxu1 }
 0x449   : > { %v6526_v50 = vadd.f32 %v6525_v61, %v6495_v3  ;;  %v7740_v18 = vadd.f32 %v7739_v51, %v7738_v9  ;;  %v7741_v1 = vpop.f32.mrb[126].mxu1 }
 0x44a   : > { %v7742_v62 = vpop.f32.mrb[127].mxu1 }
 0x44b   : > { %v6394_v54 = vadd.f32 %v7740_v18, %v11541_v19  ;;  %v7743_v57 = vadd.f32 %v7742_v62, %v7741_v1 }
 0x44c   : > { %v7832_v32 = vpop.f32.mrb[144].mxu0 }
 0x44d   : > { %v7833_v42 = vpop.f32.mrb[145].mxu0  ;;  %v6496_v14 = vmax.f32 %v6394_v54, 0.0  ;;  %v6397_v12 = vadd.f32 %v7743_v57, %v11544_v41 }
 0x44e   : > { %v11656_v5 = vadd.f32 %v7833_v42, %v7832_v32  ;;  %v7835_v37 = vpop.f32.mrb[146].mxu0 }
 0x44f   : > { %v7836_v29 = vpop.f32.mrb[147].mxu0  ;;  %v6527_v33 = vadd.f32 %v6526_v50, %v6496_v14  ;;  %v6497_v35 = vmax.f32 %v6397_v12, 0.0  ;;  %v7744_v27 = vpop.f32.mrb[128].mxu1 }
 0x450   : > { %v11658_v49 = vadd.f32 %v7836_v29, %v7835_v37  ;;  %v7745_v17 = vpop.f32.mrb[129].mxu1 }
 0x451   : > { %v6528_v2 = vadd.f32 %v6527_v33, %v6497_v35  ;;  %v7746_v24 = vadd.f32 %v7745_v17, %v7744_v27  ;;  %v7747_v8 = vpop.f32.mrb[130].mxu1 }
 0x452   : > { %v7748_v19 = vpop.f32.mrb[131].mxu1 }
 0x453   : > { %v6402_v56 = vadd.f32 %v7746_v24, %v11553_v52  ;;  %v7749_v63 = vadd.f32 %v7748_v19, %v7747_v8 }
 0x454   : > { %v7838_v44 = vpop.f32.mrb[148].mxu0 }
 0x455   : > { %v7839_v40 = vpop.f32.mrb[149].mxu0  ;;  %v6498_v41 = vmax.f32 %v6402_v56, 0.0  ;;  %v6405_v4 = vadd.f32 %v7749_v63, %v11556_v6 }
 0x456   : > { %v11662_v46 = vadd.f32 %v7839_v40, %v7838_v44  ;;  %v7841_v59 = vpop.f32.mrb[150].mxu0 }
 0x457   : > { %v7842_v39 = vpop.f32.mrb[151].mxu0  ;;  %v6529_v55 = vadd.f32 %v6528_v2, %v6498_v41  ;;  %v6499_v13 = vmax.f32 %v6405_v4, 0.0  ;;  %v7750_v60 = vpop.f32.mrb[132].mxu1 }
 0x458   : > { %v11664_v7 = vadd.f32 %v7842_v39, %v7841_v59  ;;  %v7751_v25 = vpop.f32.mrb[133].mxu1 }
 0x459   : > { %v6530_v61 = vadd.f32 %v6529_v55, %v6499_v13  ;;  %v7752_v3 = vadd.f32 %v7751_v25, %v7750_v60  ;;  %v7753_v9 = vpop.f32.mrb[134].mxu1 }
 0x45a   : > { %v7754_v52 = vpop.f32.mrb[135].mxu1 }
 0x45b   : > { %v6410_v51 = vadd.f32 %v7752_v3, %v11566_v22  ;;  %v7755_v50 = vadd.f32 %v7754_v52, %v7753_v9 }
 0x45d   : > { %v6500_v18 = vmax.f32 %v6410_v51, 0.0  ;;  %v6413_v6 = vadd.f32 %v7755_v50, %v11569_v34 }
 0x45f   : > { %v6531_v1 = vadd.f32 %v6530_v61, %v6500_v18  ;;  %v6501_v62 = vmax.f32 %v6413_v6, 0.0  ;;  %v7756_v54 = vpop.f32.mrb[136].mxu1 }
 0x460   : > { %v7757_v57 = vpop.f32.mrb[137].mxu1 }
 0x461   : > { %v6532_v32 = vadd.f32 %v6531_v1, %v6501_v62  ;;  %v7758_v42 = vadd.f32 %v7757_v57, %v7756_v54  ;;  %v7759_v14 = vpop.f32.mrb[138].mxu1 }
 0x462   : > { %v7760_v12 = vpop.f32.mrb[139].mxu1  ;;  %v7894_v37 = vpop.f32.mrb[152].mxu0 }
 0x463   : > { %v6418_v29 = vadd.f32 %v7758_v42, %v11580_v28  ;;  %v7761_v33 = vadd.f32 %v7760_v12, %v7759_v14  ;;  %v7895_v35 = vpop.f32.mrb[153].mxu0 }
 0x464   : > { %v11669_v27 = vadd.f32 %v7895_v35, %v7894_v37  ;;  %v7897_v22 = vpop.f32.mrb[154].mxu0 }
 0x465   : > { %v6502_v17 = vmax.f32 %v6418_v29, 0.0  ;;  %v6421_v2 = vadd.f32 %v7761_v33, %v11582_v20  ;;  %v7898_v34 = vpop.f32.mrb[155].mxu0 }
 0x466   : > { %v11672_v24 = vadd.f32 %v7898_v34, %v7897_v22 }
 0x467   : > { %v6533_v8 = vadd.f32 %v6532_v32, %v6502_v17  ;;  %v6503_v19 = vmax.f32 %v6421_v2, 0.0  ;;  %v7762_v56 = vpop.f32.mrb[140].mxu1 }
 0x468   : > { %v7763_v63 = vpop.f32.mrb[141].mxu1 }
 0x469   : > { %v6534_v44 = vadd.f32 %v6533_v8, %v6503_v19  ;;  %v7764_v40 = vadd.f32 %v7763_v63, %v7762_v56  ;;  %v7765_v41 = vpop.f32.mrb[142].mxu1 }
 0x46a   : > { %v7766_v4 = vpop.f32.mrb[143].mxu1 }
 0x46b   : > { %v6426_v28 = vadd.f32 %v7764_v40, %v11591_v23  ;;  %v7767_v59 = vadd.f32 %v7766_v4, %v7765_v41 }
 0x46d   : > { %v6504_v39 = vmax.f32 %v6426_v28, 0.0  ;;  %v6429_v55 = vadd.f32 %v7767_v59, %v11596_v15 }
 0x46f   : > { %v6535_v13 = vadd.f32 %v6534_v44, %v6504_v39  ;;  %v6505_v60 = vmax.f32 %v6429_v55, 0.0  ;;  %v7768_v20 = vpop.f32.mrb[144].mxu1 }
 0x470   : > { %v7769_v25 = vpop.f32.mrb[145].mxu1 }
 0x471   : > { %v6536_v61 = vadd.f32 %v6535_v13, %v6505_v60  ;;  %v7770_v3 = vadd.f32 %v7769_v25, %v7768_v20  ;;  %v7771_v9 = vpop.f32.mrb[146].mxu1 }
 0x472   : > { %v7772_v52 = vpop.f32.mrb[147].mxu1 }
 0x473   : > { %v6434_v51 = vadd.f32 %v7770_v3, %v11600_v43  ;;  %v7773_v50 = vadd.f32 %v7772_v52, %v7771_v9 }
 0x475   : > { %v6506_v18 = vmax.f32 %v6434_v51, 0.0  ;;  %v6437_v6 = vadd.f32 %v7773_v50, %v11604_v45 }
 0x477   : > { %v6537_v1 = vadd.f32 %v6536_v61, %v6506_v18  ;;  %v6507_v23 = vmax.f32 %v6437_v6, 0.0  ;;  %v7774_v62 = vpop.f32.mrb[148].mxu1 }
 0x478   : > { %v7775_v54 = vpop.f32.mrb[149].mxu1 }
 0x479   : > { %v6538_v57 = vadd.f32 %v6537_v1, %v6507_v23  ;;  %v7776_v15 = vadd.f32 %v7775_v54, %v7774_v62  ;;  %v7777_v32 = vpop.f32.mrb[150].mxu1 }
 0x47a   : > { %v7778_v42 = vpop.f32.mrb[151].mxu1 }
 0x47b   : > { %v6442_v14 = vadd.f32 %v7776_v15, %v11608_v16  ;;  %v7779_v12 = vadd.f32 %v7778_v42, %v7777_v32 }
 0x47d   : > { %v6508_v37 = vmax.f32 %v6442_v14, 0.0  ;;  %v6445_v29 = vadd.f32 %v7779_v12, %v11610_v21 }
 0x47f   : > { %v6539_v33 = vadd.f32 %v6538_v57, %v6508_v37  ;;  %v6509_v43 = vmax.f32 %v6445_v29, 0.0  ;;  %v7780_v35 = vpop.f32.mrb[152].mxu1 }
 0x480   : > { %v7781_v22 = vpop.f32.mrb[153].mxu1 }
 0x481   : > { %v6540_v17 = vadd.f32 %v6539_v33, %v6509_v43  ;;  %v7782_v45 = vadd.f32 %v7781_v22, %v7780_v35  ;;  %v7783_v2 = vpop.f32.mrb[154].mxu1 }
 0x482   : > { %v7784_v34 = vpop.f32.mrb[155].mxu1 }
 0x483   : > { %v6450_v8 = vadd.f32 %v7782_v45, %v11614_v0  ;;  %v7785_v19 = vadd.f32 %v7784_v34, %v7783_v2 }
 0x485   : > { %v6510_v56 = vmax.f32 %v6450_v8, 0.0  ;;  %v6453_v63 = vadd.f32 %v7785_v19, %v11616_v10 }
 0x487   : > { %v6541_v44 = vadd.f32 %v6540_v17, %v6510_v56  ;;  %v6511_v16 = vmax.f32 %v6453_v63, 0.0  ;;  %v7786_v40 = vpop.f32.mrb[156].mxu1 }
 0x488   : > { %v7787_v41 = vpop.f32.mrb[157].mxu1 }
 0x489   : > { %v6542_v4 = vadd.f32 %v6541_v44, %v6511_v16  ;;  %v7788_v21 = vadd.f32 %v7787_v41, %v7786_v40  ;;  %v7789_v28 = vpop.f32.mrb[158].mxu1 }
 0x48a   : > { %v7790_v59 = vpop.f32.mrb[159].mxu1 }
 0x48b   : > { %v6458_v39 = vadd.f32 %v7788_v21, %v11620_v31  ;;  %v7791_v55 = vadd.f32 %v7790_v59, %v7789_v28 }
 0x48d   : > { %v6512_v13 = vmax.f32 %v6458_v39, 0.0  ;;  %v6461_v60 = vadd.f32 %v7791_v55, %v11622_v47 }
 0x48f   : > { %v6543_v20 = vadd.f32 %v6542_v4, %v6512_v13  ;;  %v6513_v0 = vmax.f32 %v6461_v60, 0.0  ;;  %v7792_v25 = vpop.f32.mrb[160].mxu1 }
 0x490   : > { %v7793_v61 = vpop.f32.mrb[161].mxu1 }
 0x491   : > { %v6544_v3 = vadd.f32 %v6543_v20, %v6513_v0  ;;  %v7794_v10 = vadd.f32 %v7793_v61, %v7792_v25  ;;  %v7795_v9 = vpop.f32.mrb[162].mxu1 }
 0x492   : > { %v7796_v52 = vpop.f32.mrb[163].mxu1 }
 0x493   : > { %v6466_v51 = vadd.f32 %v7794_v10, %v11626_v48  ;;  %v7797_v50 = vadd.f32 %v7796_v52, %v7795_v9 }
 0x495   : > { %v6514_v18 = vmax.f32 %v6466_v51, 0.0  ;;  %v6469_v6 = vadd.f32 %v7797_v50, %v11628_v53 }
 0x497   : > { %v6545_v1 = vadd.f32 %v6544_v3, %v6514_v18  ;;  %v6515_v31 = vmax.f32 %v6469_v6, 0.0  ;;  %v7798_v23 = vpop.f32.mrb[164].mxu1 }
 0x498   : > { %v7799_v62 = vpop.f32.mrb[165].mxu1 }
 0x499   : > { %v6546_v54 = vadd.f32 %v6545_v1, %v6515_v31  ;;  %v7800_v47 = vadd.f32 %v7799_v62, %v7798_v23  ;;  %v7801_v57 = vpop.f32.mrb[166].mxu1 }
 0x49a   : > { %v7802_v15 = vpop.f32.mrb[167].mxu1 }
 0x49b   : > { %v6474_v32 = vadd.f32 %v7800_v47, %v11632_v26  ;;  %v7803_v42 = vadd.f32 %v7802_v15, %v7801_v57 }
 0x49d   : > { %v6516_v14 = vmax.f32 %v6474_v32, 0.0  ;;  %v6477_v12 = vadd.f32 %v7803_v42, %v11634_v58  ;;  %v8637_v58 = vld [vmem:[%s11716_s6] ss:$0 sm:$0xff] }
 0x49e   : > { %v6887_v63 = vadd.f32 %v8637_v58, %v11649_v30  ;;  %v6895_v13 = vadd.f32 %v8637_v58, %v11656_v5  ;;  %v6898_v61 = vadd.f32 %v8637_v58, %v11658_v49  ;;  %v6903_v51 = vadd.f32 %v8637_v58, %v11662_v46 }
 0x49f   : > { %v6547_v37 = vadd.f32 %v6546_v54, %v6516_v14  ;;  %v6517_v48 = vmax.f32 %v6477_v12, 0.0  ;;  %v7804_v29 = vpop.f32.mrb[168].mxu1  ;;  %v6906_v5 = vadd.f32 %v8637_v58, %v11664_v7 }
 0x4a0   : > { %v7805_v33 = vpop.f32.mrb[169].mxu1 }
 0x4a1   : > { %v6548_v43 = vadd.f32 %v6547_v37, %v6517_v48  ;;  %v7806_v53 = vadd.f32 %v7805_v33, %v7804_v29  ;;  %v7807_v35 = vpop.f32.mrb[170].mxu1 }
 0x4a2   : > { %v7808_v22 = vpop.f32.mrb[171].mxu1 }
 0x4a3   : > { %v6482_v17 = vadd.f32 %v7806_v53, %v11640_v11  ;;  %v7809_v45 = vadd.f32 %v7808_v22, %v7807_v35  ;;  %v6890_v11 = vadd.f32 %v8637_v58, %v11652_v38 }
 0x4a5   : > { %v6518_v2 = vmax.f32 %v6482_v17, 0.0  ;;  %v6485_v34 = vadd.f32 %v7809_v45, %v11642_v36 }
 0x4a7   : > { %v6549_v8 = vadd.f32 %v6548_v43, %v6518_v2  ;;  %v6519_v26 = vmax.f32 %v6485_v34, 0.0  ;;  %v7860_v19 = vpop.f32.mrb[172].mxu1 }
 0x4a8   : > { %v7861_v56 = vpop.f32.mrb[173].mxu1 }
 0x4a9   : > { %v6550_v44 = vadd.f32 %v6549_v8, %v6519_v26  ;;  %v7862_v16 = vadd.f32 %v7861_v56, %v7860_v19  ;;  %v7863_v40 = vpop.f32.mrb[174].mxu1 }
 0x4aa   : > { %v7864_v41 = vpop.f32.mrb[175].mxu1 }
 0x4ab   : > { %v6944_v4 = vadd.f32 %v7862_v16, %v6887_v63  ;;  %v7865_v21 = vadd.f32 %v7864_v41, %v7863_v40  ;;  %v6551_v7 = vrot.slane %v6550_v44, 4 }
 0x4ad   : > { %v7001_v36 = vadd.f32 %v11669_v27, %v6944_v4  ;;  %v6947_v28 = vadd.f32 %v7865_v21, %v6890_v11  ;;  %v6552_v45 = vadd.f32 %v6551_v7, %v6550_v44 }
 0x4af   : > { %v7004_v59 = vadd.f32 %v11672_v24, %v6947_v28  ;;  %v7866_v39 = vpop.f32.mrb[176].mxu1  ;;  %v7023_v60 = vmax.f32 %v7001_v36, 0.0  ;;  %v6553_v19 = vrot.slane %v6552_v45, 2 }
 0x4b0   : > { %v7867_v55 = vpop.f32.mrb[177].mxu1 }
 0x4b1   : > { %v7024_v20 = vmax.f32 %v7004_v59, 0.0  ;;  %v7868_v30 = vadd.f32 %v7867_v55, %v7866_v39  ;;  %v7869_v0 = vpop.f32.mrb[178].mxu1  ;;  %v6554_v63 = vadd.f32 %v6553_v19, %v6552_v45 }
 0x4b2   : > { %v7870_v25 = vpop.f32.mrb[179].mxu1 }
 0x4b3   : > { %v6952_v3 = vadd.f32 %v7868_v30, %v6895_v13  ;;  %v7871_v38 = vadd.f32 %v7870_v25, %v7869_v0  ;;  %v7035_v10 = vadd.f32 %v7024_v20, %v7023_v60  ;;  %v6555_v41 = vrot.slane %v6554_v63, 1 }
 0x4b5   : > { %v6955_v9 = vadd.f32 %v7871_v38, %v6898_v61  ;;  %v6556_v21 = vadd.f32 %v6555_v41, %v6554_v63 }
 0x4b7   : > { %v7872_v52 = vpop.f32.mrb[180].mxu1 }
 0x4b8   : > { %v7873_v27 = vpop.f32.mrb[181].mxu1 }
 0x4b9   : > { %v7874_v24 = vadd.f32 %v7873_v27, %v7872_v52  ;;  %v7875_v50 = vpop.f32.mrb[182].mxu1 }
 0x4ba   : > { %v7876_v18 = vpop.f32.mrb[183].mxu1 }
 0x4bb   : > { %v6960_v6 = vadd.f32 %v7874_v24, %v6903_v51  ;;  %v7877_v1 = vadd.f32 %v7876_v18, %v7875_v50 }
 0x4bd   : > { %v6963_v31 = vadd.f32 %v7877_v1, %v6906_v5 }
 0x4c7   : > { %v7900_v23 = vpop.f32.mrb[184].mxu1 }
 0x4c8   : > { %v7901_v62 = vpop.f32.mrb[185].mxu1 }
 0x4c9   : > { %v7902_v54 = vadd.f32 %v7901_v62, %v7900_v23  ;;  %v7903_v49 = vpop.f32.mrb[186].mxu1 }
 0x4ca   : > { %v7904_v47 = vpop.f32.mrb[187].mxu1 }
 0x4cb   : > { %v7009_v57 = vadd.f32 %v7902_v54, %v6952_v3  ;;  %v7905_v15 = vadd.f32 %v7904_v47, %v7903_v49 }
 0x4cd   : > { %v7025_v32 = vmax.f32 %v7009_v57, 0.0  ;;  %v7012_v42 = vadd.f32 %v7905_v15, %v6955_v9 }
 0x4cf   : > { %v7036_v14 = vadd.f32 %v7035_v10, %v7025_v32  ;;  %v7026_v12 = vmax.f32 %v7012_v42, 0.0  ;;  %v7906_v46 = vpop.f32.mrb[188].mxu1 }
 0x4d0   : > { %v7907_v37 = vpop.f32.mrb[189].mxu1 }
 0x4d1   : > { %v7037_v48 = vadd.f32 %v7036_v14, %v7026_v12  ;;  %v7908_v29 = vadd.f32 %v7907_v37, %v7906_v46  ;;  %v7909_v33 = vpop.f32.mrb[190].mxu1 }
 0x4d2   : > { %v7910_v43 = vpop.f32.mrb[191].mxu1 }
 0x4d3   : > { %v7017_v53 = vadd.f32 %v7908_v29, %v6960_v6  ;;  %v7911_v35 = vadd.f32 %v7910_v43, %v7909_v33 }
 0x4d5   : > { %v7027_v22 = vmax.f32 %v7017_v53, 0.0  ;;  %v7020_v17 = vadd.f32 %v7911_v35, %v6963_v31 }
 0x4d7   : > { %v7038_v2 = vadd.f32 %v7037_v48, %v7027_v22  ;;  %v7028_v34 = vmax.f32 %v7020_v17, 0.0 }
 0x4d9   : > { %v7034_v26 = vsel %vm911_vm7, %v7028_v34, 0.0 }
 0x4da   : > { %v7039_v56 = vadd.f32 %v7038_v2, %v7034_v26 }
 0x4dc   : > { %v7040_v58 = vrot.slane %v7039_v56, 4 }
 0x4de   : > { %v7041_v16 = vadd.f32 %v7040_v58, %v7039_v56 }
 0x4e0   : > { %v7042_v40 = vrot.slane %v7041_v16, 2 }
 0x4e2   : > { %v7043_v11 = vadd.f32 %v7042_v40, %v7041_v16 }
 0x4e4   : > { %v7044_v4 = vrot.slane %v7043_v11, 1 }
 0x4e6   : > { %v7045_v36 = vadd.f32 %v7044_v4, %v7043_v11 }
 0x4e8   : > { %v7046_v28 = vadd.f32 %v7045_v36, %v6556_v21 }
 0x4ea   : > { %v7047_v44 = vmul.f32 0.0033333334, %v7046_v28 }
 0x4ec   : > { %7048 = vst [vmem:[%s289_s29] sm:$0x1] %v7047_v44 }
 0x4ed PF: > { %s18_s24 = sadd.s32 1, %s8676_s24  }
 0x4ee   : > { %p15_p3 = scmp.ge.s32.totalorder %s18_s24, 4  }
 0x4f0   :  { %17 = sbr.rel (!%p15_p3) target bundleno = 1 (0x1), region = 83 }
 0x4f7   :  { %7066 = vsyncpa [#allocation5], 1 }
 0x4f8   :  { %7068 = vsyncpa [#allocation5 + $0x1], 1 }

</bundles_post_ra>
